<compile_context>
chip_gen: v7x
topology: tpu7x:2x2x1
jax: 0.10.0
libtpu: 0.0.40
codegen_flags: <defaults>
</compile_context>

<pallas_src>
import functools

import jax
import jax.numpy as jnp
from jax import lax
from jax.experimental import pallas as pl
from jax.experimental.pallas import tpu as pltpu


_VMEM_LIMIT = 32 * 1024 * 1024      # explicit scoped-VMEM budget (safe on v5e/v6e/v7x)
_EW_BLOCK_BYTES = 2 * 1024 * 1024   # target block bytes for the streaming kernels


# ----------------------------------------------------------------------------
# Kernels
# ----------------------------------------------------------------------------
def _conv3_bn_stats_kernel(x0_ref, x1_ref, x2_ref, w_ref, mask_ref,
                           y_ref, stats_ref, *, hpwp, wp, cout):
    """Direct 3x3x3 conv for one (batch, depth) output plane + fused BN statistics.

    x{0,1,2}_ref : (1, hpwp, cin) bf16  -- padded input planes at depth d-1, d, d+1
    w_ref        : (27, cin, cout) bf16 -- taps ordered (kd, kh, kw)
    mask_ref     : (hpwp, 1) bf16       -- 1 on interior H/W positions, 0 on padding
    y_ref        : (1, hpwp, cout) f32  -- conv output on the padded H/W grid
    stats_ref    : (1, 2, cout) f32     -- per-batch running [sum; sum of squares]
    """
    # Zero the per-batch stats accumulator at the first depth step.
    @pl.when(pl.program_id(1) == 0)
    def _init():
        stats_ref[...] = jnp.zeros_like(stats_ref)

    mask = mask_ref[...]                               # (hpwp, 1) in {0, 1}
    cin = x0_ref.shape[-1]
    zpad = jnp.zeros((wp + 1, cin), x0_ref.dtype)

    # Contiguous [zeros | plane(d-1) | plane(d) | plane(d+1) | zeros] stack so every
    # (kd, kh, kw) tap is a static row slice: an in-register im2col, never in HBM.
    # Masking the planes re-zeroes the H/W halo rows of the previous layer's output.
    xcat = jnp.concatenate(
        [zpad, x0_ref[0] * mask, x1_ref[0] * mask, x2_ref[0] * mask, zpad], axis=0)
    base = wp + 1

    acc = jnp.zeros((hpwp, cout), jnp.float32)
    tap = 0
    for kd in range(3):
        for kh in range(3):
            for kw in range(3):
                start = base + kd * hpwp + (kh - 1) * wp + (kw - 1)
                lhs = xcat[start:start + hpwp, :]              # (hpwp, cin) bf16
                acc = acc + jnp.dot(lhs, w_ref[tap],
                                    preferred_element_type=jnp.float32)
                tap += 1

    maskf = mask.astype(jnp.float32)
    yv = acc * maskf                 # zero halo rows (they only hold shift junk)
    y_ref[0] = yv

    # Fused BatchNorm batch-statistics epilogue (interior rows only).
    psum = jnp.sum(yv, axis=0, keepdims=True)                  # (1, cout)
    psumsq = jnp.sum(yv * yv, axis=0, keepdims=True)           # (1, cout)
    stats_ref[...] += jnp.concatenate([psum, psumsq], axis=0)[None]


def _bn_relu_kernel(y_ref, s_ref, t_ref, o_ref):
    o_ref[...] = jnp.maximum(
        y_ref[...] * s_ref[...] + t_ref[...], 0.0).astype(o_ref.dtype)


def _bn_add_relu_kernel(y_ref, s_ref, t_ref, r_ref, o_ref):
    o_ref[...] = jnp.maximum(
        y_ref[...] * s_ref[...] + t_ref[...] + r_ref[...], 0.0).astype(o_ref.dtype)


# ----------------------------------------------------------------------------
# Pallas wrappers
# ----------------------------------------------------------------------------
def conv3_bn_stats_pallas(xpad_flat, wmat, mask, *, batch, depth, hp, wp):
    """xpad_flat: (batch*(depth+2), hp*wp, cin) bf16, zero-padded in D/H/W, NDHWC."""
    dp = depth + 2
    hpwp = hp * wp
    cin = xpad_flat.shape[-1]
    cout = wmat.shape[-1]

    def xmap(kd):
        # block size 1 along the flattened (batch, padded-depth) axis, so the block
        # index is an element index: padded depth planes d+kd for output depth d.
        return lambda nb, nd, kd=kd: (nb * dp + nd + kd, 0, 0)

    kernel = functools.partial(_conv3_bn_stats_kernel, hpwp=hpwp, wp=wp, cout=cout)
    return pl.pallas_call(
        kernel,
        out_shape=(jax.ShapeDtypeStruct((batch * depth, hpwp, cout), jnp.float32),
                   jax.ShapeDtypeStruct((batch, 2, cout), jnp.float32)),
        grid_spec=pltpu.PrefetchScalarGridSpec(
            num_scalar_prefetch=0,
            grid=(batch, depth),
            in_specs=[
                pl.BlockSpec((1, hpwp, cin), xmap(0)),
                pl.BlockSpec((1, hpwp, cin), xmap(1)),
                pl.BlockSpec((1, hpwp, cin), xmap(2)),
                # constant index map -> fetched once, stays resident across the grid
                pl.BlockSpec((27, cin, cout), lambda nb, nd: (0, 0, 0)),
                pl.BlockSpec((hpwp, 1), lambda nb, nd: (0, 0)),
            ],
            out_specs=(
                pl.BlockSpec((1, hpwp, cout), lambda nb, nd: (nb * depth + nd, 0, 0)),
                pl.BlockSpec((1, 2, cout), lambda nb, nd: (nb, 0, 0)),
            ),
        ),
        compiler_params=pltpu.CompilerParams(
            dimension_semantics=("parallel", "arbitrary"),
            vmem_limit_bytes=_VMEM_LIMIT),
    )(xpad_flat, xpad_flat, xpad_flat, wmat, mask)


def _pick_row_tile(rows, row_bytes, budget=_EW_BLOCK_BYTES):
    """Largest row tile (multiple of 8, dividing `rows`) whose block fits `budget`."""
    if rows * row_bytes <= budget:
        return rows
    cap = min(rows, max(8, budget // row_bytes))
    for t in range(cap - cap % 8, 7, -8):
        if rows % t == 0:
            return t
    return rows  # tiny/awkward shapes: fall back to a single block


def bn_relu_pallas(y_flat, scale_row, shift_row, out_dtype):
    rows, lanes = y_flat.shape
    tr = _pick_row_tile(rows, lanes * 4)
    return pl.pallas_call(
        _bn_relu_kernel,
        out_shape=jax.ShapeDtypeStruct((rows, lanes), out_dtype),
        grid_spec=pltpu.PrefetchScalarGridSpec(
            num_scalar_prefetch=0,
            grid=(rows // tr,),
            in_specs=[
                pl.BlockSpec((tr, lanes), lambda i: (i, 0)),
                pl.BlockSpec((1, lanes), lambda i: (0, 0)),
                pl.BlockSpec((1, lanes), lambda i: (0, 0)),
            ],
            out_specs=pl.BlockSpec((tr, lanes), lambda i: (i, 0)),
        ),
        compiler_params=pltpu.CompilerParams(
            dimension_semantics=("parallel",), vmem_limit_bytes=_VMEM_LIMIT),
    )(y_flat, scale_row, shift_row)


def bn_add_relu_pallas(y_flat, scale_row, shift_row, residual_flat):
    rows, lanes = y_flat.shape
    tr = _pick_row_tile(rows, lanes * 4)
    return pl.pallas_call(
        _bn_add_relu_kernel,
        out_shape=jax.ShapeDtypeStruct((rows, lanes), jnp.float32),
        grid_spec=pltpu.PrefetchScalarGridSpec(
            num_scalar_prefetch=0,
            grid=(rows // tr,),
            in_specs=[
                pl.BlockSpec((tr, lanes), lambda i: (i, 0)),
                pl.BlockSpec((1, lanes), lambda i: (0, 0)),
                pl.BlockSpec((1, lanes), lambda i: (0, 0)),
                pl.BlockSpec((tr, lanes), lambda i: (i, 0)),
            ],
            out_specs=pl.BlockSpec((tr, lanes), lambda i: (i, 0)),
        ),
        compiler_params=pltpu.CompilerParams(
            dimension_semantics=("parallel",), vmem_limit_bytes=_VMEM_LIMIT),
    )(y_flat, scale_row, shift_row, residual_flat)


# ----------------------------------------------------------------------------
# JAX glue: layout, weight repacking, BN fold
# ----------------------------------------------------------------------------
def _weight_taps(w_oidhw):
    # (Cout, Cin, 3, 3, 3) -> (27, Cin, Cout), tap order (kd, kh, kw), bf16.
    cout, cin = w_oidhw.shape[0], w_oidhw.shape[1]
    return jnp.transpose(w_oidhw, (2, 3, 4, 1, 0)).reshape(27, cin, cout) \
        .astype(jnp.bfloat16)


def _border_mask(hp, wp):
    hi = lax.broadcasted_iota(jnp.int32, (hp, wp), 0)
    wi = lax.broadcasted_iota(jnp.int32, (hp, wp), 1)
    valid = (hi >= 1) & (hi <= hp - 2) & (wi >= 1) & (wi <= wp - 2)
    return valid.reshape(hp * wp, 1).astype(jnp.bfloat16)


def _fold_width(c):
    if c % 128 == 0:
        return c
    assert 128 % c == 0, f"channel count {c} must divide 128 or be a multiple of it"
    return 128


def _fold_bn(stats, count, gamma, beta, eps, reps):
    # TODO(synk): E[x^2]-E[x]^2 in f32 can lose precision for very large counts /
    # activation means; a centered (Welford-style) pass would be more robust.
    s = jnp.sum(stats, axis=0)                                  # (2, C)
    mean = s[0] / count
    var = jnp.maximum(s[1] / count - mean * mean, 0.0)          # biased var (train BN)
    scale = gamma * lax.rsqrt(var + eps)
    shift = beta - mean * scale
    return (jnp.tile(scale, reps)[None].astype(jnp.float32),
            jnp.tile(shift, reps)[None].astype(jnp.float32))


# ----------------------------------------------------------------------------
# BasicBlock forward (Pallas) — stride=1, downsample=None path
# ----------------------------------------------------------------------------
@functools.partial(jax.jit, static_argnames=("stride", "eps"))
def basic_block_pallas(x_ncdhw, params, stride=1, eps=1e-5):
    assert stride == 1, "downsample=None requires stride=1 (identity residual)"
    n, cin, d, h, w = x_ncdhw.shape
    planes = params["w1"].shape[0]
    assert planes == cin, "downsample=None requires planes == in_planes"
    hp, wp, dp = h + 2, w + 2, d + 2
    hpwp = hp * wp
    lanes = _fold_width(planes)         # lane width of the folded elementwise layout
    reps = lanes // planes
    count = n * d * h * w

    # channels-last, zero-padded in H/W: (n, d, hp*wp, c)
    x_nl = jnp.transpose(x_ncdhw, (0, 2, 3, 4, 1)).astype(jnp.float32)
    xpad_hw = jnp.pad(x_nl, ((0, 0), (0, 0), (1, 1), (1, 1), (0, 0))) \
        .reshape(n, d, hpwp, cin)
    mask = _border_mask(hp, wp)

    def dpad_flat_bf16(a):   # (n, d, hpwp, c) -> (n*(d+2), hpwp, c) bf16, zero D halo
        return jnp.pad(a.astype(jnp.bfloat16),
                       ((0, 0), (1, 1), (0, 0), (0, 0))).reshape(n * dp, hpwp, -1)

    w1 = _weight_taps(params["w1"])
    w2 = _weight_taps(params["w2"])

    # conv1 (+ fused BN1 batch statistics)
    y1, st1 = conv3_bn_stats_pallas(dpad_flat_bf16(xpad_hw), w1, mask,
                                    batch=n, depth=d, hp=hp, wp=wp)
    s1, t1 = _fold_bn(st1, count, params["g1"], params["b1"], eps, reps)
    h1 = bn_relu_pallas(y1.reshape(-1, lanes), s1, t1, jnp.bfloat16)   # bf16 act.

    # conv2 (+ fused BN2 batch statistics); halo rows of h1 are re-zeroed in-kernel
    h1_l = h1.reshape(n, d, hpwp, planes)
    y2, st2 = conv3_bn_stats_pallas(dpad_flat_bf16(h1_l), w2, mask,
                                    batch=n, depth=d, hp=hp, wp=wp)
    s2, t2 = _fold_bn(st2, count, params["g2"], params["b2"], eps, reps)

    out = bn_add_relu_pallas(y2.reshape(-1, lanes), s2, t2,
                             xpad_hw.reshape(-1, lanes))
    out = out.reshape(n, d, hp, wp, planes)[:, :, 1:hp - 1, 1:wp - 1, :]
    return jnp.transpose(out, (0, 4, 1, 2, 3))                         # back to NCDHW


# ----------------------------------------------------------------------------
# Pure-JAX reference (PyTorch semantics; optional matching bf16 casts)
# ----------------------------------------------------------------------------
def basic_block_reference(x, params, eps=1e-5, cast_bf16=True):
    def cast(a):
        return a.astype(jnp.bfloat16) if cast_bf16 else a

    def conv(a, wgt):
        return lax.conv_general_dilated(
            cast(a), cast(wgt), (1, 1, 1), [(1, 1)] * 3,
            dimension_numbers=("NCDHW", "OIDHW", "NCDHW"),
            preferred_element_type=jnp.float32)

    def bn(y, g, b):
        mean = y.mean(axis=(0, 2, 3, 4), keepdims=True)
        var = y.var(axis=(0, 2, 3, 4), keepdims=True)   # biased, as BN normalization
        return (y - mean) * lax.rsqrt(var + eps) * g.reshape(1, -1, 1, 1, 1) \
            + b.reshape(1, -1, 1, 1, 1)

    out = jnp.maximum(bn(conv(x, params["w1"]), params["g1"], params["b1"]), 0.0)
    out = bn(conv(out, params["w2"]), params["g2"], params["b2"])
    return jnp.maximum(out + x.astype(jnp.float32), 0.0)


# ----------------------------------------------------------------------------
if __name__ == "__main__":
    key = jax.random.PRNGKey(0)
    N, C, D, H, W = 2, 64, 8, 8, 8          # in_planes = planes = 64, stride = 1
    planes = C
    ks = jax.random.split(key, 7)

    x = jax.random.normal(ks[0], (N, C, D, H, W), jnp.float32)
    params = {
        "w1": 0.1 * jax.random.normal(ks[1], (planes, C, 3, 3, 3), jnp.float32),
        "g1": 1.0 + 0.1 * jax.random.normal(ks[2], (planes,), jnp.float32),
        "b1": 0.1 * jax.random.normal(ks[3], (planes,), jnp.float32),
        "w2": 0.1 * jax.random.normal(ks[4], (planes, planes, 3, 3, 3), jnp.float32),
        "g2": 1.0 + 0.1 * jax.random.normal(ks[5], (planes,), jnp.float32),
        "b2": 0.1 * jax.random.normal(ks[6], (planes,), jnp.float32),
    }

    out = jax.block_until_ready(basic_block_pallas(x, params))
    assert out.shape == (N, planes, D, H, W)

    # Tight check vs a reference with matching bf16 operand casts; loose check vs the
    # pure-f32 PyTorch-semantics reference (bounds the bf16 quantization error).
    ref_b = basic_block_reference(x, params, cast_bf16=True)
    ref_f = basic_block_reference(x, params, cast_bf16=False)
    err_b = float(jnp.max(jnp.abs(out - ref_b)))
    err_f = float(jnp.max(jnp.abs(out - ref_f)))
    if err_b > 2e-2:
        raise AssertionError(f"mismatch vs bf16-matched reference, max abs err = {err_b}")
    if err_f > 2.5e-1:
        raise AssertionError(f"mismatch vs f32 reference, max abs err = {err_f}")

    print("KERNEL_OK")
</pallas_src>

<mosaic_0001>
module attributes {stable_mosaic.version = 11 : i64} {
  func.func @_conv3_bn_stats_kernel(%arg0: i32, %arg1: i32, %arg2: memref<1x100x64xbf16, #tpu.memory_space<vmem>>, %arg3: memref<1x100x64xbf16, #tpu.memory_space<vmem>>, %arg4: memref<1x100x64xbf16, #tpu.memory_space<vmem>>, %arg5: memref<27x64x64xbf16, #tpu.memory_space<vmem>>, %arg6: memref<100x1xbf16, #tpu.memory_space<vmem>>, %arg7: memref<1x100x64xf32, #tpu.memory_space<vmem>>, %arg8: memref<1x2x64xf32, #tpu.memory_space<vmem>>) attributes {dimension_semantics = [#tpu.dimension_semantics<parallel>, #tpu.dimension_semantics<arbitrary>], iteration_bounds = array<i64: 2, 8>, scalar_prefetch = 0 : i64, scratch_operands = 0 : i64, tpu.core_type = #tpu.core_type<tc>, window_params = [{transform_indices = @transform_0, window_bounds = array<i64: 1, 100, 64>}, {transform_indices = @transform_1, window_bounds = array<i64: 1, 100, 64>}, {transform_indices = @transform_2, window_bounds = array<i64: 1, 100, 64>}, {pipeline_mode = #tpu.pipeline_mode<synchronous>, transform_indices = @transform_3, window_bounds = array<i64: 27, 64, 64>}, {pipeline_mode = #tpu.pipeline_mode<synchronous>, transform_indices = @transform_4, window_bounds = array<i64: 100, 1>}, {transform_indices = @transform_5, window_bounds = array<i64: 1, 100, 64>}, {transform_indices = @transform_6, window_bounds = array<i64: 1, 2, 64>}]} {
    %c0_i32 = arith.constant 0 : i32
    %0 = arith.cmpi eq, %arg1, %c0_i32 : i32
    %1 = arith.extui %0 : i1 to i32
    %c0_i32_0 = arith.constant 0 : i32
    %2 = arith.cmpi ne, %1, %c0_i32_0 : i32
    scf.if %2 {
      %cst_105 = arith.constant 0.000000e+00 : f32
      %170 = vector.broadcast %cst_105 : f32 to vector<1x2x64xf32>
      %c0_106 = arith.constant 0 : index
      %c0_107 = arith.constant 0 : index
      %c0_108 = arith.constant 0 : index
      %171 = vector.load %arg8[%c0_106, %c0_107, %c0_108] : memref<1x2x64xf32, #tpu.memory_space<vmem>>, vector<1x2x64xf32>
      tpu.vector_store %arg8[%c0_106, %c0_107, %c0_108], %170 {strides = array<i32>} : memref<1x2x64xf32, #tpu.memory_space<vmem>>, vector<1x2x64xf32>,
    } else {
    }
    %c0 = arith.constant 0 : index
    %c0_1 = arith.constant 0 : index
    %3 = vector.load %arg6[%c0, %c0_1] : memref<100x1xbf16, #tpu.memory_space<vmem>>, vector<100x1xbf16>
    %cst = arith.constant 0.000000e+00 : bf16
    %4 = vector.broadcast %cst : bf16 to vector<11x64xbf16>
    %c0_2 = arith.constant 0 : index
    %c0_3 = arith.constant 0 : index
    %c0_4 = arith.constant 0 : index
    %5 = vector.load %arg2[%c0_2, %c0_3, %c0_4] : memref<1x100x64xbf16, #tpu.memory_space<vmem>>, vector<1x100x64xbf16>
    %6 = vector.shape_cast %5 : vector<1x100x64xbf16> to vector<100x64xbf16>
    %7 = vector.broadcast %3 : vector<100x1xbf16> to vector<100x64xbf16>
    %8 = arith.mulf %6, %7 : vector<100x64xbf16>
    %c0_5 = arith.constant 0 : index
    %c0_6 = arith.constant 0 : index
    %c0_7 = arith.constant 0 : index
    %9 = vector.load %arg3[%c0_5, %c0_6, %c0_7] : memref<1x100x64xbf16, #tpu.memory_space<vmem>>, vector<1x100x64xbf16>
    %10 = vector.shape_cast %9 : vector<1x100x64xbf16> to vector<100x64xbf16>
    %11 = vector.broadcast %3 : vector<100x1xbf16> to vector<100x64xbf16>
    %12 = arith.mulf %10, %11 : vector<100x64xbf16>
    %c0_8 = arith.constant 0 : index
    %c0_9 = arith.constant 0 : index
    %c0_10 = arith.constant 0 : index
    %13 = vector.load %arg4[%c0_8, %c0_9, %c0_10] : memref<1x100x64xbf16, #tpu.memory_space<vmem>>, vector<1x100x64xbf16>
    %14 = vector.shape_cast %13 : vector<1x100x64xbf16> to vector<100x64xbf16>
    %15 = vector.broadcast %3 : vector<100x1xbf16> to vector<100x64xbf16>
    %16 = arith.mulf %14, %15 : vector<100x64xbf16>
    %17 = tpu.concatenate %4, %8, %12, %16, %4 in 0 : vector<11x64xbf16>, vector<100x64xbf16>, vector<100x64xbf16>, vector<100x64xbf16>, vector<11x64xbf16> -> vector<322x64xbf16>
    %cst_11 = arith.constant 0.000000e+00 : f32
    %18 = vector.broadcast %cst_11 : f32 to vector<100x64xf32>
    %19 = vector.extract_strided_slice %17 {offsets = [0, 0], sizes = [100, 64], strides = [1, 1]} : vector<322x64xbf16> to vector<100x64xbf16>
    %c0_12 = arith.constant 0 : index
    %c0_13 = arith.constant 0 : index
    %c0_14 = arith.constant 0 : index
    %20 = vector.load %arg5[%c0_12, %c0_13, %c0_14] : memref<27x64x64xbf16, #tpu.memory_space<vmem>>, vector<1x64x64xbf16>
    %21 = vector.shape_cast %20 : vector<1x64x64xbf16> to vector<64x64xbf16>
    %cst_15 = arith.constant dense<0.000000e+00> : vector<100x64xf32>
    %22 = tpu.matmul %19, %21, %cst_15 {dimension_numbers = #tpu.dot_dimension_numbers<[1], [0], [0], [1], [0, 0, 1, 1], [], []>} : vector<100x64xbf16>, vector<64x64xbf16>, vector<100x64xf32> -> vector<100x64xf32>
    %23 = arith.addf %18, %22 : vector<100x64xf32>
    %24 = vector.extract_strided_slice %17 {offsets = [1, 0], sizes = [100, 64], strides = [1, 1]} : vector<322x64xbf16> to vector<100x64xbf16>
    %c1 = arith.constant 1 : index
    %c0_16 = arith.constant 0 : index
    %c0_17 = arith.constant 0 : index
    %25 = vector.load %arg5[%c1, %c0_16, %c0_17] : memref<27x64x64xbf16, #tpu.memory_space<vmem>>, vector<1x64x64xbf16>
    %26 = vector.shape_cast %25 : vector<1x64x64xbf16> to vector<64x64xbf16>
    %cst_18 = arith.constant dense<0.000000e+00> : vector<100x64xf32>
    %27 = tpu.matmul %24, %26, %cst_18 {dimension_numbers = #tpu.dot_dimension_numbers<[1], [0], [0], [1], [0, 0, 1, 1], [], []>} : vector<100x64xbf16>, vector<64x64xbf16>, vector<100x64xf32> -> vector<100x64xf32>
    %28 = arith.addf %23, %27 : vector<100x64xf32>
    %29 = vector.extract_strided_slice %17 {offsets = [2, 0], sizes = [100, 64], strides = [1, 1]} : vector<322x64xbf16> to vector<100x64xbf16>
    %c2 = arith.constant 2 : index
    %c0_19 = arith.constant 0 : index
    %c0_20 = arith.constant 0 : index
    %30 = vector.load %arg5[%c2, %c0_19, %c0_20] : memref<27x64x64xbf16, #tpu.memory_space<vmem>>, vector<1x64x64xbf16>
    %31 = vector.shape_cast %30 : vector<1x64x64xbf16> to vector<64x64xbf16>
    %cst_21 = arith.constant dense<0.000000e+00> : vector<100x64xf32>
    %32 = tpu.matmul %29, %31, %cst_21 {dimension_numbers = #tpu.dot_dimension_numbers<[1], [0], [0], [1], [0, 0, 1, 1], [], []>} : vector<100x64xbf16>, vector<64x64xbf16>, vector<100x64xf32> -> vector<100x64xf32>
    %33 = arith.addf %28, %32 : vector<100x64xf32>
    %34 = vector.extract_strided_slice %17 {offsets = [10, 0], sizes = [100, 64], strides = [1, 1]} : vector<322x64xbf16> to vector<100x64xbf16>
    %c3 = arith.constant 3 : index
    %c0_22 = arith.constant 0 : index
    %c0_23 = arith.constant 0 : index
    %35 = vector.load %arg5[%c3, %c0_22, %c0_23] : memref<27x64x64xbf16, #tpu.memory_space<vmem>>, vector<1x64x64xbf16>
    %36 = vector.shape_cast %35 : vector<1x64x64xbf16> to vector<64x64xbf16>
    %cst_24 = arith.constant dense<0.000000e+00> : vector<100x64xf32>
    %37 = tpu.matmul %34, %36, %cst_24 {dimension_numbers = #tpu.dot_dimension_numbers<[1], [0], [0], [1], [0, 0, 1, 1], [], []>} : vector<100x64xbf16>, vector<64x64xbf16>, vector<100x64xf32> -> vector<100x64xf32>
    %38 = arith.addf %33, %37 : vector<100x64xf32>
    %39 = vector.extract_strided_slice %17 {offsets = [11, 0], sizes = [100, 64], strides = [1, 1]} : vector<322x64xbf16> to vector<100x64xbf16>
    %c4 = arith.constant 4 : index
    %c0_25 = arith.constant 0 : index
    %c0_26 = arith.constant 0 : index
    %40 = vector.load %arg5[%c4, %c0_25, %c0_26] : memref<27x64x64xbf16, #tpu.memory_space<vmem>>, vector<1x64x64xbf16>
    %41 = vector.shape_cast %40 : vector<1x64x64xbf16> to vector<64x64xbf16>
    %cst_27 = arith.constant dense<0.000000e+00> : vector<100x64xf32>
    %42 = tpu.matmul %39, %41, %cst_27 {dimension_numbers = #tpu.dot_dimension_numbers<[1], [0], [0], [1], [0, 0, 1, 1], [], []>} : vector<100x64xbf16>, vector<64x64xbf16>, vector<100x64xf32> -> vector<100x64xf32>
    %43 = arith.addf %38, %42 : vector<100x64xf32>
    %44 = vector.extract_strided_slice %17 {offsets = [12, 0], sizes = [100, 64], strides = [1, 1]} : vector<322x64xbf16> to vector<100x64xbf16>
    %c5 = arith.constant 5 : index
    %c0_28 = arith.constant 0 : index
    %c0_29 = arith.constant 0 : index
    %45 = vector.load %arg5[%c5, %c0_28, %c0_29] : memref<27x64x64xbf16, #tpu.memory_space<vmem>>, vector<1x64x64xbf16>
    %46 = vector.shape_cast %45 : vector<1x64x64xbf16> to vector<64x64xbf16>
    %cst_30 = arith.constant dense<0.000000e+00> : vector<100x64xf32>
    %47 = tpu.matmul %44, %46, %cst_30 {dimension_numbers = #tpu.dot_dimension_numbers<[1], [0], [0], [1], [0, 0, 1, 1], [], []>} : vector<100x64xbf16>, vector<64x64xbf16>, vector<100x64xf32> -> vector<100x64xf32>
    %48 = arith.addf %43, %47 : vector<100x64xf32>
    %49 = vector.extract_strided_slice %17 {offsets = [20, 0], sizes = [100, 64], strides = [1, 1]} : vector<322x64xbf16> to vector<100x64xbf16>
    %c6 = arith.constant 6 : index
    %c0_31 = arith.constant 0 : index
    %c0_32 = arith.constant 0 : index
    %50 = vector.load %arg5[%c6, %c0_31, %c0_32] : memref<27x64x64xbf16, #tpu.memory_space<vmem>>, vector<1x64x64xbf16>
    %51 = vector.shape_cast %50 : vector<1x64x64xbf16> to vector<64x64xbf16>
    %cst_33 = arith.constant dense<0.000000e+00> : vector<100x64xf32>
    %52 = tpu.matmul %49, %51, %cst_33 {dimension_numbers = #tpu.dot_dimension_numbers<[1], [0], [0], [1], [0, 0, 1, 1], [], []>} : vector<100x64xbf16>, vector<64x64xbf16>, vector<100x64xf32> -> vector<100x64xf32>
    %53 = arith.addf %48, %52 : vector<100x64xf32>
    %54 = vector.extract_strided_slice %17 {offsets = [21, 0], sizes = [100, 64], strides = [1, 1]} : vector<322x64xbf16> to vector<100x64xbf16>
    %c7 = arith.constant 7 : index
    %c0_34 = arith.constant 0 : index
    %c0_35 = arith.constant 0 : index
    %55 = vector.load %arg5[%c7, %c0_34, %c0_35] : memref<27x64x64xbf16, #tpu.memory_space<vmem>>, vector<1x64x64xbf16>
    %56 = vector.shape_cast %55 : vector<1x64x64xbf16> to vector<64x64xbf16>
    %cst_36 = arith.constant dense<0.000000e+00> : vector<100x64xf32>
    %57 = tpu.matmul %54, %56, %cst_36 {dimension_numbers = #tpu.dot_dimension_numbers<[1], [0], [0], [1], [0, 0, 1, 1], [], []>} : vector<100x64xbf16>, vector<64x64xbf16>, vector<100x64xf32> -> vector<100x64xf32>
    %58 = arith.addf %53, %57 : vector<100x64xf32>
    %59 = vector.extract_strided_slice %17 {offsets = [22, 0], sizes = [100, 64], strides = [1, 1]} : vector<322x64xbf16> to vector<100x64xbf16>
    %c8 = arith.constant 8 : index
    %c0_37 = arith.constant 0 : index
    %c0_38 = arith.constant 0 : index
    %60 = vector.load %arg5[%c8, %c0_37, %c0_38] : memref<27x64x64xbf16, #tpu.memory_space<vmem>>, vector<1x64x64xbf16>
    %61 = vector.shape_cast %60 : vector<1x64x64xbf16> to vector<64x64xbf16>
    %cst_39 = arith.constant dense<0.000000e+00> : vector<100x64xf32>
    %62 = tpu.matmul %59, %61, %cst_39 {dimension_numbers = #tpu.dot_dimension_numbers<[1], [0], [0], [1], [0, 0, 1, 1], [], []>} : vector<100x64xbf16>, vector<64x64xbf16>, vector<100x64xf32> -> vector<100x64xf32>
    %63 = arith.addf %58, %62 : vector<100x64xf32>
    %64 = vector.extract_strided_slice %17 {offsets = [100, 0], sizes = [100, 64], strides = [1, 1]} : vector<322x64xbf16> to vector<100x64xbf16>
    %c9 = arith.constant 9 : index
    %c0_40 = arith.constant 0 : index
    %c0_41 = arith.constant 0 : index
    %65 = vector.load %arg5[%c9, %c0_40, %c0_41] : memref<27x64x64xbf16, #tpu.memory_space<vmem>>, vector<1x64x64xbf16>
    %66 = vector.shape_cast %65 : vector<1x64x64xbf16> to vector<64x64xbf16>
    %cst_42 = arith.constant dense<0.000000e+00> : vector<100x64xf32>
    %67 = tpu.matmul %64, %66, %cst_42 {dimension_numbers = #tpu.dot_dimension_numbers<[1], [0], [0], [1], [0, 0, 1, 1], [], []>} : vector<100x64xbf16>, vector<64x64xbf16>, vector<100x64xf32> -> vector<100x64xf32>
    %68 = arith.addf %63, %67 : vector<100x64xf32>
    %69 = vector.extract_strided_slice %17 {offsets = [101, 0], sizes = [100, 64], strides = [1, 1]} : vector<322x64xbf16> to vector<100x64xbf16>
    %c10 = arith.constant 10 : index
    %c0_43 = arith.constant 0 : index
    %c0_44 = arith.constant 0 : index
    %70 = vector.load %arg5[%c10, %c0_43, %c0_44] : memref<27x64x64xbf16, #tpu.memory_space<vmem>>, vector<1x64x64xbf16>
    %71 = vector.shape_cast %70 : vector<1x64x64xbf16> to vector<64x64xbf16>
    %cst_45 = arith.constant dense<0.000000e+00> : vector<100x64xf32>
    %72 = tpu.matmul %69, %71, %cst_45 {dimension_numbers = #tpu.dot_dimension_numbers<[1], [0], [0], [1], [0, 0, 1, 1], [], []>} : vector<100x64xbf16>, vector<64x64xbf16>, vector<100x64xf32> -> vector<100x64xf32>
    %73 = arith.addf %68, %72 : vector<100x64xf32>
    %74 = vector.extract_strided_slice %17 {offsets = [102, 0], sizes = [100, 64], strides = [1, 1]} : vector<322x64xbf16> to vector<100x64xbf16>
    %c11 = arith.constant 11 : index
    %c0_46 = arith.constant 0 : index
    %c0_47 = arith.constant 0 : index
    %75 = vector.load %arg5[%c11, %c0_46, %c0_47] : memref<27x64x64xbf16, #tpu.memory_space<vmem>>, vector<1x64x64xbf16>
    %76 = vector.shape_cast %75 : vector<1x64x64xbf16> to vector<64x64xbf16>
    %cst_48 = arith.constant dense<0.000000e+00> : vector<100x64xf32>
    %77 = tpu.matmul %74, %76, %cst_48 {dimension_numbers = #tpu.dot_dimension_numbers<[1], [0], [0], [1], [0, 0, 1, 1], [], []>} : vector<100x64xbf16>, vector<64x64xbf16>, vector<100x64xf32> -> vector<100x64xf32>
    %78 = arith.addf %73, %77 : vector<100x64xf32>
    %79 = vector.extract_strided_slice %17 {offsets = [110, 0], sizes = [100, 64], strides = [1, 1]} : vector<322x64xbf16> to vector<100x64xbf16>
    %c12 = arith.constant 12 : index
    %c0_49 = arith.constant 0 : index
    %c0_50 = arith.constant 0 : index
    %80 = vector.load %arg5[%c12, %c0_49, %c0_50] : memref<27x64x64xbf16, #tpu.memory_space<vmem>>, vector<1x64x64xbf16>
    %81 = vector.shape_cast %80 : vector<1x64x64xbf16> to vector<64x64xbf16>
    %cst_51 = arith.constant dense<0.000000e+00> : vector<100x64xf32>
    %82 = tpu.matmul %79, %81, %cst_51 {dimension_numbers = #tpu.dot_dimension_numbers<[1], [0], [0], [1], [0, 0, 1, 1], [], []>} : vector<100x64xbf16>, vector<64x64xbf16>, vector<100x64xf32> -> vector<100x64xf32>
    %83 = arith.addf %78, %82 : vector<100x64xf32>
    %84 = vector.extract_strided_slice %17 {offsets = [111, 0], sizes = [100, 64], strides = [1, 1]} : vector<322x64xbf16> to vector<100x64xbf16>
    %c13 = arith.constant 13 : index
    %c0_52 = arith.constant 0 : index
    %c0_53 = arith.constant 0 : index
    %85 = vector.load %arg5[%c13, %c0_52, %c0_53] : memref<27x64x64xbf16, #tpu.memory_space<vmem>>, vector<1x64x64xbf16>
    %86 = vector.shape_cast %85 : vector<1x64x64xbf16> to vector<64x64xbf16>
    %cst_54 = arith.constant dense<0.000000e+00> : vector<100x64xf32>
    %87 = tpu.matmul %84, %86, %cst_54 {dimension_numbers = #tpu.dot_dimension_numbers<[1], [0], [0], [1], [0, 0, 1, 1], [], []>} : vector<100x64xbf16>, vector<64x64xbf16>, vector<100x64xf32> -> vector<100x64xf32>
    %88 = arith.addf %83, %87 : vector<100x64xf32>
    %89 = vector.extract_strided_slice %17 {offsets = [112, 0], sizes = [100, 64], strides = [1, 1]} : vector<322x64xbf16> to vector<100x64xbf16>
    %c14 = arith.constant 14 : index
    %c0_55 = arith.constant 0 : index
    %c0_56 = arith.constant 0 : index
    %90 = vector.load %arg5[%c14, %c0_55, %c0_56] : memref<27x64x64xbf16, #tpu.memory_space<vmem>>, vector<1x64x64xbf16>
    %91 = vector.shape_cast %90 : vector<1x64x64xbf16> to vector<64x64xbf16>
    %cst_57 = arith.constant dense<0.000000e+00> : vector<100x64xf32>
    %92 = tpu.matmul %89, %91, %cst_57 {dimension_numbers = #tpu.dot_dimension_numbers<[1], [0], [0], [1], [0, 0, 1, 1], [], []>} : vector<100x64xbf16>, vector<64x64xbf16>, vector<100x64xf32> -> vector<100x64xf32>
    %93 = arith.addf %88, %92 : vector<100x64xf32>
    %94 = vector.extract_strided_slice %17 {offsets = [120, 0], sizes = [100, 64], strides = [1, 1]} : vector<322x64xbf16> to vector<100x64xbf16>
    %c15 = arith.constant 15 : index
    %c0_58 = arith.constant 0 : index
    %c0_59 = arith.constant 0 : index
    %95 = vector.load %arg5[%c15, %c0_58, %c0_59] : memref<27x64x64xbf16, #tpu.memory_space<vmem>>, vector<1x64x64xbf16>
    %96 = vector.shape_cast %95 : vector<1x64x64xbf16> to vector<64x64xbf16>
    %cst_60 = arith.constant dense<0.000000e+00> : vector<100x64xf32>
    %97 = tpu.matmul %94, %96, %cst_60 {dimension_numbers = #tpu.dot_dimension_numbers<[1], [0], [0], [1], [0, 0, 1, 1], [], []>} : vector<100x64xbf16>, vector<64x64xbf16>, vector<100x64xf32> -> vector<100x64xf32>
    %98 = arith.addf %93, %97 : vector<100x64xf32>
    %99 = vector.extract_strided_slice %17 {offsets = [121, 0], sizes = [100, 64], strides = [1, 1]} : vector<322x64xbf16> to vector<100x64xbf16>
    %c16 = arith.constant 16 : index
    %c0_61 = arith.constant 0 : index
    %c0_62 = arith.constant 0 : index
    %100 = vector.load %arg5[%c16, %c0_61, %c0_62] : memref<27x64x64xbf16, #tpu.memory_space<vmem>>, vector<1x64x64xbf16>
    %101 = vector.shape_cast %100 : vector<1x64x64xbf16> to vector<64x64xbf16>
    %cst_63 = arith.constant dense<0.000000e+00> : vector<100x64xf32>
    %102 = tpu.matmul %99, %101, %cst_63 {dimension_numbers = #tpu.dot_dimension_numbers<[1], [0], [0], [1], [0, 0, 1, 1], [], []>} : vector<100x64xbf16>, vector<64x64xbf16>, vector<100x64xf32> -> vector<100x64xf32>
    %103 = arith.addf %98, %102 : vector<100x64xf32>
    %104 = vector.extract_strided_slice %17 {offsets = [122, 0], sizes = [100, 64], strides = [1, 1]} : vector<322x64xbf16> to vector<100x64xbf16>
    %c17 = arith.constant 17 : index
    %c0_64 = arith.constant 0 : index
    %c0_65 = arith.constant 0 : index
    %105 = vector.load %arg5[%c17, %c0_64, %c0_65] : memref<27x64x64xbf16, #tpu.memory_space<vmem>>, vector<1x64x64xbf16>
    %106 = vector.shape_cast %105 : vector<1x64x64xbf16> to vector<64x64xbf16>
    %cst_66 = arith.constant dense<0.000000e+00> : vector<100x64xf32>
    %107 = tpu.matmul %104, %106, %cst_66 {dimension_numbers = #tpu.dot_dimension_numbers<[1], [0], [0], [1], [0, 0, 1, 1], [], []>} : vector<100x64xbf16>, vector<64x64xbf16>, vector<100x64xf32> -> vector<100x64xf32>
    %108 = arith.addf %103, %107 : vector<100x64xf32>
    %109 = vector.extract_strided_slice %17 {offsets = [200, 0], sizes = [100, 64], strides = [1, 1]} : vector<322x64xbf16> to vector<100x64xbf16>
    %c18 = arith.constant 18 : index
    %c0_67 = arith.constant 0 : index
    %c0_68 = arith.constant 0 : index
    %110 = vector.load %arg5[%c18, %c0_67, %c0_68] : memref<27x64x64xbf16, #tpu.memory_space<vmem>>, vector<1x64x64xbf16>
    %111 = vector.shape_cast %110 : vector<1x64x64xbf16> to vector<64x64xbf16>
    %cst_69 = arith.constant dense<0.000000e+00> : vector<100x64xf32>
    %112 = tpu.matmul %109, %111, %cst_69 {dimension_numbers = #tpu.dot_dimension_numbers<[1], [0], [0], [1], [0, 0, 1, 1], [], []>} : vector<100x64xbf16>, vector<64x64xbf16>, vector<100x64xf32> -> vector<100x64xf32>
    %113 = arith.addf %108, %112 : vector<100x64xf32>
    %114 = vector.extract_strided_slice %17 {offsets = [201, 0], sizes = [100, 64], strides = [1, 1]} : vector<322x64xbf16> to vector<100x64xbf16>
    %c19 = arith.constant 19 : index
    %c0_70 = arith.constant 0 : index
    %c0_71 = arith.constant 0 : index
    %115 = vector.load %arg5[%c19, %c0_70, %c0_71] : memref<27x64x64xbf16, #tpu.memory_space<vmem>>, vector<1x64x64xbf16>
    %116 = vector.shape_cast %115 : vector<1x64x64xbf16> to vector<64x64xbf16>
    %cst_72 = arith.constant dense<0.000000e+00> : vector<100x64xf32>
    %117 = tpu.matmul %114, %116, %cst_72 {dimension_numbers = #tpu.dot_dimension_numbers<[1], [0], [0], [1], [0, 0, 1, 1], [], []>} : vector<100x64xbf16>, vector<64x64xbf16>, vector<100x64xf32> -> vector<100x64xf32>
    %118 = arith.addf %113, %117 : vector<100x64xf32>
    %119 = vector.extract_strided_slice %17 {offsets = [202, 0], sizes = [100, 64], strides = [1, 1]} : vector<322x64xbf16> to vector<100x64xbf16>
    %c20 = arith.constant 20 : index
    %c0_73 = arith.constant 0 : index
    %c0_74 = arith.constant 0 : index
    %120 = vector.load %arg5[%c20, %c0_73, %c0_74] : memref<27x64x64xbf16, #tpu.memory_space<vmem>>, vector<1x64x64xbf16>
    %121 = vector.shape_cast %120 : vector<1x64x64xbf16> to vector<64x64xbf16>
    %cst_75 = arith.constant dense<0.000000e+00> : vector<100x64xf32>
    %122 = tpu.matmul %119, %121, %cst_75 {dimension_numbers = #tpu.dot_dimension_numbers<[1], [0], [0], [1], [0, 0, 1, 1], [], []>} : vector<100x64xbf16>, vector<64x64xbf16>, vector<100x64xf32> -> vector<100x64xf32>
    %123 = arith.addf %118, %122 : vector<100x64xf32>
    %124 = vector.extract_strided_slice %17 {offsets = [210, 0], sizes = [100, 64], strides = [1, 1]} : vector<322x64xbf16> to vector<100x64xbf16>
    %c21 = arith.constant 21 : index
    %c0_76 = arith.constant 0 : index
    %c0_77 = arith.constant 0 : index
    %125 = vector.load %arg5[%c21, %c0_76, %c0_77] : memref<27x64x64xbf16, #tpu.memory_space<vmem>>, vector<1x64x64xbf16>
    %126 = vector.shape_cast %125 : vector<1x64x64xbf16> to vector<64x64xbf16>
    %cst_78 = arith.constant dense<0.000000e+00> : vector<100x64xf32>
    %127 = tpu.matmul %124, %126, %cst_78 {dimension_numbers = #tpu.dot_dimension_numbers<[1], [0], [0], [1], [0, 0, 1, 1], [], []>} : vector<100x64xbf16>, vector<64x64xbf16>, vector<100x64xf32> -> vector<100x64xf32>
    %128 = arith.addf %123, %127 : vector<100x64xf32>
    %129 = vector.extract_strided_slice %17 {offsets = [211, 0], sizes = [100, 64], strides = [1, 1]} : vector<322x64xbf16> to vector<100x64xbf16>
    %c22 = arith.constant 22 : index
    %c0_79 = arith.constant 0 : index
    %c0_80 = arith.constant 0 : index
    %130 = vector.load %arg5[%c22, %c0_79, %c0_80] : memref<27x64x64xbf16, #tpu.memory_space<vmem>>, vector<1x64x64xbf16>
    %131 = vector.shape_cast %130 : vector<1x64x64xbf16> to vector<64x64xbf16>
    %cst_81 = arith.constant dense<0.000000e+00> : vector<100x64xf32>
    %132 = tpu.matmul %129, %131, %cst_81 {dimension_numbers = #tpu.dot_dimension_numbers<[1], [0], [0], [1], [0, 0, 1, 1], [], []>} : vector<100x64xbf16>, vector<64x64xbf16>, vector<100x64xf32> -> vector<100x64xf32>
    %133 = arith.addf %128, %132 : vector<100x64xf32>
    %134 = vector.extract_strided_slice %17 {offsets = [212, 0], sizes = [100, 64], strides = [1, 1]} : vector<322x64xbf16> to vector<100x64xbf16>
    %c23 = arith.constant 23 : index
    %c0_82 = arith.constant 0 : index
    %c0_83 = arith.constant 0 : index
    %135 = vector.load %arg5[%c23, %c0_82, %c0_83] : memref<27x64x64xbf16, #tpu.memory_space<vmem>>, vector<1x64x64xbf16>
    %136 = vector.shape_cast %135 : vector<1x64x64xbf16> to vector<64x64xbf16>
    %cst_84 = arith.constant dense<0.000000e+00> : vector<100x64xf32>
    %137 = tpu.matmul %134, %136, %cst_84 {dimension_numbers = #tpu.dot_dimension_numbers<[1], [0], [0], [1], [0, 0, 1, 1], [], []>} : vector<100x64xbf16>, vector<64x64xbf16>, vector<100x64xf32> -> vector<100x64xf32>
    %138 = arith.addf %133, %137 : vector<100x64xf32>
    %139 = vector.extract_strided_slice %17 {offsets = [220, 0], sizes = [100, 64], strides = [1, 1]} : vector<322x64xbf16> to vector<100x64xbf16>
    %c24 = arith.constant 24 : index
    %c0_85 = arith.constant 0 : index
    %c0_86 = arith.constant 0 : index
    %140 = vector.load %arg5[%c24, %c0_85, %c0_86] : memref<27x64x64xbf16, #tpu.memory_space<vmem>>, vector<1x64x64xbf16>
    %141 = vector.shape_cast %140 : vector<1x64x64xbf16> to vector<64x64xbf16>
    %cst_87 = arith.constant dense<0.000000e+00> : vector<100x64xf32>
    %142 = tpu.matmul %139, %141, %cst_87 {dimension_numbers = #tpu.dot_dimension_numbers<[1], [0], [0], [1], [0, 0, 1, 1], [], []>} : vector<100x64xbf16>, vector<64x64xbf16>, vector<100x64xf32> -> vector<100x64xf32>
    %143 = arith.addf %138, %142 : vector<100x64xf32>
    %144 = vector.extract_strided_slice %17 {offsets = [221, 0], sizes = [100, 64], strides = [1, 1]} : vector<322x64xbf16> to vector<100x64xbf16>
    %c25 = arith.constant 25 : index
    %c0_88 = arith.constant 0 : index
    %c0_89 = arith.constant 0 : index
    %145 = vector.load %arg5[%c25, %c0_88, %c0_89] : memref<27x64x64xbf16, #tpu.memory_space<vmem>>, vector<1x64x64xbf16>
    %146 = vector.shape_cast %145 : vector<1x64x64xbf16> to vector<64x64xbf16>
    %cst_90 = arith.constant dense<0.000000e+00> : vector<100x64xf32>
    %147 = tpu.matmul %144, %146, %cst_90 {dimension_numbers = #tpu.dot_dimension_numbers<[1], [0], [0], [1], [0, 0, 1, 1], [], []>} : vector<100x64xbf16>, vector<64x64xbf16>, vector<100x64xf32> -> vector<100x64xf32>
    %148 = arith.addf %143, %147 : vector<100x64xf32>
    %149 = vector.extract_strided_slice %17 {offsets = [222, 0], sizes = [100, 64], strides = [1, 1]} : vector<322x64xbf16> to vector<100x64xbf16>
    %c26 = arith.constant 26 : index
    %c0_91 = arith.constant 0 : index
    %c0_92 = arith.constant 0 : index
    %150 = vector.load %arg5[%c26, %c0_91, %c0_92] : memref<27x64x64xbf16, #tpu.memory_space<vmem>>, vector<1x64x64xbf16>
    %151 = vector.shape_cast %150 : vector<1x64x64xbf16> to vector<64x64xbf16>
    %cst_93 = arith.constant dense<0.000000e+00> : vector<100x64xf32>
    %152 = tpu.matmul %149, %151, %cst_93 {dimension_numbers = #tpu.dot_dimension_numbers<[1], [0], [0], [1], [0, 0, 1, 1], [], []>} : vector<100x64xbf16>, vector<64x64xbf16>, vector<100x64xf32> -> vector<100x64xf32>
    %153 = arith.addf %148, %152 : vector<100x64xf32>
    %154 = arith.extf %3 : vector<100x1xbf16> to vector<100x1xf32>
    %155 = vector.broadcast %154 : vector<100x1xf32> to vector<100x64xf32>
    %156 = arith.mulf %153, %155 : vector<100x64xf32>
    %c0_94 = arith.constant 0 : index
    %c0_95 = arith.constant 0 : index
    %c0_96 = arith.constant 0 : index
    %157 = vector.load %arg7[%c0_94, %c0_95, %c0_96] : memref<1x100x64xf32, #tpu.memory_space<vmem>>, vector<1x100x64xf32>
    %158 = vector.shape_cast %157 : vector<1x100x64xf32> to vector<100x64xf32>
    %159 = vector.shape_cast %156 : vector<100x64xf32> to vector<1x100x64xf32>
    tpu.vector_store %arg7[%c0_94, %c0_95, %c0_96], %159 {strides = array<i32>} : memref<1x100x64xf32, #tpu.memory_space<vmem>>, vector<1x100x64xf32>,
    %cst_97 = arith.constant dense<0.000000e+00> : vector<64xf32>
    %160 = vector.multi_reduction <add>, %156, %cst_97 [0] : vector<100x64xf32> to vector<64xf32>
    %161 = vector.shape_cast %160 : vector<64xf32> to vector<1x64xf32>
    %162 = arith.mulf %156, %156 : vector<100x64xf32>
    %cst_98 = arith.constant dense<0.000000e+00> : vector<64xf32>
    %163 = vector.multi_reduction <add>, %162, %cst_98 [0] : vector<100x64xf32> to vector<64xf32>
    %164 = vector.shape_cast %163 : vector<64xf32> to vector<1x64xf32>
    %c0_99 = arith.constant 0 : index
    %c0_100 = arith.constant 0 : index
    %c0_101 = arith.constant 0 : index
    %165 = vector.load %arg8[%c0_99, %c0_100, %c0_101] : memref<1x2x64xf32, #tpu.memory_space<vmem>>, vector<1x2x64xf32>
    %166 = tpu.concatenate %161, %164 in 0 : vector<1x64xf32>, vector<1x64xf32> -> vector<2x64xf32>
    %167 = vector.shape_cast %166 : vector<2x64xf32> to vector<1x2x64xf32>
    %168 = arith.addf %165, %167 : vector<1x2x64xf32>
    %c0_102 = arith.constant 0 : index
    %c0_103 = arith.constant 0 : index
    %c0_104 = arith.constant 0 : index
    %169 = vector.load %arg8[%c0_102, %c0_103, %c0_104] : memref<1x2x64xf32, #tpu.memory_space<vmem>>, vector<1x2x64xf32>
    tpu.vector_store %arg8[%c0_102, %c0_103, %c0_104], %168 {strides = array<i32>} : memref<1x2x64xf32, #tpu.memory_space<vmem>>, vector<1x2x64xf32>,
    return
  }
  func.func @transform_0(%arg0: i32, %arg1: i32) -> (i32, i32, i32) {
    %c10_i32 = arith.constant 10 : i32
    %0 = arith.muli %arg0, %c10_i32 : i32
    %1 = arith.addi %0, %arg1 : i32
    %c0_i32 = arith.constant 0 : i32
    %2 = arith.addi %1, %c0_i32 : i32
    %c0_i32_0 = arith.constant 0 : i32
    %c0_i32_1 = arith.constant 0 : i32
    %c0_i32_2 = arith.constant 0 : i32
    return %2, %c0_i32_0, %c0_i32_1 : i32, i32, i32
  }
  func.func @transform_1(%arg0: i32, %arg1: i32) -> (i32, i32, i32) {
    %c10_i32 = arith.constant 10 : i32
    %0 = arith.muli %arg0, %c10_i32 : i32
    %1 = arith.addi %0, %arg1 : i32
    %c1_i32 = arith.constant 1 : i32
    %2 = arith.addi %1, %c1_i32 : i32
    %c0_i32 = arith.constant 0 : i32
    %c0_i32_0 = arith.constant 0 : i32
    %c0_i32_1 = arith.constant 0 : i32
    return %2, %c0_i32, %c0_i32_0 : i32, i32, i32
  }
  func.func @transform_2(%arg0: i32, %arg1: i32) -> (i32, i32, i32) {
    %c10_i32 = arith.constant 10 : i32
    %0 = arith.muli %arg0, %c10_i32 : i32
    %1 = arith.addi %0, %arg1 : i32
    %c2_i32 = arith.constant 2 : i32
    %2 = arith.addi %1, %c2_i32 : i32
    %c0_i32 = arith.constant 0 : i32
    %c0_i32_0 = arith.constant 0 : i32
    %c0_i32_1 = arith.constant 0 : i32
    return %2, %c0_i32, %c0_i32_0 : i32, i32, i32
  }
  func.func @transform_3(%arg0: i32, %arg1: i32) -> (i32, i32, i32) {
    %c0_i32 = arith.constant 0 : i32
    %c0_i32_0 = arith.constant 0 : i32
    %c0_i32_1 = arith.constant 0 : i32
    %c0_i32_2 = arith.constant 0 : i32
    return %c0_i32, %c0_i32_0, %c0_i32_1 : i32, i32, i32
  }
  func.func @transform_4(%arg0: i32, %arg1: i32) -> (i32, i32) {
    %c0_i32 = arith.constant 0 : i32
    %c0_i32_0 = arith.constant 0 : i32
    %c0_i32_1 = arith.constant 0 : i32
    return %c0_i32, %c0_i32_0 : i32, i32
  }
  func.func @transform_5(%arg0: i32, %arg1: i32) -> (i32, i32, i32) {
    %c8_i32 = arith.constant 8 : i32
    %0 = arith.muli %arg0, %c8_i32 : i32
    %1 = arith.addi %0, %arg1 : i32
    %c0_i32 = arith.constant 0 : i32
    %c0_i32_0 = arith.constant 0 : i32
    %c0_i32_1 = arith.constant 0 : i32
    return %1, %c0_i32, %c0_i32_0 : i32, i32, i32
  }
  func.func @transform_6(%arg0: i32, %arg1: i32) -> (i32, i32, i32) {
    %c0_i32 = arith.constant 0 : i32
    %c0_i32_0 = arith.constant 0 : i32
    %c0_i32_1 = arith.constant 0 : i32
    return %arg0, %c0_i32, %c0_i32_0 : i32, i32, i32
  }
}

module attributes {stable_mosaic.version = 11 : i64} {
  func.func @_bn_relu_kernel(%arg0: i32, %arg1: memref<800x128xf32, #tpu.memory_space<vmem>>, %arg2: memref<1x128xf32, #tpu.memory_space<vmem>>, %arg3: memref<1x128xf32, #tpu.memory_space<vmem>>, %arg4: memref<800x128xbf16, #tpu.memory_space<vmem>>) attributes {dimension_semantics = [#tpu.dimension_semantics<parallel>], iteration_bounds = array<i64: 1>, scalar_prefetch = 0 : i64, scratch_operands = 0 : i64, tpu.core_type = #tpu.core_type<tc>, window_params = [{transform_indices = @transform_0, window_bounds = array<i64: 800, 128>}, {pipeline_mode = #tpu.pipeline_mode<synchronous>, transform_indices = @transform_1, window_bounds = array<i64: 1, 128>}, {pipeline_mode = #tpu.pipeline_mode<synchronous>, transform_indices = @transform_2, window_bounds = array<i64: 1, 128>}, {transform_indices = @transform_3, window_bounds = array<i64: 800, 128>}]} {
    %c0 = arith.constant 0 : index
    %c0_0 = arith.constant 0 : index
    %0 = vector.load %arg1[%c0, %c0_0] : memref<800x128xf32, #tpu.memory_space<vmem>>, vector<800x128xf32>
    %c0_1 = arith.constant 0 : index
    %c0_2 = arith.constant 0 : index
    %1 = vector.load %arg2[%c0_1, %c0_2] : memref<1x128xf32, #tpu.memory_space<vmem>>, vector<1x128xf32>
    %2 = vector.broadcast %1 : vector<1x128xf32> to vector<800x128xf32>
    %3 = arith.mulf %0, %2 : vector<800x128xf32>
    %c0_3 = arith.constant 0 : index
    %c0_4 = arith.constant 0 : index
    %4 = vector.load %arg3[%c0_3, %c0_4] : memref<1x128xf32, #tpu.memory_space<vmem>>, vector<1x128xf32>
    %5 = vector.broadcast %4 : vector<1x128xf32> to vector<800x128xf32>
    %6 = arith.addf %3, %5 : vector<800x128xf32>
    %cst = arith.constant 0.000000e+00 : f32
    %7 = vector.broadcast %cst : f32 to vector<800x128xf32>
    %8 = arith.maximumf %6, %7 : vector<800x128xf32>
    %9 = arith.truncf %8 : vector<800x128xf32> to vector<800x128xbf16>
    %c0_5 = arith.constant 0 : index
    %c0_6 = arith.constant 0 : index
    %10 = vector.load %arg4[%c0_5, %c0_6] : memref<800x128xbf16, #tpu.memory_space<vmem>>, vector<800x128xbf16>
    tpu.vector_store %arg4[%c0_5, %c0_6], %9 {strides = array<i32>} : memref<800x128xbf16, #tpu.memory_space<vmem>>, vector<800x128xbf16>,
    return
  }
  func.func @transform_0(%arg0: i32) -> (i32, i32) {
    %c0_i32 = arith.constant 0 : i32
    %c0_i32_0 = arith.constant 0 : i32
    return %arg0, %c0_i32 : i32, i32
  }
  func.func @transform_1(%arg0: i32) -> (i32, i32) {
    %c0_i32 = arith.constant 0 : i32
    %c0_i32_0 = arith.constant 0 : i32
    %c0_i32_1 = arith.constant 0 : i32
    return %c0_i32, %c0_i32_0 : i32, i32
  }
  func.func @transform_2(%arg0: i32) -> (i32, i32) {
    %c0_i32 = arith.constant 0 : i32
    %c0_i32_0 = arith.constant 0 : i32
    %c0_i32_1 = arith.constant 0 : i32
    return %c0_i32, %c0_i32_0 : i32, i32
  }
  func.func @transform_3(%arg0: i32) -> (i32, i32) {
    %c0_i32 = arith.constant 0 : i32
    %c0_i32_0 = arith.constant 0 : i32
    return %arg0, %c0_i32 : i32, i32
  }
}

module attributes {stable_mosaic.version = 11 : i64} {
  func.func @_bn_add_relu_kernel(%arg0: i32, %arg1: memref<800x128xf32, #tpu.memory_space<vmem>>, %arg2: memref<1x128xf32, #tpu.memory_space<vmem>>, %arg3: memref<1x128xf32, #tpu.memory_space<vmem>>, %arg4: memref<800x128xf32, #tpu.memory_space<vmem>>, %arg5: memref<800x128xf32, #tpu.memory_space<vmem>>) attributes {dimension_semantics = [#tpu.dimension_semantics<parallel>], iteration_bounds = array<i64: 1>, scalar_prefetch = 0 : i64, scratch_operands = 0 : i64, tpu.core_type = #tpu.core_type<tc>, window_params = [{transform_indices = @transform_0, window_bounds = array<i64: 800, 128>}, {pipeline_mode = #tpu.pipeline_mode<synchronous>, transform_indices = @transform_1, window_bounds = array<i64: 1, 128>}, {pipeline_mode = #tpu.pipeline_mode<synchronous>, transform_indices = @transform_2, window_bounds = array<i64: 1, 128>}, {transform_indices = @transform_3, window_bounds = array<i64: 800, 128>}, {transform_indices = @transform_4, window_bounds = array<i64: 800, 128>}]} {
    %c0 = arith.constant 0 : index
    %c0_0 = arith.constant 0 : index
    %0 = vector.load %arg1[%c0, %c0_0] : memref<800x128xf32, #tpu.memory_space<vmem>>, vector<800x128xf32>
    %c0_1 = arith.constant 0 : index
    %c0_2 = arith.constant 0 : index
    %1 = vector.load %arg2[%c0_1, %c0_2] : memref<1x128xf32, #tpu.memory_space<vmem>>, vector<1x128xf32>
    %2 = vector.broadcast %1 : vector<1x128xf32> to vector<800x128xf32>
    %3 = arith.mulf %0, %2 : vector<800x128xf32>
    %c0_3 = arith.constant 0 : index
    %c0_4 = arith.constant 0 : index
    %4 = vector.load %arg3[%c0_3, %c0_4] : memref<1x128xf32, #tpu.memory_space<vmem>>, vector<1x128xf32>
    %5 = vector.broadcast %4 : vector<1x128xf32> to vector<800x128xf32>
    %6 = arith.addf %3, %5 : vector<800x128xf32>
    %c0_5 = arith.constant 0 : index
    %c0_6 = arith.constant 0 : index
    %7 = vector.load %arg4[%c0_5, %c0_6] : memref<800x128xf32, #tpu.memory_space<vmem>>, vector<800x128xf32>
    %8 = arith.addf %6, %7 : vector<800x128xf32>
    %cst = arith.constant 0.000000e+00 : f32
    %9 = vector.broadcast %cst : f32 to vector<800x128xf32>
    %10 = arith.maximumf %8, %9 : vector<800x128xf32>
    %c0_7 = arith.constant 0 : index
    %c0_8 = arith.constant 0 : index
    %11 = vector.load %arg5[%c0_7, %c0_8] : memref<800x128xf32, #tpu.memory_space<vmem>>, vector<800x128xf32>
    tpu.vector_store %arg5[%c0_7, %c0_8], %10 {strides = array<i32>} : memref<800x128xf32, #tpu.memory_space<vmem>>, vector<800x128xf32>,
    return
  }
  func.func @transform_0(%arg0: i32) -> (i32, i32) {
    %c0_i32 = arith.constant 0 : i32
    %c0_i32_0 = arith.constant 0 : i32
    return %arg0, %c0_i32 : i32, i32
  }
  func.func @transform_1(%arg0: i32) -> (i32, i32) {
    %c0_i32 = arith.constant 0 : i32
    %c0_i32_0 = arith.constant 0 : i32
    %c0_i32_1 = arith.constant 0 : i32
    return %c0_i32, %c0_i32_0 : i32, i32
  }
  func.func @transform_2(%arg0: i32) -> (i32, i32) {
    %c0_i32 = arith.constant 0 : i32
    %c0_i32_0 = arith.constant 0 : i32
    %c0_i32_1 = arith.constant 0 : i32
    return %c0_i32, %c0_i32_0 : i32, i32
  }
  func.func @transform_3(%arg0: i32) -> (i32, i32) {
    %c0_i32 = arith.constant 0 : i32
    %c0_i32_0 = arith.constant 0 : i32
    return %arg0, %c0_i32 : i32, i32
  }
  func.func @transform_4(%arg0: i32) -> (i32, i32) {
    %c0_i32 = arith.constant 0 : i32
    %c0_i32_0 = arith.constant 0 : i32
    return %arg0, %c0_i32 : i32, i32
  }
}

</mosaic_0001>

<bundles_post_ra>
// kernel: tile.23
= control target key start
LH: loop header
LB: loop body
LE: loop exit
PB: predicated region body
PF: predicated region fallthrough
CT: control target
= control target key end

     0   :  { %s22_s0 = inlined_call_operand.vmem [shape: f32[64], index: 0, kind: input, shape index: {}]   ;;  %s23_s1 = inlined_call_operand.vmem [shape: f32[2,64], index: 1, kind: output, shape index: {}]  }
   0x1   :  { %v4_v0 = vld [vmem:[%s22_s0] ss:$0 sm:$0xff] }
   0x2   :  { %5 = vst [vmem:[%s23_s1] sm:$0x3] %v4_v0 }

// kernel: tile.24
= control target key start
LH: loop header
LB: loop body
LE: loop exit
PB: predicated region body
PF: predicated region fallthrough
CT: control target
= control target key end

     0   :  { %vm7_vm0 = vcmask 523264   ;;  %vm13_vm1 = vcmask 1048064   ;;  %s39_s0 = inlined_call_operand.vmem [shape: f32[2,64], index: 0, kind: input, shape index: {}]   ;;  %s40_s1 = inlined_call_operand.vmem [shape: f32[1,128], index: 1, kind: output, shape index: {}]  }
   0x1   :  { %v4_v0 = vld [vmem:[%s39_s0] sm:$0x3]  ;;  %s22_s0 = smov 64  }
   0x2   :  { %5 = vst [vmem:[#allocation1] sm:$0x3] %v4_v0 }
   0x9   :  { %v10_v1 = vld [vmem:[#allocation1 + $0x1] sm:$0x1]   ;;  %v6_v2 = vld [vmem:[#allocation1] sm:$0x1]  }
   0xa   :  { %11 = vrot.lane.b32.xlu0 %v10_v1, %s22_s0  ;;  %8 = vst.msk [vmem:[#allocation0] sm:$0x1] %vm7_vm0, %v6_v2  }
  0x7c   :  { %v12_v3 = vpop.permute.xlu0 %11  }
  0x7d   :  { %14 = vst.msk [vmem:[#allocation0] sm:$0x1] %vm13_vm1, %v12_v3  }
  0x84   :  { %v18_v4 = vld [vmem:[#allocation0] sm:$0x1] }
  0x85   :  { %20 = vst [vmem:[%s40_s1] sm:$0x1] %v18_v4 }

// kernel: basic_block_pallas.5
= control target key start
LH: loop header
LB: loop body
LE: loop exit
PB: predicated region body
PF: predicated region fallthrough
CT: control target
= control target key end

     0   :  { %s2113_s0 = inlined_call_operand.vmem [shape: f32[800,128], index: 0, kind: input, shape index: {}]   ;;  %s2114_s1 = inlined_call_operand.vmem [shape: f32[1,128], index: 1, kind: input, shape index: {}]   ;;  %s2115_s2 = inlined_call_operand.vmem [shape: f32[1,128], index: 2, kind: input, shape index: {}]   ;;  %s2116_s3 = inlined_call_operand.vmem [shape: bf16[800,128], index: 3, kind: output, shape index: {}]  }
   0x1   :  { %v14_v0 = vld [vmem:[%s2113_s0] sm:$0xff]  ;;  %v15_v1 = vld [vmem:[%s2113_s0 + $0x8] sm:$0xff]  ;;  %v16_v6 = vld [vmem:[%s2113_s0 + $0x10] sm:$0xff] }
   0x2   :  { %v1462_v2 = vld [vmem:[%s2114_s1] ss:$0 sm:$0xff]  ;;  %v17_v7 = vld [vmem:[%s2113_s0 + $0x18] sm:$0xff]  ;;  %v19_v11 = vld [vmem:[%s2113_s0 + $0x28] sm:$0xff] }
   0x3   :  { %v121_v3 = vmul.f32 %v1462_v2, %v14_v0  ;;  %v122_v4 = vmul.f32 %v1462_v2, %v15_v1  ;;  %v1469_v5 = vld [vmem:[%s2115_s2] ss:$0 sm:$0xff]  ;;  %v123_v8 = vmul.f32 %v1462_v2, %v16_v6  ;;  %v124_v9 = vmul.f32 %v1462_v2, %v17_v7  ;;  %v20_v12 = vld [vmem:[%s2113_s0 + $0x30] sm:$0xff]  ;;  %v21_v17 = vld [vmem:[%s2113_s0 + $0x38] sm:$0xff] }
   0x4   :  { %v18_v10 = vld [vmem:[%s2113_s0 + $0x20] sm:$0xff]  ;;  %v126_v16 = vmul.f32 %v1462_v2, %v19_v11  ;;  %v127_v20 = vmul.f32 %v1462_v2, %v20_v12  ;;  %v128_v21 = vmul.f32 %v1462_v2, %v21_v17  ;;  %v23_v27 = vld [vmem:[%s2113_s0 + $0x48] sm:$0xff]  ;;  %v24_v32 = vld [vmem:[%s2113_s0 + $0x50] sm:$0xff] }
   0x5   :  { %v228_v13 = vadd.f32 %v1469_v5, %v121_v3  ;;  %v229_v14 = vadd.f32 %v1469_v5, %v122_v4  ;;  %v125_v15 = vmul.f32 %v1462_v2, %v18_v10  ;;  %v230_v18 = vadd.f32 %v1469_v5, %v123_v8  ;;  %v22_v22 = vld [vmem:[%s2113_s0 + $0x40] sm:$0xff]  ;;  %v25_v33 = vld [vmem:[%s2113_s0 + $0x58] sm:$0xff]  ;;  %v27_v39 = vld [vmem:[%s2113_s0 + $0x68] sm:$0xff] }
   0x6   :  { %v231_v19 = vadd.f32 %v1469_v5, %v124_v9  ;;  %v233_v26 = vadd.f32 %v1469_v5, %v126_v16  ;;  %v234_v30 = vadd.f32 %v1469_v5, %v127_v20  ;;  %v235_v31 = vadd.f32 %v1469_v5, %v128_v21  ;;  %v26_v38 = vld [vmem:[%s2113_s0 + $0x60] sm:$0xff]  ;;  %v28_v44 = vld [vmem:[%s2113_s0 + $0x70] sm:$0xff]  ;;  %v29_v49 = vld [vmem:[%s2113_s0 + $0x78] sm:$0xff] }
   0x7   :  { %v328_v23 = vmax.f32 %v228_v13, 0.0  ;;  %v329_v24 = vmax.f32 %v229_v14, 0.0  ;;  %v232_v25 = vadd.f32 %v1469_v5, %v125_v15  ;;  %v330_v28 = vmax.f32 %v230_v18, 0.0  ;;  %v30_v54 = vld [vmem:[%s2113_s0 + $0x80] sm:$0xff]  ;;  %v31_v63 = vld [vmem:[%s2113_s0 + $0x88] sm:$0xff]  ;;  %v32_v6 = vld [vmem:[%s2113_s0 + $0x90] sm:$0xff] }
   0x8   :  { %v331_v29 = vmax.f32 %v231_v19, 0.0  ;;  %v333_v36 = vmax.f32 %v233_v26, 0.0  ;;  %v129_v37 = vmul.f32 %v1462_v2, %v22_v22  ;;  %v334_v41 = vmax.f32 %v234_v30, 0.0  ;;  %v33_v7 = vld [vmem:[%s2113_s0 + $0x98] sm:$0xff]  ;;  %v34_v12 = vld [vmem:[%s2113_s0 + $0xa0] sm:$0xff]  ;;  %v35_v13 = vld [vmem:[%s2113_s0 + $0xa8] sm:$0xff] }
   0x9   :  { %v1137_v34 = vpack.c.bf16 %v329_v24, %v328_v23  ;;  %v332_v35 = vmax.f32 %v232_v25, 0.0  ;;  %v335_v42 = vmax.f32 %v235_v31, 0.0  ;;  %v130_v43 = vmul.f32 %v1462_v2, %v23_v27  ;;  %v36_v18 = vld [vmem:[%s2113_s0 + $0xb0] sm:$0xff]  ;;  %v37_v23 = vld [vmem:[%s2113_s0 + $0xb8] sm:$0xff] }
   0xa   :  { %v1142_v40 = vpack.c.bf16 %v331_v29, %v330_v28  ;;  %v236_v46 = vadd.f32 %v1469_v5, %v129_v37  ;;  %v131_v47 = vmul.f32 %v1462_v2, %v24_v32  ;;  %v132_v48 = vmul.f32 %v1462_v2, %v25_v33  ;;  %v38_v28 = vld [vmem:[%s2113_s0 + $0xc0] sm:$0xff]  ;;  %v39_v37 = vld [vmem:[%s2113_s0 + $0xc8] sm:$0xff] }
   0xb   :  { %1138 = vst [vmem:[%s2116_s3] sm:$0xff] %v1137_v34   ;;  %v1147_v45 = vpack.c.bf16 %v333_v36, %v332_v35  ;;  %v1152_v50 = vpack.c.bf16 %v335_v42, %v334_v41  ;;  %v237_v51 = vadd.f32 %v1469_v5, %v130_v43  ;;  %v133_v52 = vmul.f32 %v1462_v2, %v26_v38  ;;  %v40_v42 = vld [vmem:[%s2113_s0 + $0xd0] sm:$0xff]  ;;  %v41_v43 = vld [vmem:[%s2113_s0 + $0xd8] sm:$0xff] }
   0xc   :  { %1384 = vst [vmem:[%s2116_s3 + $0x8] sm:$0xff] %v1142_v40   ;;  %v134_v53 = vmul.f32 %v1462_v2, %v27_v39  ;;  %v336_v55 = vmax.f32 %v236_v46, 0.0  ;;  %v238_v56 = vadd.f32 %v1469_v5, %v131_v47  ;;  %v239_v57 = vadd.f32 %v1469_v5, %v132_v48  ;;  %v42_v48 = vld [vmem:[%s2113_s0 + $0xe0] sm:$0xff] }
   0xd   :  { %1385 = vst [vmem:[%s2116_s3 + $0x10] sm:$0xff] %v1147_v45   ;;  %v135_v58 = vmul.f32 %v1462_v2, %v28_v44  ;;  %1386 = vst [vmem:[%s2116_s3 + $0x18] sm:$0xff] %v1152_v50   ;;  %v337_v59 = vmax.f32 %v237_v51, 0.0  ;;  %v240_v60 = vadd.f32 %v1469_v5, %v133_v52  ;;  %v136_v62 = vmul.f32 %v1462_v2, %v29_v49  ;;  %v43_v49 = vld [vmem:[%s2113_s0 + $0xe8] sm:$0xff] }
   0xe   :  { %v241_v61 = vadd.f32 %v1469_v5, %v134_v53  ;;  %v338_v0 = vmax.f32 %v238_v56, 0.0  ;;  %v339_v1 = vmax.f32 %v239_v57, 0.0  ;;  %v137_v4 = vmul.f32 %v1462_v2, %v30_v54  ;;  %v44_v54 = vld [vmem:[%s2113_s0 + $0xf0] sm:$0xff] }
   0xf   :  { %v242_v3 = vadd.f32 %v1469_v5, %v135_v58  ;;  %v1157_v8 = vpack.c.bf16 %v337_v59, %v336_v55  ;;  %v340_v9 = vmax.f32 %v240_v60, 0.0  ;;  %v243_v11 = vadd.f32 %v1469_v5, %v136_v62  ;;  %v45_v59 = vld [vmem:[%s2113_s0 + $0xf8] sm:$0xff] }
  0x10   :  { %v341_v10 = vmax.f32 %v241_v61, 0.0  ;;  %v1162_v14 = vpack.c.bf16 %v339_v1, %v338_v0  ;;  %v138_v16 = vmul.f32 %v1462_v2, %v31_v63  ;;  %v244_v17 = vadd.f32 %v1469_v5, %v137_v4  ;;  %v46_v0 = vld [vmem:[%s2113_s0 + $0x100] sm:$0xff] }
  0x11   :  { %v342_v15 = vmax.f32 %v242_v3, 0.0  ;;  %1387 = vst [vmem:[%s2116_s3 + $0x20] sm:$0xff] %v1157_v8   ;;  %v343_v20 = vmax.f32 %v243_v11, 0.0  ;;  %v139_v21 = vmul.f32 %v1462_v2, %v32_v6  ;;  %v140_v22 = vmul.f32 %v1462_v2, %v33_v7  ;;  %v47_v11 = vld [vmem:[%s2113_s0 + $0x108] sm:$0xff] }
  0x12   :  { %v1167_v19 = vpack.c.bf16 %v341_v10, %v340_v9  ;;  %1388 = vst [vmem:[%s2116_s3 + $0x28] sm:$0xff] %v1162_v14   ;;  %v245_v24 = vadd.f32 %v1469_v5, %v138_v16  ;;  %v344_v25 = vmax.f32 %v244_v17, 0.0  ;;  %v141_v26 = vmul.f32 %v1462_v2, %v34_v12  ;;  %v48_v16 = vld [vmem:[%s2113_s0 + $0x110] sm:$0xff]  ;;  %v49_v17 = vld [vmem:[%s2113_s0 + $0x118] sm:$0xff] }
  0x13   :  { %v142_v27 = vmul.f32 %v1462_v2, %v35_v13  ;;  %v1172_v29 = vpack.c.bf16 %v343_v20, %v342_v15  ;;  %v246_v30 = vadd.f32 %v1469_v5, %v139_v21  ;;  %v247_v31 = vadd.f32 %v1469_v5, %v140_v22  ;;  %v50_v22 = vld [vmem:[%s2113_s0 + $0x120] sm:$0xff] }
  0x14   :  { %1389 = vst [vmem:[%s2116_s3 + $0x30] sm:$0xff] %v1167_v19   ;;  %v143_v32 = vmul.f32 %v1462_v2, %v36_v18  ;;  %v345_v33 = vmax.f32 %v245_v24, 0.0  ;;  %v248_v34 = vadd.f32 %v1469_v5, %v141_v26  ;;  %v144_v36 = vmul.f32 %v1462_v2, %v37_v23  ;;  %v51_v23 = vld [vmem:[%s2113_s0 + $0x128] sm:$0xff] }
  0x15   :  { %v249_v35 = vadd.f32 %v1469_v5, %v142_v27  ;;  %1390 = vst [vmem:[%s2116_s3 + $0x38] sm:$0xff] %v1172_v29   ;;  %v346_v38 = vmax.f32 %v246_v30, 0.0  ;;  %v347_v39 = vmax.f32 %v247_v31, 0.0  ;;  %v145_v41 = vmul.f32 %v1462_v2, %v38_v28  ;;  %v52_v28 = vld [vmem:[%s2113_s0 + $0x130] sm:$0xff] }
  0x16   :  { %v250_v40 = vadd.f32 %v1469_v5, %v143_v32  ;;  %v1177_v44 = vpack.c.bf16 %v345_v33, %v344_v25  ;;  %v348_v45 = vmax.f32 %v248_v34, 0.0  ;;  %v251_v47 = vadd.f32 %v1469_v5, %v144_v36  ;;  %v53_v33 = vld [vmem:[%s2113_s0 + $0x138] sm:$0xff] }
  0x17   :  { %v349_v46 = vmax.f32 %v249_v35, 0.0  ;;  %v1182_v50 = vpack.c.bf16 %v347_v39, %v346_v38  ;;  %v146_v52 = vmul.f32 %v1462_v2, %v39_v37  ;;  %v252_v53 = vadd.f32 %v1469_v5, %v145_v41  ;;  %v54_v38 = vld [vmem:[%s2113_s0 + $0x140] sm:$0xff] }
  0x18   :  { %v350_v51 = vmax.f32 %v250_v40, 0.0  ;;  %1391 = vst [vmem:[%s2116_s3 + $0x40] sm:$0xff] %v1177_v44   ;;  %v351_v56 = vmax.f32 %v251_v47, 0.0  ;;  %v147_v57 = vmul.f32 %v1462_v2, %v40_v42  ;;  %v148_v58 = vmul.f32 %v1462_v2, %v41_v43  ;;  %v55_v47 = vld [vmem:[%s2113_s0 + $0x148] sm:$0xff] }
  0x19   :  { %v1187_v55 = vpack.c.bf16 %v349_v46, %v348_v45  ;;  %1392 = vst [vmem:[%s2116_s3 + $0x48] sm:$0xff] %v1182_v50   ;;  %v253_v60 = vadd.f32 %v1469_v5, %v146_v52  ;;  %v352_v61 = vmax.f32 %v252_v53, 0.0  ;;  %v149_v62 = vmul.f32 %v1462_v2, %v42_v48  ;;  %v56_v52 = vld [vmem:[%s2113_s0 + $0x150] sm:$0xff]  ;;  %v57_v53 = vld [vmem:[%s2113_s0 + $0x158] sm:$0xff] }
  0x1a   :  { %v150_v63 = vmul.f32 %v1462_v2, %v43_v49  ;;  %v1192_v1 = vpack.c.bf16 %v351_v56, %v350_v51  ;;  %v254_v3 = vadd.f32 %v1469_v5, %v147_v57  ;;  %v255_v4 = vadd.f32 %v1469_v5, %v148_v58  ;;  %v58_v58 = vld [vmem:[%s2113_s0 + $0x160] sm:$0xff] }
  0x1b   :  { %1393 = vst [vmem:[%s2116_s3 + $0x50] sm:$0xff] %v1187_v55   ;;  %v151_v6 = vmul.f32 %v1462_v2, %v44_v54  ;;  %v353_v7 = vmax.f32 %v253_v60, 0.0  ;;  %v256_v8 = vadd.f32 %v1469_v5, %v149_v62  ;;  %v152_v10 = vmul.f32 %v1462_v2, %v45_v59  ;;  %v59_v59 = vld [vmem:[%s2113_s0 + $0x168] sm:$0xff] }
  0x1c   :  { %v257_v9 = vadd.f32 %v1469_v5, %v150_v63  ;;  %1394 = vst [vmem:[%s2116_s3 + $0x58] sm:$0xff] %v1192_v1   ;;  %v354_v12 = vmax.f32 %v254_v3, 0.0  ;;  %v355_v13 = vmax.f32 %v255_v4, 0.0  ;;  %v153_v15 = vmul.f32 %v1462_v2, %v46_v0  ;;  %v60_v0 = vld [vmem:[%s2113_s0 + $0x170] sm:$0xff] }
  0x1d   :  { %v258_v14 = vadd.f32 %v1469_v5, %v151_v6  ;;  %v1197_v18 = vpack.c.bf16 %v353_v7, %v352_v61  ;;  %v356_v19 = vmax.f32 %v256_v8, 0.0  ;;  %v259_v21 = vadd.f32 %v1469_v5, %v152_v10  ;;  %v61_v7 = vld [vmem:[%s2113_s0 + $0x178] sm:$0xff] }
  0x1e   :  { %v357_v20 = vmax.f32 %v257_v9, 0.0  ;;  %v1202_v24 = vpack.c.bf16 %v355_v13, %v354_v12  ;;  %v154_v26 = vmul.f32 %v1462_v2, %v47_v11  ;;  %v260_v27 = vadd.f32 %v1469_v5, %v153_v15  ;;  %v62_v12 = vld [vmem:[%s2113_s0 + $0x180] sm:$0xff] }
  0x1f   :  { %v358_v25 = vmax.f32 %v258_v14, 0.0  ;;  %1395 = vst [vmem:[%s2116_s3 + $0x60] sm:$0xff] %v1197_v18   ;;  %v359_v30 = vmax.f32 %v259_v21, 0.0  ;;  %v155_v31 = vmul.f32 %v1462_v2, %v48_v16  ;;  %v156_v32 = vmul.f32 %v1462_v2, %v49_v17  ;;  %v63_v21 = vld [vmem:[%s2113_s0 + $0x188] sm:$0xff] }
  0x20   :  { %v1207_v29 = vpack.c.bf16 %v357_v20, %v356_v19  ;;  %1396 = vst [vmem:[%s2116_s3 + $0x68] sm:$0xff] %v1202_v24   ;;  %v261_v34 = vadd.f32 %v1469_v5, %v154_v26  ;;  %v360_v35 = vmax.f32 %v260_v27, 0.0  ;;  %v157_v36 = vmul.f32 %v1462_v2, %v50_v22  ;;  %v64_v26 = vld [vmem:[%s2113_s0 + $0x190] sm:$0xff]  ;;  %v65_v27 = vld [vmem:[%s2113_s0 + $0x198] sm:$0xff] }
  0x21   :  { %v158_v37 = vmul.f32 %v1462_v2, %v51_v23  ;;  %v1212_v39 = vpack.c.bf16 %v359_v30, %v358_v25  ;;  %v262_v40 = vadd.f32 %v1469_v5, %v155_v31  ;;  %v263_v41 = vadd.f32 %v1469_v5, %v156_v32  ;;  %v66_v32 = vld [vmem:[%s2113_s0 + $0x1a0] sm:$0xff] }
  0x22   :  { %1397 = vst [vmem:[%s2116_s3 + $0x70] sm:$0xff] %v1207_v29   ;;  %v159_v42 = vmul.f32 %v1462_v2, %v52_v28  ;;  %v361_v43 = vmax.f32 %v261_v34, 0.0  ;;  %v264_v44 = vadd.f32 %v1469_v5, %v157_v36  ;;  %v160_v46 = vmul.f32 %v1462_v2, %v53_v33  ;;  %v67_v33 = vld [vmem:[%s2113_s0 + $0x1a8] sm:$0xff] }
  0x23   :  { %v265_v45 = vadd.f32 %v1469_v5, %v158_v37  ;;  %1398 = vst [vmem:[%s2116_s3 + $0x78] sm:$0xff] %v1212_v39   ;;  %v362_v48 = vmax.f32 %v262_v40, 0.0  ;;  %v363_v49 = vmax.f32 %v263_v41, 0.0  ;;  %v161_v51 = vmul.f32 %v1462_v2, %v54_v38  ;;  %v68_v38 = vld [vmem:[%s2113_s0 + $0x1b0] sm:$0xff] }
  0x24   :  { %v266_v50 = vadd.f32 %v1469_v5, %v159_v42  ;;  %v1217_v54 = vpack.c.bf16 %v361_v43, %v360_v35  ;;  %v364_v55 = vmax.f32 %v264_v44, 0.0  ;;  %v267_v57 = vadd.f32 %v1469_v5, %v160_v46  ;;  %v69_v43 = vld [vmem:[%s2113_s0 + $0x1b8] sm:$0xff] }
  0x25   :  { %v365_v56 = vmax.f32 %v265_v45, 0.0  ;;  %v1222_v60 = vpack.c.bf16 %v363_v49, %v362_v48  ;;  %v162_v62 = vmul.f32 %v1462_v2, %v55_v47  ;;  %v268_v63 = vadd.f32 %v1469_v5, %v161_v51  ;;  %v70_v48 = vld [vmem:[%s2113_s0 + $0x1c0] sm:$0xff] }
  0x26   :  { %v366_v61 = vmax.f32 %v266_v50, 0.0  ;;  %1399 = vst [vmem:[%s2116_s3 + $0x80] sm:$0xff] %v1217_v54   ;;  %v367_v3 = vmax.f32 %v267_v57, 0.0  ;;  %v163_v4 = vmul.f32 %v1462_v2, %v56_v52  ;;  %v164_v6 = vmul.f32 %v1462_v2, %v57_v53  ;;  %v71_v57 = vld [vmem:[%s2113_s0 + $0x1c8] sm:$0xff] }
  0x27   :  { %v1227_v1 = vpack.c.bf16 %v365_v56, %v364_v55  ;;  %1400 = vst [vmem:[%s2116_s3 + $0x88] sm:$0xff] %v1222_v60   ;;  %v269_v8 = vadd.f32 %v1469_v5, %v162_v62  ;;  %v368_v9 = vmax.f32 %v268_v63, 0.0  ;;  %v165_v10 = vmul.f32 %v1462_v2, %v58_v58  ;;  %v72_v62 = vld [vmem:[%s2113_s0 + $0x1d0] sm:$0xff]  ;;  %v73_v63 = vld [vmem:[%s2113_s0 + $0x1d8] sm:$0xff] }
  0x28   :  { %v166_v11 = vmul.f32 %v1462_v2, %v59_v59  ;;  %v1232_v13 = vpack.c.bf16 %v367_v3, %v366_v61  ;;  %v270_v14 = vadd.f32 %v1469_v5, %v163_v4  ;;  %v271_v15 = vadd.f32 %v1469_v5, %v164_v6  ;;  %v74_v6 = vld [vmem:[%s2113_s0 + $0x1e0] sm:$0xff] }
  0x29   :  { %1401 = vst [vmem:[%s2116_s3 + $0x90] sm:$0xff] %v1227_v1   ;;  %v167_v16 = vmul.f32 %v1462_v2, %v60_v0  ;;  %v369_v17 = vmax.f32 %v269_v8, 0.0  ;;  %v272_v18 = vadd.f32 %v1469_v5, %v165_v10  ;;  %v168_v20 = vmul.f32 %v1462_v2, %v61_v7  ;;  %v75_v7 = vld [vmem:[%s2113_s0 + $0x1e8] sm:$0xff] }
  0x2a   :  { %v273_v19 = vadd.f32 %v1469_v5, %v166_v11  ;;  %1402 = vst [vmem:[%s2116_s3 + $0x98] sm:$0xff] %v1232_v13   ;;  %v370_v22 = vmax.f32 %v270_v14, 0.0  ;;  %v371_v23 = vmax.f32 %v271_v15, 0.0  ;;  %v169_v25 = vmul.f32 %v1462_v2, %v62_v12  ;;  %v76_v12 = vld [vmem:[%s2113_s0 + $0x1f0] sm:$0xff] }
  0x2b   :  { %v274_v24 = vadd.f32 %v1469_v5, %v167_v16  ;;  %v1237_v28 = vpack.c.bf16 %v369_v17, %v368_v9  ;;  %v372_v29 = vmax.f32 %v272_v18, 0.0  ;;  %v275_v31 = vadd.f32 %v1469_v5, %v168_v20  ;;  %v77_v17 = vld [vmem:[%s2113_s0 + $0x1f8] sm:$0xff] }
  0x2c   :  { %v373_v30 = vmax.f32 %v273_v19, 0.0  ;;  %v1242_v34 = vpack.c.bf16 %v371_v23, %v370_v22  ;;  %v170_v36 = vmul.f32 %v1462_v2, %v63_v21  ;;  %v276_v37 = vadd.f32 %v1469_v5, %v169_v25  ;;  %v78_v22 = vld [vmem:[%s2113_s0 + $0x200] sm:$0xff] }
  0x2d   :  { %v374_v35 = vmax.f32 %v274_v24, 0.0  ;;  %1403 = vst [vmem:[%s2116_s3 + $0xa0] sm:$0xff] %v1237_v28   ;;  %v375_v40 = vmax.f32 %v275_v31, 0.0  ;;  %v171_v41 = vmul.f32 %v1462_v2, %v64_v26  ;;  %v172_v42 = vmul.f32 %v1462_v2, %v65_v27  ;;  %v79_v31 = vld [vmem:[%s2113_s0 + $0x208] sm:$0xff] }
  0x2e   :  { %v1247_v39 = vpack.c.bf16 %v373_v30, %v372_v29  ;;  %1404 = vst [vmem:[%s2116_s3 + $0xa8] sm:$0xff] %v1242_v34   ;;  %v277_v44 = vadd.f32 %v1469_v5, %v170_v36  ;;  %v376_v45 = vmax.f32 %v276_v37, 0.0  ;;  %v173_v46 = vmul.f32 %v1462_v2, %v66_v32  ;;  %v80_v36 = vld [vmem:[%s2113_s0 + $0x210] sm:$0xff]  ;;  %v81_v37 = vld [vmem:[%s2113_s0 + $0x218] sm:$0xff] }
  0x2f   :  { %v174_v47 = vmul.f32 %v1462_v2, %v67_v33  ;;  %v1252_v49 = vpack.c.bf16 %v375_v40, %v374_v35  ;;  %v278_v50 = vadd.f32 %v1469_v5, %v171_v41  ;;  %v279_v51 = vadd.f32 %v1469_v5, %v172_v42  ;;  %v82_v42 = vld [vmem:[%s2113_s0 + $0x220] sm:$0xff] }
  0x30   :  { %1405 = vst [vmem:[%s2116_s3 + $0xb0] sm:$0xff] %v1247_v39   ;;  %v175_v52 = vmul.f32 %v1462_v2, %v68_v38  ;;  %v377_v53 = vmax.f32 %v277_v44, 0.0  ;;  %v280_v54 = vadd.f32 %v1469_v5, %v173_v46  ;;  %v176_v56 = vmul.f32 %v1462_v2, %v69_v43  ;;  %v83_v43 = vld [vmem:[%s2113_s0 + $0x228] sm:$0xff] }
  0x31   :  { %v281_v55 = vadd.f32 %v1469_v5, %v174_v47  ;;  %1406 = vst [vmem:[%s2116_s3 + $0xb8] sm:$0xff] %v1252_v49   ;;  %v378_v58 = vmax.f32 %v278_v50, 0.0  ;;  %v379_v59 = vmax.f32 %v279_v51, 0.0  ;;  %v177_v61 = vmul.f32 %v1462_v2, %v70_v48  ;;  %v84_v48 = vld [vmem:[%s2113_s0 + $0x230] sm:$0xff] }
  0x32   :  { %v282_v60 = vadd.f32 %v1469_v5, %v175_v52  ;;  %v1257_v0 = vpack.c.bf16 %v377_v53, %v376_v45  ;;  %v380_v1 = vmax.f32 %v280_v54, 0.0  ;;  %v283_v4 = vadd.f32 %v1469_v5, %v176_v56  ;;  %v85_v53 = vld [vmem:[%s2113_s0 + $0x238] sm:$0xff] }
  0x33   :  { %v381_v3 = vmax.f32 %v281_v55, 0.0  ;;  %v1262_v8 = vpack.c.bf16 %v379_v59, %v378_v58  ;;  %v178_v10 = vmul.f32 %v1462_v2, %v71_v57  ;;  %v284_v11 = vadd.f32 %v1469_v5, %v177_v61  ;;  %v86_v58 = vld [vmem:[%s2113_s0 + $0x240] sm:$0xff] }
  0x34   :  { %v382_v9 = vmax.f32 %v282_v60, 0.0  ;;  %1407 = vst [vmem:[%s2116_s3 + $0xc0] sm:$0xff] %v1257_v0   ;;  %v383_v14 = vmax.f32 %v283_v4, 0.0  ;;  %v179_v15 = vmul.f32 %v1462_v2, %v72_v62  ;;  %v180_v16 = vmul.f32 %v1462_v2, %v73_v63  ;;  %v87_v4 = vld [vmem:[%s2113_s0 + $0x248] sm:$0xff] }
  0x35   :  { %v1267_v13 = vpack.c.bf16 %v381_v3, %v380_v1  ;;  %1408 = vst [vmem:[%s2116_s3 + $0xc8] sm:$0xff] %v1262_v8   ;;  %v285_v18 = vadd.f32 %v1469_v5, %v178_v10  ;;  %v384_v19 = vmax.f32 %v284_v11, 0.0  ;;  %v181_v20 = vmul.f32 %v1462_v2, %v74_v6  ;;  %v88_v10 = vld [vmem:[%s2113_s0 + $0x250] sm:$0xff]  ;;  %v89_v11 = vld [vmem:[%s2113_s0 + $0x258] sm:$0xff] }
  0x36   :  { %v182_v21 = vmul.f32 %v1462_v2, %v75_v7  ;;  %v1272_v23 = vpack.c.bf16 %v383_v14, %v382_v9  ;;  %v286_v24 = vadd.f32 %v1469_v5, %v179_v15  ;;  %v287_v25 = vadd.f32 %v1469_v5, %v180_v16  ;;  %v90_v16 = vld [vmem:[%s2113_s0 + $0x260] sm:$0xff] }
  0x37   :  { %1409 = vst [vmem:[%s2116_s3 + $0xd0] sm:$0xff] %v1267_v13   ;;  %v183_v26 = vmul.f32 %v1462_v2, %v76_v12  ;;  %v385_v27 = vmax.f32 %v285_v18, 0.0  ;;  %v288_v28 = vadd.f32 %v1469_v5, %v181_v20  ;;  %v184_v30 = vmul.f32 %v1462_v2, %v77_v17  ;;  %v91_v17 = vld [vmem:[%s2113_s0 + $0x268] sm:$0xff] }
  0x38   :  { %v289_v29 = vadd.f32 %v1469_v5, %v182_v21  ;;  %1410 = vst [vmem:[%s2116_s3 + $0xd8] sm:$0xff] %v1272_v23   ;;  %v386_v32 = vmax.f32 %v286_v24, 0.0  ;;  %v387_v33 = vmax.f32 %v287_v25, 0.0  ;;  %v185_v35 = vmul.f32 %v1462_v2, %v78_v22  ;;  %v92_v22 = vld [vmem:[%s2113_s0 + $0x270] sm:$0xff] }
  0x39   :  { %v290_v34 = vadd.f32 %v1469_v5, %v183_v26  ;;  %v1277_v38 = vpack.c.bf16 %v385_v27, %v384_v19  ;;  %v388_v39 = vmax.f32 %v288_v28, 0.0  ;;  %v291_v41 = vadd.f32 %v1469_v5, %v184_v30  ;;  %v93_v27 = vld [vmem:[%s2113_s0 + $0x278] sm:$0xff] }
  0x3a   :  { %v389_v40 = vmax.f32 %v289_v29, 0.0  ;;  %v1282_v44 = vpack.c.bf16 %v387_v33, %v386_v32  ;;  %v186_v46 = vmul.f32 %v1462_v2, %v79_v31  ;;  %v292_v47 = vadd.f32 %v1469_v5, %v185_v35  ;;  %v94_v32 = vld [vmem:[%s2113_s0 + $0x280] sm:$0xff] }
  0x3b   :  { %v390_v45 = vmax.f32 %v290_v34, 0.0  ;;  %1411 = vst [vmem:[%s2116_s3 + $0xe0] sm:$0xff] %v1277_v38   ;;  %v391_v50 = vmax.f32 %v291_v41, 0.0  ;;  %v187_v51 = vmul.f32 %v1462_v2, %v80_v36  ;;  %v188_v52 = vmul.f32 %v1462_v2, %v81_v37  ;;  %v95_v41 = vld [vmem:[%s2113_s0 + $0x288] sm:$0xff] }
  0x3c   :  { %v1287_v49 = vpack.c.bf16 %v389_v40, %v388_v39  ;;  %1412 = vst [vmem:[%s2116_s3 + $0xe8] sm:$0xff] %v1282_v44   ;;  %v293_v54 = vadd.f32 %v1469_v5, %v186_v46  ;;  %v392_v55 = vmax.f32 %v292_v47, 0.0  ;;  %v189_v56 = vmul.f32 %v1462_v2, %v82_v42  ;;  %v96_v46 = vld [vmem:[%s2113_s0 + $0x290] sm:$0xff]  ;;  %v97_v47 = vld [vmem:[%s2113_s0 + $0x298] sm:$0xff] }
  0x3d   :  { %v190_v57 = vmul.f32 %v1462_v2, %v83_v43  ;;  %v1292_v59 = vpack.c.bf16 %v391_v50, %v390_v45  ;;  %v294_v60 = vadd.f32 %v1469_v5, %v187_v51  ;;  %v295_v61 = vadd.f32 %v1469_v5, %v188_v52  ;;  %v98_v52 = vld [vmem:[%s2113_s0 + $0x2a0] sm:$0xff] }
  0x3e   :  { %1413 = vst [vmem:[%s2116_s3 + $0xf0] sm:$0xff] %v1287_v49   ;;  %v191_v62 = vmul.f32 %v1462_v2, %v84_v48  ;;  %v393_v63 = vmax.f32 %v293_v54, 0.0  ;;  %v296_v0 = vadd.f32 %v1469_v5, %v189_v56  ;;  %v192_v3 = vmul.f32 %v1462_v2, %v85_v53  ;;  %v99_v53 = vld [vmem:[%s2113_s0 + $0x2a8] sm:$0xff] }
  0x3f   :  { %v297_v1 = vadd.f32 %v1469_v5, %v190_v57  ;;  %1414 = vst [vmem:[%s2116_s3 + $0xf8] sm:$0xff] %v1292_v59   ;;  %v394_v6 = vmax.f32 %v294_v60, 0.0  ;;  %v395_v7 = vmax.f32 %v295_v61, 0.0  ;;  %v193_v9 = vmul.f32 %v1462_v2, %v86_v58  ;;  %v100_v58 = vld [vmem:[%s2113_s0 + $0x2b0] sm:$0xff] }
  0x40   :  { %v298_v8 = vadd.f32 %v1469_v5, %v191_v62  ;;  %v1297_v12 = vpack.c.bf16 %v393_v63, %v392_v55  ;;  %v396_v13 = vmax.f32 %v296_v0, 0.0  ;;  %v299_v15 = vadd.f32 %v1469_v5, %v192_v3  ;;  %v101_v63 = vld [vmem:[%s2113_s0 + $0x2b8] sm:$0xff] }
  0x41   :  { %v397_v14 = vmax.f32 %v297_v1, 0.0  ;;  %v1302_v18 = vpack.c.bf16 %v395_v7, %v394_v6  ;;  %v194_v20 = vmul.f32 %v1462_v2, %v87_v4  ;;  %v300_v21 = vadd.f32 %v1469_v5, %v193_v9  ;;  %v102_v6 = vld [vmem:[%s2113_s0 + $0x2c0] sm:$0xff] }
  0x42   :  { %v398_v19 = vmax.f32 %v298_v8, 0.0  ;;  %1415 = vst [vmem:[%s2116_s3 + $0x100] sm:$0xff] %v1297_v12   ;;  %v399_v24 = vmax.f32 %v299_v15, 0.0  ;;  %v195_v25 = vmul.f32 %v1462_v2, %v88_v10  ;;  %v196_v26 = vmul.f32 %v1462_v2, %v89_v11  ;;  %v103_v15 = vld [vmem:[%s2113_s0 + $0x2c8] sm:$0xff] }
  0x43   :  { %v1307_v23 = vpack.c.bf16 %v397_v14, %v396_v13  ;;  %1416 = vst [vmem:[%s2116_s3 + $0x108] sm:$0xff] %v1302_v18   ;;  %v301_v28 = vadd.f32 %v1469_v5, %v194_v20  ;;  %v400_v29 = vmax.f32 %v300_v21, 0.0  ;;  %v197_v30 = vmul.f32 %v1462_v2, %v90_v16  ;;  %v104_v20 = vld [vmem:[%s2113_s0 + $0x2d0] sm:$0xff]  ;;  %v105_v21 = vld [vmem:[%s2113_s0 + $0x2d8] sm:$0xff] }
  0x44   :  { %v198_v31 = vmul.f32 %v1462_v2, %v91_v17  ;;  %v1312_v33 = vpack.c.bf16 %v399_v24, %v398_v19  ;;  %v302_v34 = vadd.f32 %v1469_v5, %v195_v25  ;;  %v303_v35 = vadd.f32 %v1469_v5, %v196_v26  ;;  %v106_v26 = vld [vmem:[%s2113_s0 + $0x2e0] sm:$0xff] }
  0x45   :  { %1417 = vst [vmem:[%s2116_s3 + $0x110] sm:$0xff] %v1307_v23   ;;  %v199_v36 = vmul.f32 %v1462_v2, %v92_v22  ;;  %v401_v37 = vmax.f32 %v301_v28, 0.0  ;;  %v304_v38 = vadd.f32 %v1469_v5, %v197_v30  ;;  %v200_v40 = vmul.f32 %v1462_v2, %v93_v27  ;;  %v107_v27 = vld [vmem:[%s2113_s0 + $0x2e8] sm:$0xff] }
  0x46   :  { %v305_v39 = vadd.f32 %v1469_v5, %v198_v31  ;;  %1418 = vst [vmem:[%s2116_s3 + $0x118] sm:$0xff] %v1312_v33   ;;  %v402_v42 = vmax.f32 %v302_v34, 0.0  ;;  %v403_v43 = vmax.f32 %v303_v35, 0.0  ;;  %v201_v45 = vmul.f32 %v1462_v2, %v94_v32  ;;  %v108_v32 = vld [vmem:[%s2113_s0 + $0x2f0] sm:$0xff] }
  0x47   :  { %v306_v44 = vadd.f32 %v1469_v5, %v199_v36  ;;  %v1317_v48 = vpack.c.bf16 %v401_v37, %v400_v29  ;;  %v404_v49 = vmax.f32 %v304_v38, 0.0  ;;  %v307_v51 = vadd.f32 %v1469_v5, %v200_v40  ;;  %v109_v37 = vld [vmem:[%s2113_s0 + $0x2f8] sm:$0xff] }
  0x48   :  { %v405_v50 = vmax.f32 %v305_v39, 0.0  ;;  %v1322_v54 = vpack.c.bf16 %v403_v43, %v402_v42  ;;  %v202_v56 = vmul.f32 %v1462_v2, %v95_v41  ;;  %v308_v57 = vadd.f32 %v1469_v5, %v201_v45  ;;  %v110_v42 = vld [vmem:[%s2113_s0 + $0x300] sm:$0xff] }
  0x49   :  { %v406_v55 = vmax.f32 %v306_v44, 0.0  ;;  %1419 = vst [vmem:[%s2116_s3 + $0x120] sm:$0xff] %v1317_v48   ;;  %v407_v60 = vmax.f32 %v307_v51, 0.0  ;;  %v203_v61 = vmul.f32 %v1462_v2, %v96_v46  ;;  %v204_v62 = vmul.f32 %v1462_v2, %v97_v47  ;;  %v111_v51 = vld [vmem:[%s2113_s0 + $0x308] sm:$0xff] }
  0x4a   :  { %v1327_v59 = vpack.c.bf16 %v405_v50, %v404_v49  ;;  %1420 = vst [vmem:[%s2116_s3 + $0x128] sm:$0xff] %v1322_v54   ;;  %v309_v0 = vadd.f32 %v1469_v5, %v202_v56  ;;  %v408_v1 = vmax.f32 %v308_v57, 0.0  ;;  %v205_v3 = vmul.f32 %v1462_v2, %v98_v52  ;;  %v112_v56 = vld [vmem:[%s2113_s0 + $0x310] sm:$0xff]  ;;  %v113_v57 = vld [vmem:[%s2113_s0 + $0x318] sm:$0xff] }
  0x4b   :  { %v206_v4 = vmul.f32 %v1462_v2, %v99_v53  ;;  %v1332_v7 = vpack.c.bf16 %v407_v60, %v406_v55  ;;  %v310_v8 = vadd.f32 %v1469_v5, %v203_v61  ;;  %v311_v9 = vadd.f32 %v1469_v5, %v204_v62 }
  0x4c   :  { %1421 = vst [vmem:[%s2116_s3 + $0x130] sm:$0xff] %v1327_v59   ;;  %v207_v10 = vmul.f32 %v1462_v2, %v100_v58  ;;  %v409_v11 = vmax.f32 %v309_v0, 0.0  ;;  %v312_v12 = vadd.f32 %v1469_v5, %v205_v3  ;;  %v208_v14 = vmul.f32 %v1462_v2, %v101_v63 }
  0x4d   :  { %v313_v13 = vadd.f32 %v1469_v5, %v206_v4  ;;  %1422 = vst [vmem:[%s2116_s3 + $0x138] sm:$0xff] %v1332_v7   ;;  %v410_v16 = vmax.f32 %v310_v8, 0.0  ;;  %v411_v17 = vmax.f32 %v311_v9, 0.0  ;;  %v209_v19 = vmul.f32 %v1462_v2, %v102_v6 }
  0x4e   :  { %v314_v18 = vadd.f32 %v1469_v5, %v207_v10  ;;  %v1337_v22 = vpack.c.bf16 %v409_v11, %v408_v1  ;;  %v412_v23 = vmax.f32 %v312_v12, 0.0  ;;  %v315_v25 = vadd.f32 %v1469_v5, %v208_v14 }
  0x4f   :  { %v413_v24 = vmax.f32 %v313_v13, 0.0  ;;  %v1342_v28 = vpack.c.bf16 %v411_v17, %v410_v16  ;;  %v210_v30 = vmul.f32 %v1462_v2, %v103_v15  ;;  %v316_v31 = vadd.f32 %v1469_v5, %v209_v19 }
  0x50   :  { %v414_v29 = vmax.f32 %v314_v18, 0.0  ;;  %1423 = vst [vmem:[%s2116_s3 + $0x140] sm:$0xff] %v1337_v22   ;;  %v415_v34 = vmax.f32 %v315_v25, 0.0  ;;  %v211_v35 = vmul.f32 %v1462_v2, %v104_v20  ;;  %v212_v36 = vmul.f32 %v1462_v2, %v105_v21 }
  0x51   :  { %v1347_v33 = vpack.c.bf16 %v413_v24, %v412_v23  ;;  %1424 = vst [vmem:[%s2116_s3 + $0x148] sm:$0xff] %v1342_v28   ;;  %v317_v38 = vadd.f32 %v1469_v5, %v210_v30  ;;  %v416_v39 = vmax.f32 %v316_v31, 0.0  ;;  %v213_v40 = vmul.f32 %v1462_v2, %v106_v26 }
  0x52   :  { %v214_v41 = vmul.f32 %v1462_v2, %v107_v27  ;;  %v1352_v43 = vpack.c.bf16 %v415_v34, %v414_v29  ;;  %v318_v44 = vadd.f32 %v1469_v5, %v211_v35  ;;  %v319_v45 = vadd.f32 %v1469_v5, %v212_v36 }
  0x53   :  { %1425 = vst [vmem:[%s2116_s3 + $0x150] sm:$0xff] %v1347_v33   ;;  %v215_v46 = vmul.f32 %v1462_v2, %v108_v32  ;;  %v417_v47 = vmax.f32 %v317_v38, 0.0  ;;  %v320_v48 = vadd.f32 %v1469_v5, %v213_v40  ;;  %v216_v50 = vmul.f32 %v1462_v2, %v109_v37 }
  0x54   :  { %v321_v49 = vadd.f32 %v1469_v5, %v214_v41  ;;  %1426 = vst [vmem:[%s2116_s3 + $0x158] sm:$0xff] %v1352_v43   ;;  %v418_v52 = vmax.f32 %v318_v44, 0.0  ;;  %v419_v53 = vmax.f32 %v319_v45, 0.0  ;;  %v217_v55 = vmul.f32 %v1462_v2, %v110_v42 }
  0x55   :  { %v322_v54 = vadd.f32 %v1469_v5, %v215_v46  ;;  %v1357_v58 = vpack.c.bf16 %v417_v47, %v416_v39  ;;  %v420_v59 = vmax.f32 %v320_v48, 0.0  ;;  %v323_v61 = vadd.f32 %v1469_v5, %v216_v50 }
  0x56   :  { %v421_v60 = vmax.f32 %v321_v49, 0.0  ;;  %v1362_v62 = vpack.c.bf16 %v419_v53, %v418_v52  ;;  %v218_v0 = vmul.f32 %v1462_v2, %v111_v51  ;;  %v324_v1 = vadd.f32 %v1469_v5, %v217_v55 }
  0x57   :  { %v422_v63 = vmax.f32 %v322_v54, 0.0  ;;  %1427 = vst [vmem:[%s2116_s3 + $0x160] sm:$0xff] %v1357_v58   ;;  %v423_v4 = vmax.f32 %v323_v61, 0.0  ;;  %v219_v6 = vmul.f32 %v1462_v2, %v112_v56  ;;  %v220_v7 = vmul.f32 %v1462_v2, %v113_v57 }
  0x58   :  { %v1367_v3 = vpack.c.bf16 %v421_v60, %v420_v59  ;;  %1428 = vst [vmem:[%s2116_s3 + $0x168] sm:$0xff] %v1362_v62   ;;  %v325_v8 = vadd.f32 %v1469_v5, %v218_v0  ;;  %v424_v9 = vmax.f32 %v324_v1, 0.0 }
  0x59   :  { %v1372_v10 = vpack.c.bf16 %v423_v4, %v422_v63  ;;  %v326_v11 = vadd.f32 %v1469_v5, %v219_v6  ;;  %v327_v12 = vadd.f32 %v1469_v5, %v220_v7 }
  0x5a   :  { %1429 = vst [vmem:[%s2116_s3 + $0x170] sm:$0xff] %v1367_v3   ;;  %v425_v13 = vmax.f32 %v325_v8, 0.0 }
  0x5b   :  { %1430 = vst [vmem:[%s2116_s3 + $0x178] sm:$0xff] %v1372_v10   ;;  %v426_v2 = vmax.f32 %v326_v11, 0.0  ;;  %v427_v14 = vmax.f32 %v327_v12, 0.0 }
  0x5c   :  { %v1377_v15 = vpack.c.bf16 %v425_v13, %v424_v9 }
  0x5d   :  { %v1382_v16 = vpack.c.bf16 %v427_v14, %v426_v2 }
  0x5e   :  { %1431 = vst [vmem:[%s2116_s3 + $0x180] sm:$0xff] %v1377_v15  }
  0x5f   :  { %1432 = vst [vmem:[%s2116_s3 + $0x188] sm:$0xff] %v1382_v16  }

// kernel: basic_block_pallas.4
= control target key start
LH: loop header
LB: loop body
LE: loop exit
PB: predicated region body
PF: predicated region fallthrough
CT: control target
= control target key end

     0   :  { %s8689_s21 = smov 0   ;;  %s8691_s22 = smov 0   ;;  %s10779_s0 = inlined_call_operand.vmem [shape: bf16[20,100,64], index: 0, kind: input, shape index: {}, may-alias: {0,1,2}]   ;;  %s10780_s1 = inlined_call_operand.vmem [shape: bf16[20,100,64], index: 1, kind: input, shape index: {}, may-alias: {0,1,2}]   ;;  %s10781_s2 = inlined_call_operand.vmem [shape: bf16[20,100,64], index: 2, kind: input, shape index: {}, may-alias: {0,1,2}]   ;;  %s10782_s3 = inlined_call_operand.vmem [shape: bf16[27,64,64], index: 3, kind: input, shape index: {}]   ;;  %s10783_s4 = inlined_call_operand.vmem [shape: bf16[100,1], index: 4, kind: input, shape index: {}]   ;;  %s10784_s5 = inlined_call_operand.vmem [shape: f32[16,100,64], index: 5, kind: output, shape index: {0}]   ;;  %s10785_s6 = inlined_call_operand.vmem [shape: f32[2,2,64], index: 6, kind: output, shape index: {1}]  }
   0x1   :  { %s8693_s23 = smov 0   ;;  %s8695_s24 = smov 0  }
   0x2   :  { %s8697_s25 = smov 0  }
   0x3 LB: > { %s26_s26 = sadd.s32 1, %s8639_s23  ;;  %s29_s27 = sadd.s32 1, %s8643_s24  ;;  %s8647_s25 = sphi %s8697_s25, %s17_s25   ;;  %s8643_s24 = sphi %s8695_s24, %s10852_s24   ;;  %s8639_s23 = sphi %s8693_s23, %s10851_s23   ;;  %s8635_s22 = sphi %s8691_s22, %s10850_s22   ;;  %s8631_s21 = sphi %s8689_s21, %s10849_s21  }
   0x4   : > { %p27_p0 = scmp.ge.s32.totalorder %s26_s26, 8  ;;  %p5915_p1 = scmp.ge.s32.totalorder %s8647_s25, 1 }
   0x5   : > { %p283_p2 = scmp.lt.s32.totalorder %s8647_s25, 17 }
   0x6   : > { %s10854_s26 = smov (%p27_p0, %s26_s26), 0  ;;  %s10856_s27 = smov (!%p27_p0, %s29_s27), %s8643_s24 }
   0x7   : > { %p284_p3 = pnand %p5915_p1, %p283_p2  ;;  %p31_p4 = scmp.ge.s32.totalorder %s10856_s27, 2 }
   0x9   : > { %s10858_s27 = smov (%p31_p4, %s10856_s27), 0  ;;  %287 = sbr.rel (%p284_p3) target bundleno = 1211 (0x4bb), region = 40 }
  0x10   : > { %s337_s28 = smul.u32 10, %s8635_s22  ;;  %s5919_s29 = sshll.u32 %s8635_s22, 3 }
  0x11   : > { %s369_s7 = sadd.s32 %s8631_s21, %s5919_s29  ;;  %p377_p9 = scmp.lt.s32.totalorder %s8635_s22, 1 }
  0x12   : > { %s338_s30 = sadd.s32 %s8631_s21, %s337_s28  ;;  %p370_p8 = scmp.lt.s32.totalorder %s369_s7, 15 }
  0x13   : > { %p339_p5 = scmp.lt.s32.totalorder %s338_s30, 19  ;;  %s348_s8 = sadd.s32 1, %s338_s30 }
  0x14   : > { %p349_p6 = scmp.lt.s32.totalorder %s348_s8, 19  ;;  %s359_s9 = sadd.s32 2, %s338_s30 }
  0x15   : > { %s10860_s30 = smov (!%p339_p5, %s338_s30), 19  ;;  %p360_p7 = scmp.lt.s32.totalorder %s359_s9, 19 }
  0x16   : > { %s10862_s8 = smov (!%p349_p6, %s348_s8), 19  ;;  %s8441_s10 = smul.u32 52, %s10860_s30 }
  0x17   : > { %s8442_s11 = smul.u32 52, %s10862_s8  ;;  %s10864_s9 = smov (!%p360_p7, %s359_s9), 19 }
  0x18   : > { %s8730_s14 = scalar_lea.vmem %s10779_s0, %s8441_s10  ;;  %s10866_s7 = smov (!%p370_p8, %s369_s7), 15 }
  0x19   : > { %s8735_s17 = scalar_lea.vmem %s10780_s1, %s8442_s11  ;;  %s8443_s18 = smul.u32 52, %s10864_s9 }
  0x1a   : > { %s8444_s19 = smul.u32 104, %s10866_s7  ;;  %s10868_s22 = smov (!%p377_p9, %s8635_s22), 1 }
  0x1b   : > { %s8741_s29 = scalar_lea.vmem %s10781_s2, %s8443_s18  ;;  %s5921_s12 = sshll.u32 %s10868_s22, 1 }
  0x1c   : > { %s8746_s10 = scalar_lea.vmem %s10784_s5, %s8444_s19  ;;  %s8752_s15 = scalar_lea.vmem %s10785_s6, %s5921_s12 }
  0x1d   : > { %p5922_p10 = scmp.ne.s32.totalorder %s8631_s21, 0 }
  0x1e   : > { %vm386_vm0 = vcmask (!%p5922_p10), 517120   ;;  %v8649_v0 = vmov (!%p5922_p10), 0.0  }
  0x1f   : > { %385 = sbr.rel (%p5922_p10) target bundleno = 38 (0x26), region = 44  ;;  %387 = vst.msk [vmem:[%s8752_s15] sm:$0x3] (!%p5922_p10), %vm386_vm0, %v8649_v0 }
  0x26 PF: > { %v8759_v1 = vld [vmem:[%s10783_s4 + $0x28] sm:$0xf]  ;;  %v388_v2 = vld [vmem:[%s10783_s4] sm:$0xf]  ;;  %v10789_v3 = vmov 0   ;;  %v8651_v22 = vmov 0.0   ;;  %v422_v40 = vlaneseq }
  0x27   : > { %8491 = vset.pattern.permute.xlu1 %v10789_v3  ;;  %8490 = vset.pattern.permute.xlu0 %v10789_v3  ;;  %v8770_v4 = vld [vmem:[%s10783_s4 + $0x2c] sm:$0xf]  ;;  %v389_v5 = vld [vmem:[%s10783_s4 + $0x4] sm:$0xf]  ;;  %v390_v6 = vld [vmem:[%s10783_s4 + $0x8] sm:$0xf]  ;;  %v5595_v12 = vunpack.c.l.bf16 %v388_v2  ;;  %v5605_v33 = vunpack.c.l.bf16 %v8759_v1 }
  0x28   : > { %536 = vperm.xlu1 %8491, %v8759_v1   ;;  %416 = vperm.xlu0 %8490, %v388_v2   ;;  %v8782_v7 = vld [vmem:[%s10783_s4 + $0x30] sm:$0x3]  ;;  %v391_v9 = vld [vmem:[%s10783_s4 + $0xc] sm:$0xf]  ;;  %v394_v10 = vld [vmem:[%s10783_s4 + $0x18] sm:$0xf]  ;;  %v5596_v13 = vunpack.c.l.bf16 %v389_v5  ;;  %v5597_v18 = vunpack.c.l.bf16 %v390_v6  ;;  %v5606_v34 = vunpack.c.l.bf16 %v8770_v4 }
  0x29   : > { %v392_v8 = vld [vmem:[%s10783_s4 + $0x10] sm:$0xf]  ;;  %v393_v11 = vld [vmem:[%s10783_s4 + $0x14] sm:$0xf]  ;;  %v396_v14 = vld [vmem:[%s10783_s4 + $0x20] sm:$0xf]  ;;  %v5598_v19 = vunpack.c.l.bf16 %v391_v9  ;;  %7216 = vmatprep.subr.bf16.mxu0 %v8651_v22  ;;  %6748 = vmatprep.subr.bf16.mxu1 %v8651_v22  ;;  %v5601_v25 = vunpack.c.l.bf16 %v394_v10  ;;  %v5607_v35 = vunpack.c.l.bf16 %v8782_v7 }
  0x2a   : > { %v395_v15 = vld [vmem:[%s10783_s4 + $0x1c] sm:$0xf]  ;;  %v8492_v16 = vpack.i.bf16 %v5596_v13, %v5595_v12  ;;  %v397_v17 = vld [vmem:[%s10783_s4 + $0x24] sm:$0xf]  ;;  %v5599_v23 = vunpack.c.l.bf16 %v392_v8  ;;  %v5600_v24 = vunpack.c.l.bf16 %v393_v11  ;;  %v8499_v27 = vld [vmem:[%s10782_s3 + $0x1a8] sm:$0xff]   ;;  %v5603_v29 = vunpack.c.l.bf16 %v396_v14 }
  0x2b   : > { %v8497_v20 = vld [vmem:[%s10782_s3 + $0x1a0] sm:$0xff]   ;;  %v5602_v26 = vunpack.c.l.bf16 %v395_v15  ;;  %v8500_v28 = vld [vmem:[%s10782_s3 + $0x28] sm:$0xff]   ;;  %v5604_v30 = vunpack.c.l.bf16 %v397_v17  ;;  %v8501_v31 = vld [vmem:[%s10782_s3 + $0x1b0] sm:$0xff]   ;;  %vm8652_vm1 = vmmov 0   ;;  %v8653_v38 = vmov 839922192  }
  0x2c   : > { %548 = vperm.xlu1 %8491, %v8770_v4   ;;  %428 = vperm.xlu0 %8490, %v389_v5   ;;  %v8498_v21 = vld [vmem:[%s10782_s3 + $0x20] sm:$0xff]   ;;  %v8502_v32 = vld [vmem:[%s10782_s3 + $0x30] sm:$0xff]   ;;  %v8503_v36 = vld [vmem:[%s10782_s3 + $0x1b8] sm:$0xff]   ;;  %v420_v39 = vunpack.c.l.s4 %v8653_v38  ;;  %v423_v42 = vshrl.u32 %v422_v40, 7  ;;  %vm766_vm2 = vsmask.f32 7424 }
  0x2d   : > { %7217 = vmatpush3.bf16.msra.mxu0 %v8497_v20  ;;  %6749 = vmatpush3.bf16.msra.mxu1 %v8498_v21  ;;  %v8504_v37 = vld [vmem:[%s10782_s3 + $0x38] sm:$0xff]   ;;  %v593_v47 = vld [vmem:[%s8735_s17 + $0x28] sm:$0xf]  ;;  %v594_v50 = vld [vmem:[%s8735_s17 + $0x2c] sm:$0xf]  ;;  %vm928_vm4 = vcmask 1041408  }
  0x2e   : > { %7218 = vmatprep.subr.bf16.mxu0 %v8651_v22  ;;  %6750 = vmatprep.subr.bf16.mxu1 %v8651_v22  ;;  %v421_v41 = vunpack.c.0.s8 %v420_v39  ;;  %v619_v48 = vld [vmem:[%s8741_s29 + $0x28] sm:$0xf]  ;;  %v620_v51 = vld [vmem:[%s8741_s29 + $0x2c] sm:$0xf]  ;;  %v609_v56 = vld [vmem:[%s8741_s29] sm:$0xf] }
  0x2f   : > { %6756 = vmatprep.mubr.msk.bf16.mxu1 %vm8652_vm1, %v8651_v22  ;;  %7224 = vmatprep.mubr.msk.bf16.mxu0 %vm8652_vm1, %v8651_v22  ;;  %v610_v58 = vld [vmem:[%s8741_s29 + $0x4] sm:$0xf]  ;;  %v411_v60 = vld [vmem:[%s8730_s14 + $0x28] sm:$0xf]  ;;  %v412_v61 = vld [vmem:[%s8730_s14 + $0x2c] sm:$0xf] }
  0x30   : > { %440 = vperm.xlu1 %8491, %v390_v6   ;;  %560 = vperm.xlu0 %8490, %v8782_v7   ;;  %v8847_v43 = vsub.s32 %v421_v41, %v423_v42  ;;  %v402_v7 = vld [vmem:[%s8730_s14 + $0x4] sm:$0xf]  ;;  %v583_v12 = vld [vmem:[%s8735_s17] sm:$0xf]  ;;  %v595_v20 = vld [vmem:[%s8735_s17 + $0x30] sm:$0x3] }
  0x31   : > { %7219 = vmatpush3.bf16.msra.mxu0 %v8499_v27  ;;  %6751 = vmatpush3.bf16.msra.mxu1 %v8500_v28  ;;  %v621_v21 = vld [vmem:[%s8741_s29 + $0x30] sm:$0x3]  ;;  %vm857_vm3 = vsmask.f32 1280  ;;  %v611_v41 = vld [vmem:[%s8741_s29 + $0x8] sm:$0xf] }
  0x32   : > { %7220 = vmatprep.subr.bf16.mxu0 %v8651_v22  ;;  %6752 = vmatprep.subr.bf16.mxu1 %v8651_v22  ;;  %vm929_vm5 = vmand %vm928_vm4, %vm857_vm3  ;;  %vm668_vm6 = vsmask.f32 5376  ;;  %vm922_vm7 = vcmask 1045504   ;;  %vm925_vm8 = vcmask 1047552   ;;  %vm1031_vm11 = vcmask 523264  }
  0x33   : > { %vm923_vm9 = vmand %vm922_vm7, %vm668_vm6  ;;  %vm3184_vm12 = vsmask.f32 256  ;;  %vm1616_vm13 = vsmask.f32 2304  ;;  %vm931_vm14 = vcmask 1043456  }
  0x34   : > { %464 = vperm.xlu1 %8491, %v392_v8   ;;  %452 = vperm.xlu0 %8490, %v391_v9   ;;  %v584_v8 = vld [vmem:[%s8735_s17 + $0x4] sm:$0xf]  ;;  %vm926_vm10 = vmand %vm925_vm8, %vm766_vm2  ;;  %vm932_vm15 = vsmask.f32 3328  ;;  %vm3013_vm8 = vcmask 1040384  }
  0x35   : > { %7221 = vmatpush3.bf16.msra.mxu0 %v8501_v31  ;;  %6753 = vmatpush3.bf16.msra.mxu1 %v8502_v32  ;;  %vm933_vm0 = vmand %vm931_vm14, %vm932_vm15 }
  0x36   : > { %7222 = vmatprep.subr.bf16.mxu0 %v8651_v22  ;;  %6754 = vmatprep.subr.bf16.mxu1 %v8651_v22 }
  0x38   : > { %488 = vperm.xlu1 %8491, %v394_v10   ;;  %476 = vperm.xlu0 %8490, %v393_v11   ;;  %v401_v10 = vld [vmem:[%s8730_s14] sm:$0xf] }
  0x39   : > { %7223 = vmatpush3.bf16.msra.mxu0 %v8503_v36  ;;  %6755 = vmatpush3.bf16.msra.mxu1 %v8504_v37 }
  0x3a   : > { %7252 = vmatprep.subr.bf16.mxu0 %v8651_v22  ;;  %6784 = vmatprep.subr.bf16.mxu1 %v8651_v22 }
  0x3c   : > { %512 = vperm.xlu1 %8491, %v396_v14   ;;  %500 = vperm.xlu0 %8490, %v395_v15  }
  0x40   : > { %524 = vperm.xlu0 %8490, %v397_v17   ;;  %8493 = vperm.xlu1 %8491, %v8492_v16  }
  0x44   : > { %5620 = vperm.xlu0 %8490, %v5597_v18   ;;  %5625 = vperm.xlu1 %8491, %v5598_v19  }
  0x48   : > { %5630 = vperm.xlu0 %8490, %v5599_v23   ;;  %5635 = vperm.xlu1 %8491, %v5600_v24  }
  0x4c   : > { %5640 = vperm.xlu0 %8490, %v5601_v25   ;;  %5645 = vperm.xlu1 %8491, %v5602_v26  }
  0x50   : > { %5650 = vperm.xlu0 %8490, %v5603_v29   ;;  %5655 = vperm.xlu1 %8491, %v5604_v30   ;;  %v413_v29 = vld [vmem:[%s8730_s14 + $0x30] sm:$0x3] }
  0x54   : > { %5660 = vperm.xlu0 %8490, %v5605_v33   ;;  %5665 = vperm.xlu1 %8491, %v5606_v34  }
  0x58   : > { %5670 = vperm.xlu0 %8490, %v5607_v35  }
  0xa7   : > { %v537_v44 = vpop.permute.xlu1 %536  ;;  %v417_v45 = vpop.permute.xlu0 %416 }
  0xa8   : > { %v545_v46 = vrot.slane %v537_v44, %v8847_v43  ;;  %v425_v49 = vrot.slane %v417_v45, %v8847_v43 }
  0xaa   : > { %v606_v54 = vmul.bf16 %v593_v47, %v545_v46  ;;  %v632_v55 = vmul.bf16 %v619_v48, %v545_v46  ;;  %v622_v0 = vmul.bf16 %v609_v56, %v425_v49  ;;  %v580_v2 = vmul.bf16 %v545_v46, %v411_v60  ;;  %v403_v56 = vld [vmem:[%s8730_s14 + $0x8] sm:$0xf] }
  0xab   : > { %v549_v52 = vpop.permute.xlu1 %548  ;;  %v429_v53 = vpop.permute.xlu0 %428  ;;  %v570_v16 = vmul.bf16 %v425_v49, %v401_v10  ;;  %v596_v18 = vmul.bf16 %v583_v12, %v425_v49  ;;  %v404_v49 = vld [vmem:[%s8730_s14 + $0xc] sm:$0xf] }
  0xac   : > { %v557_v57 = vrot.slane %v549_v52, %v8847_v43  ;;  %v437_v59 = vrot.slane %v429_v53, %v8847_v43  ;;  %v586_v10 = vld [vmem:[%s8735_s17 + $0xc] sm:$0xf] }
  0xae   : > { %v607_v62 = vmul.bf16 %v594_v50, %v557_v57  ;;  %v633_v63 = vmul.bf16 %v620_v51, %v557_v57  ;;  %v623_v1 = vmul.bf16 %v610_v58, %v437_v59  ;;  %v581_v4 = vmul.bf16 %v557_v57, %v412_v61  ;;  %v612_v50 = vld [vmem:[%s8741_s29 + $0xc] sm:$0xf] }
  0xaf   : > { %v561_v11 = vpop.permute.xlu0 %560  ;;  %v571_v13 = vmul.bf16 %v437_v59, %v402_v7  ;;  %v597_v15 = vmul.bf16 %v584_v8, %v437_v59  ;;  %v441_v17 = vpop.permute.xlu1 %440 }
  0xb0   : > { %v5935_v5 = vcombine.low %v606_v54, %v607_v62  ;;  %v5942_v6 = vcombine.low %v632_v55, %v633_v63  ;;  %v5937_v9 = vcombine.low %v622_v0, %v623_v1  ;;  %v5928_v14 = vcombine.low %v580_v2, %v581_v4 }
  0xb1   : > { %v569_v23 = vrot.slane %v561_v11, %v8847_v43  ;;  %v8868_v24 = vcombine.low %v570_v16, %v571_v13  ;;  %v8870_v27 = vcombine.low %v596_v18, %v597_v15  ;;  %v8873_v28 = vrot.slane %v441_v17, %v8847_v43  ;;  %v585_v16 = vld [vmem:[%s8735_s17 + $0x8] sm:$0xf] }
  0xb2   : > { %v807_v19 = vshll.u32 %v5935_v5, 16  ;;  %v714_v25 = vshrl.u32 %v5928_v14, 16  ;;  %v717_v26 = vshll.u32 %v5928_v14, 16  ;;  %v903_v31 = vshrl.u32 %v5942_v6, 16 }
  0xb3   : > { %v453_v30 = vpop.permute.xlu0 %452  ;;  %v906_v32 = vshll.u32 %v5942_v6, 16  ;;  %v859_v33 = vshrl.u32 %v5937_v9, 16  ;;  %v862_v34 = vshll.u32 %v5937_v9, 16  ;;  %v811_v36 = vshrl.u32 %v5935_v5, 16  ;;  %v465_v62 = vpop.permute.xlu1 %464 }
  0xb4   : > { %v8876_v35 = vrot.slane %v807_v19, 1  ;;  %v608_v37 = vmul.bf16 %v595_v20, %v569_v23  ;;  %v634_v38 = vmul.bf16 %v621_v21, %v569_v23  ;;  %v670_v39 = vshrl.u32 %v8868_v24, 16  ;;  %v406_v20 = vld [vmem:[%s8730_s14 + $0x14] sm:$0xf] }
  0xb5   : > { %v673_v40 = vshll.u32 %v8868_v24, 16  ;;  %v582_v42 = vmul.bf16 %v569_v23, %v413_v29  ;;  %v8882_v44 = vrot.slane %v453_v30, %v8847_v43  ;;  %v716_v45 = vrot.slane %v714_v25, 2  ;;  %v405_v24 = vld [vmem:[%s8730_s14 + $0x10] sm:$0xf] }
  0xb6   : > { %v719_v46 = vrot.slane %v717_v26, 3  ;;  %v5936_v47 = vcombine.low %v608_v37, %v608_v37  ;;  %v5943_v48 = vcombine.low %v634_v38, %v634_v38  ;;  %v905_v51 = vrot.slane %v903_v31, 6 }
  0xb7   : > { %v908_v52 = vrot.slane %v906_v32, 7  ;;  %v861_v53 = vrot.slane %v859_v33, 6  ;;  %v864_v54 = vrot.slane %v862_v34, 7  ;;  %v813_v55 = vor.u32 %v811_v36, %v8876_v35  ;;  %v477_v1 = vpop.permute.xlu0 %476  ;;  %v489_v33 = vpop.permute.xlu1 %488  ;;  %v614_v34 = vld [vmem:[%s8741_s29 + $0x14] sm:$0xf] }
  0xb8   : > { %v815_v57 = vshll.u32 %v5936_v47, 16  ;;  %v912_v58 = vshrl.u32 %v5943_v48, 16  ;;  %v915_v59 = vshll.u32 %v5943_v48, 16  ;;  %v624_v60 = vmul.bf16 %v611_v41, %v8873_v28  ;;  %v613_v41 = vld [vmem:[%s8741_s29 + $0x10] sm:$0xf] }
  0xb9   : > { %v5929_v61 = vcombine.low %v582_v42, %v582_v42  ;;  %v573_v63 = vmul.bf16 %v8882_v44, %v404_v49  ;;  %v625_v0 = vmul.bf16 %v612_v50, %v8882_v44  ;;  %v819_v4 = vshrl.u32 %v5936_v47, 16  ;;  %v587_v49 = vld [vmem:[%s8735_s17 + $0x10] sm:$0xf] }
  0xba   : > { %v817_v2 = vrot.slane %v815_v57, 1  ;;  %v914_v5 = vrot.slane %v912_v58, 6  ;;  %v917_v6 = vrot.slane %v915_v59, 7  ;;  %v8891_v7 = vor.u32 %v908_v52, %v905_v51 }
  0xbb   : > { %v8893_v8 = vor.u32 %v864_v54, %v861_v53  ;;  %v572_v9 = vmul.bf16 %v8873_v28, %v403_v56  ;;  %v5938_v11 = vcombine.low %v624_v60, %v625_v0  ;;  %v8903_v15 = vrot.slane %v477_v1, %v8847_v43  ;;  %v501_v36 = vpop.permute.xlu0 %500  ;;  %v616_v0 = vld [vmem:[%s8741_s29 + $0x1c] sm:$0xf] }
  0xbc   : > { %v8900_v12 = vsel %vm766_vm2, %v813_v55, %v817_v2  ;;  %v821_v13 = vor.u32 %v819_v4, %v817_v2  ;;  %v918_v14 = vor.u32 %v917_v6, %v914_v5  ;;  %v723_v17 = vshrl.u32 %v5929_v61, 16 }
  0xbd   : > { %v726_v18 = vshll.u32 %v5929_v61, 16  ;;  %v8907_v19 = vrot.slane %v465_v62, %v8847_v43  ;;  %v599_v25 = vmul.bf16 %v586_v10, %v8882_v44  ;;  %v5924_v26 = vcombine.low %v572_v9, %v573_v63  ;;  %v513_v63 = vpop.permute.xlu1 %512  ;;  %v407_v9 = vld [vmem:[%s8730_s14 + $0x18] sm:$0xf] }
  0xbe   : > { %v8912_v21 = vsel %vm857_vm3, %v8891_v7, %v918_v14  ;;  %v8915_v23 = vsel %vm929_vm5, %v821_v13, %v8893_v8  ;;  %v672_v29 = vrot.slane %v670_v39, 2  ;;  %v675_v30 = vrot.slane %v673_v40, 3  ;;  %v615_v10 = vld [vmem:[%s8741_s29 + $0x18] sm:$0xf] }
  0xbf   : > { %v768_v31 = vshll.u32 %v8870_v27, 16  ;;  %v867_v32 = vshrl.u32 %v5938_v11, 16  ;;  %v8921_v37 = vor.u32 %v719_v46, %v716_v45  ;;  %v598_v38 = vmul.bf16 %v585_v16, %v8873_v28  ;;  %v588_v46 = vld [vmem:[%s8735_s17 + $0x14] sm:$0xf]  ;;  %v525_v1 = vpop.permute.xlu0 %524  ;;  %v408_v16 = vld [vmem:[%s8730_s14 + $0x1c] sm:$0xf] }
  0xc0   : > { %v870_v42 = vshll.u32 %v5938_v11, 16  ;;  %v575_v44 = vmul.bf16 %v8903_v15, %v406_v20  ;;  %v725_v39 = vrot.slane %v723_v17, 2  ;;  %v728_v40 = vrot.slane %v726_v18, 3 }
  0xc1   : > { %v574_v47 = vmul.bf16 %v8907_v19, %v405_v24  ;;  %v869_v48 = vrot.slane %v867_v32, 6  ;;  %v678_v50 = vshrl.u32 %v5924_v26, 16  ;;  %v8928_v51 = vcombine.low %v598_v38, %v599_v25 }
  0xc2   : > { %v872_v45 = vrot.slane %v870_v42, 7  ;;  %v627_v52 = vmul.bf16 %v614_v34, %v8903_v15  ;;  %v8932_v28 = vrot.slane %v768_v31, 1  ;;  %v771_v53 = vshrl.u32 %v8870_v27, 16  ;;  %v590_v34 = vld [vmem:[%s8735_s17 + $0x1c] sm:$0xf] }
  0xc3   : > { %v626_v54 = vmul.bf16 %v613_v41, %v8907_v19  ;;  %v5925_v55 = vcombine.low %v574_v47, %v575_v44  ;;  %v8936_v56 = vor.u32 %v675_v30, %v672_v29  ;;  %v681_v57 = vshll.u32 %v5924_v26, 16  ;;  %v617_v29 = vld [vmem:[%s8741_s29 + $0x20] sm:$0xf]  ;;  %v618_v30 = vld [vmem:[%s8741_s29 + $0x24] sm:$0xf] }
  0xc4   : > { %v873_v58 = vor.u32 %v872_v45, %v869_v48  ;;  %v8939_v59 = vrot.slane %v501_v36, %v8847_v43  ;;  %v600_v60 = vmul.bf16 %v587_v49, %v8907_v19  ;;  %v8943_v61 = vrot.slane %v489_v33, %v8847_v43 }
  0xc5   : > { %v601_v27 = vmul.bf16 %v588_v46, %v8903_v15  ;;  %v5939_v62 = vcombine.low %v626_v54, %v627_v52  ;;  %v729_v2 = vor.u32 %v728_v40, %v725_v39  ;;  %v680_v4 = vrot.slane %v678_v50, 2  ;;  %v589_v40 = vld [vmem:[%s8735_s17 + $0x18] sm:$0xf]  ;;  %v409_v54 = vld [vmem:[%s8730_s14 + $0x20] sm:$0xf] }
  0xc6   : > { %v775_v5 = vshll.u32 %v8928_v51, 16  ;;  %v8950_v6 = vsel %vm857_vm3, %v8893_v8, %v873_v58  ;;  %v687_v11 = vshrl.u32 %v5925_v55, 16  ;;  %v690_v13 = vshll.u32 %v5925_v55, 16 }
  0xc7   : > { %v876_v14 = vshrl.u32 %v5939_v62, 16  ;;  %v879_v15 = vshll.u32 %v5939_v62, 16  ;;  %v683_v17 = vrot.slane %v681_v57, 3  ;;  %v8956_v18 = vrot.slane %v513_v63, %v8847_v43 }
  0xc8   : > { %v629_v19 = vmul.bf16 %v616_v0, %v8939_v59  ;;  %v8960_v20 = vrot.slane %v525_v1, %v8847_v43  ;;  %v628_v8 = vmul.bf16 %v615_v10, %v8943_v61  ;;  %v8963_v24 = vcombine.low %v600_v60, %v601_v27 }
  0xc9   : > { %v878_v25 = vrot.slane %v876_v14, 6  ;;  %v881_v26 = vrot.slane %v879_v15, 7  ;;  %v773_v31 = vor.u32 %v771_v53, %v8932_v28  ;;  %v730_v32 = vsel %vm668_vm6, %v8921_v37, %v729_v2  ;;  %v410_v2 = vld [vmem:[%s8730_s14 + $0x24] sm:$0xf] }
  0xca   : > { %v576_v33 = vmul.bf16 %v8943_v61, %v407_v9  ;;  %v577_v43 = vmul.bf16 %v8939_v59, %v408_v16  ;;  %v689_v36 = vrot.slane %v687_v11, 2  ;;  %v692_v38 = vrot.slane %v690_v13, 3 }
  0xcb   : > { %v882_v41 = vor.u32 %v881_v26, %v878_v25  ;;  %v5940_v42 = vcombine.low %v628_v8, %v629_v19  ;;  %v684_v44 = vor.u32 %v683_v17, %v680_v4  ;;  %v777_v39 = vrot.slane %v775_v5, 1 }
  0xcc   : > { %v630_v47 = vmul.bf16 %v617_v29, %v8956_v18  ;;  %v631_v48 = vmul.bf16 %v618_v30, %v8960_v20  ;;  %v783_v49 = vshll.u32 %v8963_v24, 16  ;;  %v603_v45 = vmul.bf16 %v590_v34, %v8939_v59 }
  0xcd   : > { %v8982_v50 = vsel %vm857_vm3, %v873_v58, %v882_v41  ;;  %v885_v46 = vshrl.u32 %v5940_v42, 16  ;;  %v8986_v52 = vsel %vm923_vm9, 0, %v8936_v56  ;;  %v779_v53 = vshrl.u32 %v8928_v51, 16 }
  0xce   : > { %v5926_v55 = vcombine.low %v576_v33, %v577_v43  ;;  %v888_v57 = vshll.u32 %v5940_v42, 16  ;;  %v602_v60 = vmul.bf16 %v589_v40, %v8943_v61  ;;  %v8991_v27 = vor.u32 %v692_v38, %v689_v36 }
  0xcf   : > { %v887_v62 = vrot.slane %v885_v46, 6  ;;  %v5941_v58 = vcombine.low %v630_v47, %v631_v48  ;;  %v8994_v63 = vsel %vm926_vm10, %v730_v32, %v8932_v28  ;;  %v8997_v59 = vsel %vm766_vm2, %v773_v31, %v777_v39  ;;  %v592_v28 = vld [vmem:[%s8735_s17 + $0x24] sm:$0xf] }
  0xd0   : > { %v781_v0 = vor.u32 %v779_v53, %v777_v39  ;;  %v890_v1 = vrot.slane %v888_v57, 7  ;;  %v9002_v51 = vsel %vm668_vm6, %v8936_v56, %v684_v44  ;;  %v785_v61 = vrot.slane %v783_v49, 1  ;;  %v8506_v47 = vld [vmem:[%s10782_s3] sm:$0xff]  }
  0xd1   : > { %v578_v4 = vmul.bf16 %v8956_v18, %v409_v54  ;;  %v9005_v5 = vcombine.low %v602_v60, %v603_v45  ;;  %v696_v9 = vshrl.u32 %v5926_v55, 16  ;;  %v894_v11 = vshrl.u32 %v5941_v58, 16 }
  0xd2   : > { %v891_v10 = vor.u32 %v890_v1, %v887_v62  ;;  %v897_v13 = vshll.u32 %v5941_v58, 16  ;;  %v9010_v14 = vsel %vm668_vm6, %v684_v44, %v8991_v27  ;;  %v787_v15 = vshrl.u32 %v8963_v24, 16  ;;  %v591_v24 = vld [vmem:[%s8735_s17 + $0x20] sm:$0xf] }
  0xd3   : > { %v699_v16 = vshll.u32 %v5926_v55, 16  ;;  %v579_v56 = vmul.bf16 %v8960_v20, %v410_v2  ;;  %v896_v19 = vrot.slane %v894_v11, 6  ;;  %v955_v25 = vshll.u32 %v8986_v52, 16  ;;  %v8505_v1 = vld [vmem:[%s10782_s3 + $0x1c0] sm:$0xff]  }
  0xd4   : > { %v9015_v17 = vsel %vm857_vm3, %v882_v41, %v891_v10  ;;  %v899_v8 = vrot.slane %v897_v13, 7  ;;  %v9019_v26 = vsel %vm766_vm2, %v781_v0, %v785_v61  ;;  %v791_v29 = vshll.u32 %v9005_v5, 16 }
  0xd5   : > { %v605_v30 = vmul.bf16 %v592_v28, %v8960_v20  ;;  %v9024_v31 = vshll.u32 %v9002_v51, 16  ;;  %v698_v32 = vrot.slane %v696_v9, 2  ;;  %v953_v34 = vshrl.u32 %v8986_v52, 16 }
  0xd6   : > { %v900_v33 = vor.u32 %v899_v8, %v896_v19  ;;  %v957_v43 = vrot.slane %v955_v25, 1  ;;  %v701_v36 = vrot.slane %v699_v16, 3  ;;  %v5927_v38 = vcombine.low %v578_v4, %v579_v56  ;;  %v8512_v8 = vld [vmem:[%s10782_s3 + $0x10] sm:$0xff]  }
  0xd7   : > { %v962_v41 = vrot.slane %v9024_v31, 1  ;;  %v9032_v42 = vshrl.u32 %v8994_v63, 16  ;;  %v9044_v40 = vshrl.u32 %v8997_v59, 16  ;;  %v789_v48 = vor.u32 %v787_v15, %v785_v61  ;;  %v8509_v61 = vld [vmem:[%s10782_s3 + $0x8] sm:$0xff]  }
  0xd8   : > { %v9035_v20 = vsel %vm857_vm3, %v891_v10, %v900_v33  ;;  %v9039_v44 = vsel %vm857_vm3, %v900_v33, %v8891_v7  ;;  %v958_v39 = vor.u32 %v957_v43, %v953_v34  ;;  %v604_v49 = vmul.bf16 %v591_v24, %v8956_v18 }
  0xd9   : > { %v793_v45 = vrot.slane %v791_v29, 1  ;;  %v9051_v46 = vshll.u32 %v8997_v59, 16  ;;  %v3186_v53 = vrot.slane %v9044_v40, 7  ;;  %v9056_v54 = vshll.u32 %v9010_v14, 16 }
  0xda   : > { %v963_v7 = vsel %vm766_vm2, %v958_v39, %v962_v41  ;;  %v9059_v55 = vshrl.u32 %v9019_v26, 16  ;;  %v702_v57 = vor.u32 %v701_v36, %v698_v32  ;;  %v705_v60 = vshrl.u32 %v5927_v38, 16 }
  0xdb   : > { %v708_v62 = vshll.u32 %v5927_v38, 16  ;;  %v9061_v58 = vcombine.low %v604_v49, %v605_v30  ;;  %6757 = vmatmul.mubr.msk.bf16.vlgmr.msra.gmra.mrb[0].mxu1 %vm1031_vm11, %v963_v7  ;;  %v3185_v18 = vrot.slane %v9032_v42, 7  ;;  %v3187_v0 = vor.u32 %v3186_v53, %v9051_v46  ;;  %v8508_v38 = vld [vmem:[%s10782_s3 + $0x1d0] sm:$0xff]  }
  0xdc   : > { %6760 = vmatprep.mubr.msk.bf16.mxu1 %vm8652_vm1, %v8651_v22  ;;  %6785 = vmatpush3.bf16.msra.mxu1 %v8506_v47  ;;  %v9072_v2 = vsel %vm766_vm2, %v789_v48, %v793_v45  ;;  %v9080_v9 = vshrl.u32 %v9002_v51, 16  ;;  %v970_v10 = vrot.slane %v9056_v54, 1  ;;  %v3189_v28 = vrot.slane %v9059_v55, 7 }
  0xdd   : > { %6786 = vmatprep.subr.bf16.mxu1 %v8651_v22  ;;  %v3188_v4 = vsel %vm3184_vm12, %v3185_v18, %v3187_v0  ;;  %v9086_v11 = vsel %vm668_vm6, %v8991_v27, %v702_v57  ;;  %v707_v13 = vrot.slane %v705_v60, 2  ;;  %v710_v15 = vrot.slane %v708_v62, 3  ;;  %v8507_v27 = vld [vmem:[%s10782_s3 + $0x1c8] sm:$0xff]  }
  0xde   : > { %v799_v16 = vshll.u32 %v9061_v58, 16  ;;  %7225 = vmatmul.mubr.msk.bf16.vlgmr.msra.gmra.mrb[0].mxu0 %vm1031_vm11, %v3188_v4  ;;  %v966_v56 = vor.u32 %v9080_v9, %v962_v41  ;;  %v9094_v19 = vshll.u32 %v9019_v26, 16  ;;  %v9106_v24 = vshll.u32 %v9086_v11, 16 }
  0xdf   : > { %7253 = vmatpush3.bf16.msra.mxu0 %v8505_v1  ;;  %7228 = vmatprep.mubr.msk.bf16.mxu0 %vm8652_vm1, %v8651_v22  ;;  %v9109_v32 = vshrl.u32 %v9072_v2, 16  ;;  %v795_v33 = vshrl.u32 %v9005_v5, 16  ;;  %v711_v43 = vor.u32 %v710_v15, %v707_v13  ;;  %v8514_v5 = vld [vmem:[%s10782_s3 + $0x18] sm:$0xff]   ;;  %v9127_v47 = vshrl.u32 %v9010_v14, 16 }
  0xe0   : > { %7254 = vmatprep.subr.bf16.mxu0 %v8651_v22  ;;  %6787 = vmatpush3.bf16.msra.mxu1 %v8509_v61  ;;  %v971_v29 = vsel %vm766_vm2, %v966_v56, %v970_v10  ;;  %v3190_v30 = vor.u32 %v3189_v28, %v9094_v19  ;;  %v9113_v36 = vrot.slane %v799_v16, 1  ;;  %v978_v48 = vrot.slane %v9106_v24, 1 }
  0xe1   : > { %6788 = vmatprep.subr.bf16.mxu1 %v8651_v22  ;;  %v797_v41 = vor.u32 %v795_v33, %v793_v45  ;;  %v3192_v49 = vrot.slane %v9109_v32, 7  ;;  %v9133_v45 = vsel %vm668_vm6, %v702_v57, %v711_v43  ;;  %v9144_v60 = vshll.u32 %v9072_v2, 16  ;;  %v8510_v57 = vld [vmem:[%s10782_s3 + $0x1d8] sm:$0xff]  }
  0xe2   : > { %v3191_v39 = vsel %vm3184_vm12, %v3186_v53, %v3190_v30  ;;  %v974_v53 = vor.u32 %v9127_v47, %v970_v10  ;;  %v3683_v62 = vrot.slane %v9044_v40, 4  ;;  %v9154_v1 = vshll.u32 %v9133_v45, 16 }
  0xe3   : > { %6761 = vmatmul.mubr.msk.bf16.gmra.mrb[4].mxu1 %vm1031_vm11, %v971_v29  ;;  %7255 = vmatpush3.bf16.msra.mxu0 %v8507_v27  ;;  %v9137_v7 = vsel %vm766_vm2, %v797_v41, %v9113_v36  ;;  %v3193_v0 = vor.u32 %v3192_v49, %v9144_v60  ;;  %v3684_v4 = vrot.slane %v9051_v46, 5  ;;  %v9169_v15 = vshrl.u32 %v9086_v11, 16 }
  0xe4   : > { %6764 = vmatprep.mubr.msk.bf16.mxu1 %vm8652_vm1, %v8651_v22  ;;  %7256 = vmatprep.subr.bf16.mxu0 %v8651_v22  ;;  %v979_v18 = vsel %vm766_vm2, %v974_v53, %v978_v48  ;;  %v9157_v61 = vshrl.u32 %v9137_v7, 16  ;;  %v986_v16 = vrot.slane %v9154_v1, 1  ;;  %v1617_v33 = vrot.slane %v953_v34, 5 }
  0xe5   : > { %6789 = vmatpush3.bf16.msra.mxu1 %v8512_v8  ;;  %v9165_v10 = vor.u32 %v3684_v4, %v3683_v62  ;;  %v3194_v13 = vsel %vm3184_vm12, %v3189_v28, %v3193_v0  ;;  %v982_v27 = vor.u32 %v9169_v15, %v978_v48  ;;  %v9178_v8 = vshll.u32 %v9137_v7, 16 }
  0xe6   : > { %6790 = vmatprep.subr.bf16.mxu1 %v8651_v22  ;;  %7229 = vmatmul.mubr.msk.bf16.gmra.mrb[4].mxu0 %vm1031_vm11, %v3191_v39  ;;  %v10786_v56 = vrot.slane %v9157_v61, 7  ;;  %v9182_v28 = vsel %vm668_vm6, %v711_v43, %v8921_v37  ;;  %v9196_v37 = vshrl.u32 %v9133_v45, 16  ;;  %v1621_v53 = vrot.slane %v9024_v31, 6 }
  0xe7   : > { %7232 = vmatprep.mubr.msk.bf16.mxu0 %vm8652_vm1, %v8651_v22  ;;  %7257 = vmatpush3.bf16.msra.mxu0 %v8508_v38  ;;  %v987_v29 = vsel %vm766_vm2, %v982_v27, %v986_v16  ;;  %v1618_v38 = vrot.slane %v955_v25, 6  ;;  %v9199_v43 = vshll.u32 %v9182_v28, 16  ;;  %v1620_v25 = vrot.slane %v9080_v9, 5  ;;  %v8511_v27 = vld [vmem:[%s10782_s3 + $0x1e0] sm:$0xff]  }
  0xe8   : > { %7258 = vmatprep.subr.bf16.mxu0 %v8651_v22  ;;  %v3196_v30 = vor.u32 %v10786_v56, %v9178_v8  ;;  %v9209_v48 = vshrl.u32 %v9182_v28, 16  ;;  %v1625_v62 = vrot.slane %v9056_v54, 6  ;;  %v1629_v0 = vrot.slane %v9106_v24, 6 }
  0xe9   : > { %6791 = vmatpush3.bf16.msra.mxu1 %v8514_v5  ;;  %v990_v5 = vor.u32 %v9196_v37, %v986_v16  ;;  %v1619_v34 = vor.u32 %v1618_v38, %v1617_v33  ;;  %v994_v39 = vrot.slane %v9199_v43, 1  ;;  %v9219_v4 = vshll.u32 %v8994_v63, 16 }
  0xea   : > { %6820 = vmatprep.subr.bf16.mxu1 %v8651_v22  ;;  %v3197_v41 = vsel %vm3184_vm12, %v3192_v49, %v3196_v30  ;;  %v1624_v49 = vrot.slane %v9127_v47, 5  ;;  %v1632_v16 = vrot.slane %v9196_v37, 5  ;;  %v1633_v33 = vrot.slane %v9154_v1, 6 }
  0xeb   : > { %6765 = vmatmul.mubr.msk.bf16.gmra.mrb[8].mxu1 %vm1031_vm11, %v979_v18  ;;  %7259 = vmatpush3.bf16.msra.mxu0 %v8510_v57  ;;  %v995_v57 = vsel %vm766_vm2, %v990_v5, %v994_v39  ;;  %v1628_v18 = vrot.slane %v9169_v15, 5  ;;  %v998_v38 = vor.u32 %v9209_v48, %v994_v39  ;;  %v1636_v5 = vrot.slane %v9209_v48, 5 }
  0xec   : > { %6768 = vmatprep.mubr.msk.bf16.mxu1 %vm8652_vm1, %v8651_v22  ;;  %7288 = vmatprep.subr.bf16.mxu0 %v8651_v22  ;;  %v1634_v56 = vor.u32 %v1633_v33, %v1632_v16  ;;  %vm1278_vm5 = vcmask 1046528   ;;  %vm1447_vm9 = vcmask 1042432   ;;  %vm2322_vm10 = vcmask 1044480  }
  0xed   : > { %v1630_v30 = vor.u32 %v1629_v0, %v1628_v18  ;;  %v8513_v18 = vld [vmem:[%s10782_s3 + $0x1e8] sm:$0xff]  }
  0xee   : > { %7233 = vmatmul.mubr.msk.bf16.gmra.mrb[8].mxu0 %vm1031_vm11, %v3194_v13  ;;  %v1622_v13 = vor.u32 %v1621_v53, %v1620_v25  ;;  %v1637_v25 = vrot.slane %v9199_v43, 6 }
  0xef   : > { %7236 = vmatprep.mubr.msk.bf16.mxu0 %vm8652_vm1, %v8651_v22  ;;  %v9251_v0 = vsel %vm1616_vm13, %v1630_v30, %v1634_v56 }
  0xf0   : > { %v1638_v39 = vor.u32 %v1637_v25, %v1636_v5  ;;  %v2135_v5 = vrot.slane %v9080_v9, 2  ;;  %v2136_v25 = vrot.slane %v9024_v31, 3  ;;  %v8518_v31 = vld [vmem:[%s10782_s3 + $0x48] sm:$0xff]  }
  0xf3   : > { %6769 = vmatmul.mubr.msk.bf16.gmra.mrb[12].mxu1 %vm1031_vm11, %v987_v29  ;;  %v1626_v29 = vor.u32 %v1625_v62, %v1624_v49  ;;  %v1640_v49 = vrot.slane %v9032_v42, 5  ;;  %v1002_v62 = vrot.slane %v9219_v4, 1 }
  0xf4   : > { %6772 = vmatprep.mubr.msk.bf16.mxu1 %vm8652_vm1, %v8651_v22 }
  0xf5   : > { %v9235_v53 = vsel %vm1616_vm13, %v1622_v13, %v1626_v29  ;;  %v1006_v33 = vor.u32 %v9032_v42, %v1002_v62 }
  0xf6   : > { %7237 = vmatmul.mubr.msk.bf16.gmra.mrb[12].mxu0 %vm1031_vm11, %v3197_v41  ;;  %v9230_v41 = vsel %vm1616_vm13, %v1619_v34, %v1622_v13  ;;  %v1641_v34 = vrot.slane %v9219_v4, 6  ;;  %v9255_v13 = vsel %vm1616_vm13, %v1634_v56, %v1638_v39  ;;  %v8517_v56 = vld [vmem:[%s10782_s3 + $0x1f8] sm:$0xff]  }
  0xf7   : > { %7260 = vmatprep.mubr.msk.bf16.mxu0 %vm8652_vm1, %v8651_v22 }
  0xf8   : > { %v9257_v16 = vor.u32 %v1641_v34, %v1640_v49  ;;  %v2138_v49 = vrot.slane %v9127_v47, 2  ;;  %v2137_v34 = vor.u32 %v2136_v25, %v2135_v5 }
  0xfb   : > { %6773 = vmatmul.mubr.msk.bf16.gmra.mrb[16].mxu1 %vm1031_vm11, %v995_v57  ;;  %v9238_v57 = vsel %vm1616_vm13, %v1626_v29, %v1630_v30  ;;  %v9263_v29 = vsel %vm1616_vm13, %v1638_v39, %v9257_v16  ;;  %v8515_v30 = vld [vmem:[%s10782_s3 + $0x1f0] sm:$0xff]   ;;  %v2139_v39 = vrot.slane %v9056_v54, 3  ;;  %v2146_v54 = vrot.slane %v9196_v37, 2 }
  0xfc   : > { %6776 = vmatprep.mubr.msk.bf16.mxu1 %vm8652_vm1, %v8651_v22 }
  0xfd   : > { %v2140_v9 = vor.u32 %v2139_v39, %v2138_v49 }
  0xfe   : > { %7261 = vmatmul.mubr.msk.bf16.vlgmr.msra.gmra.mrb[0].mxu0 %vm1031_vm11, %v8997_v59 }
  0xff   : > { %7289 = vmatpush3.bf16.msra.mxu0 %v8511_v27  ;;  %7264 = vmatprep.mubr.msk.bf16.mxu0 %vm8652_vm1, %v8651_v22  ;;  %v1003_v27 = vsel %vm766_vm2, %v998_v38, %v1002_v62  ;;  %v8516_v38 = vld [vmem:[%s10782_s3 + $0x40] sm:$0xff]   ;;  %v2142_v62 = vrot.slane %v9169_v15, 2  ;;  %v2147_v15 = vrot.slane %v9154_v1, 3  ;;  %v2155_v1 = vrot.slane %v9219_v4, 3 }
 0x100   : > { %7290 = vmatprep.subr.bf16.mxu0 %v8651_v22  ;;  %v9336_v4 = vsel %vm933_vm0, %v8912_v21, 0  ;;  %v8522_v21 = vld [vmem:[%s10782_s3 + $0x58] sm:$0xff]  }
 0x103   : > { %6777 = vmatmul.mubr.msk.bf16.gmra.mrb[20].mxu1 %vm1031_vm11, %v1003_v27  ;;  %7291 = vmatpush3.bf16.msra.mxu0 %v8513_v18  ;;  %v2143_v18 = vrot.slane %v9106_v24, 3  ;;  %v2150_v24 = vrot.slane %v9209_v48, 2  ;;  %v9309_v27 = vsel %vm668_vm6, %v2137_v34, %v2140_v9  ;;  %v803_v48 = vshrl.u32 %v9061_v58, 16 }
 0x104   : > { %6780 = vmatprep.mubr.msk.bf16.mxu1 %vm8652_vm1, %v8651_v22  ;;  %7292 = vmatprep.subr.bf16.mxu0 %v8651_v22  ;;  %v2164_v58 = vrot.slane %v9051_v46, 3  ;;  %v9356_v46 = vshrl.u32 %v8950_v6, 16 }
 0x105   : > { %v2144_v47 = vor.u32 %v2143_v18, %v2142_v62  ;;  %v805_v49 = vor.u32 %v803_v48, %v9113_v36  ;;  %v9359_v36 = vshll.u32 %v8950_v6, 16  ;;  %v10788_v62 = vrot.slane %v9039_v44, 1 }
 0x106   : > { %7265 = vmatmul.mubr.msk.bf16.gmra.mrb[4].mxu0 %vm1031_vm11, %v9019_v26  ;;  %v9364_v18 = vshrl.u32 %v8982_v50, 16  ;;  %v9404_v48 = vshll.u32 %v9039_v44, 16 }
 0x107   : > { %7268 = vmatprep.mubr.msk.bf16.mxu0 %vm8652_vm1, %v8651_v22  ;;  %7293 = vmatpush3.bf16.msra.mxu0 %v8515_v30  ;;  %v2151_v30 = vrot.slane %v9199_v43, 3  ;;  %v9318_v37 = vsel %vm668_vm6, %v2140_v9, %v2144_v47  ;;  %v10787_v9 = vrot.slane %v9336_v4, 1 }
 0x108   : > { %7294 = vmatprep.subr.bf16.mxu0 %v8651_v22  ;;  %10798 = vst [vmem:[#allocation2_spill] sm:$0xff] %v9318_v37 }
 0x109   : > { %v2152_v43 = vor.u32 %v2151_v30, %v2150_v24  ;;  %v9383_v24 = vshrl.u32 %v9035_v20, 16  ;;  %v9386_v30 = vshll.u32 %v9035_v20, 16 }
 0x10b   : > { %6781 = vmatmul.mubr.msk.bf16.gmra.mrb[24].mxu1 %vm1031_vm11, %v1006_v33  ;;  %7295 = vmatpush3.bf16.msra.mxu0 %v8517_v56  ;;  %v2154_v56 = vrot.slane %v9032_v42, 2  ;;  %v2148_v33 = vor.u32 %v2147_v15, %v2146_v54  ;;  %v8520_v42 = vld [vmem:[%s10782_s3 + $0x50] sm:$0xff]   ;;  %v9372_v54 = vsel %vm766_vm2, %v805_v49, %v8876_v35  ;;  %v9378_v15 = vshll.u32 %v9015_v17, 16 }
 0x10c   : > { %6792 = vmatprep.mubr.msk.bf16.mxu1 %vm8652_vm1, %v8651_v22  ;;  %7324 = vmatprep.subr.bf16.mxu0 %v8651_v22  ;;  %v9393_v35 = vsel %vm1278_vm5, %v10788_v62, %v10787_v9  ;;  %v4739_v9 = vrot.slane %v9383_v24, 1  ;;  %v4740_v62 = vrot.slane %v9386_v30, 2  ;;  %vm4723_vm2 = vsmask.f32 6400 }
 0x10d   : > { %v9330_v5 = vsel %vm668_vm6, %v2144_v47, %v2148_v33  ;;  %v9332_v25 = vor.u32 %v2155_v1, %v2154_v56  ;;  %v9340_v39 = vsel %vm668_vm6, %v2148_v33, %v2152_v43  ;;  %v9375_v47 = vshrl.u32 %v9015_v17, 16  ;;  %10804 = vst [vmem:[#allocation8_spill] sm:$0xff] %v9393_v35 }
 0x10e   : > { %7269 = vmatmul.mubr.msk.bf16.gmra.mrb[8].mxu0 %vm1031_vm11, %v9072_v2  ;;  %10799 = vst [vmem:[#allocation3_spill] sm:$0xff] %v9330_v5  ;;  %10801 = vst [vmem:[#allocation5_spill] sm:$0xff] %v9340_v39  ;;  %v9398_v56 = vshrl.u32 %v9039_v44, 16  ;;  %v4727_v33 = vrot.slane %v9356_v46, 1  ;;  %v4728_v1 = vrot.slane %v9359_v36, 2  ;;  %v4736_v49 = vrot.slane %v9378_v15, 2 }
 0x10f   : > { %7272 = vmatprep.mubr.msk.bf16.mxu0 %vm8652_vm1, %v8651_v22  ;;  %10800 = vst [vmem:[#allocation4_spill] sm:$0xff] %v9332_v25  ;;  %v4741_v35 = vor.u32 %v4740_v62, %v4739_v9 }
 0x113   : > { %6793 = vmatmul.mubr.msk.bf16.vlgmr.msra.gmra.mrb[0].mxu1 %vm1031_vm11, %v8986_v52 }
 0x114   : > { %6796 = vmatprep.mubr.msk.bf16.mxu1 %vm8652_vm1, %v8651_v22  ;;  %6821 = vmatpush3.bf16.msra.mxu1 %v8516_v38  ;;  %v2161_v38 = vrot.slane %v9044_v40, 2  ;;  %v9346_v40 = vsel %vm668_vm6, %v2152_v43, %v9332_v25  ;;  %v4744_v25 = vrot.slane %v9404_v48, 2 }
 0x115   : > { %6822 = vmatprep.subr.bf16.mxu1 %v8651_v22  ;;  %10802 = vst [vmem:[#allocation6_spill] sm:$0xff] %v9346_v40 }
 0x116   : > { %7273 = vmatmul.mubr.msk.bf16.gmra.mrb[12].mxu0 %vm1031_vm11, %v9137_v7  ;;  %v9348_v34 = vor.u32 %v2164_v58, %v2161_v38  ;;  %v9408_v38 = vor.u32 %v4728_v1, %v4727_v33  ;;  %v4735_v58 = vrot.slane %v9375_v47, 1  ;;  %v4743_v33 = vrot.slane %v9398_v56, 1 }
 0x117   : > { %7276 = vmatprep.mubr.msk.bf16.mxu0 %vm8652_vm1, %v8651_v22 }
 0x118   : > { %6823 = vmatpush3.bf16.msra.mxu1 %v8518_v31  ;;  %10803 = vst [vmem:[#allocation7_spill] sm:$0xff] %v9348_v34  ;;  %v9367_v31 = vshll.u32 %v8982_v50, 16  ;;  %10805 = vst [vmem:[#allocation9_spill] sm:$0xff] %v9408_v38  ;;  %v4737_v3 = vor.u32 %v4736_v49, %v4735_v58  ;;  %v4751_v34 = vshll.u32 %v9336_v4, 16  ;;  %v4745_v49 = vor.u32 %v4744_v25, %v4743_v33  ;;  %v8519_v33 = vld [vmem:[%s10782_s3 + $0x200] sm:$0xff]  }
 0x119   : > { %6824 = vmatprep.subr.bf16.mxu1 %v8651_v22  ;;  %v3516_v25 = vrot.slane %v9019_v26, 4 }
 0x11a   : > { %v4732_v43 = vrot.slane %v9367_v31, 2  ;;  %v9432_v58 = vsel %vm4723_vm2, %v4737_v3, %v4741_v35  ;;  %v4753_v9 = vrot.slane %v4751_v34, 2  ;;  %v5271_v37 = vrot.slane %v4751_v34, 7 }
 0x11b   : > { %6797 = vmatmul.mubr.msk.bf16.gmra.mrb[4].mxu1 %vm1031_vm11, %v9002_v51  ;;  %10808 = vst [vmem:[#allocation12_spill] sm:$0xff] %v9432_v58  ;;  %v5259_v58 = vrot.slane %v9378_v15, 7 }
 0x11c   : > { %6800 = vmatprep.mubr.msk.bf16.mxu1 %vm8652_vm1, %v8651_v22  ;;  %6825 = vmatpush3.bf16.msra.mxu1 %v8520_v42  ;;  %v4731_v42 = vrot.slane %v9364_v18, 1 }
 0x11d   : > { %6826 = vmatprep.subr.bf16.mxu1 %v8651_v22 }
 0x11e   : > { %7277 = vmatmul.mubr.msk.bf16.gmra.mrb[16].mxu0 %vm1031_vm11, %v9372_v54 }
 0x11f   : > { %7280 = vmatprep.mubr.msk.bf16.mxu0 %vm8652_vm1, %v8651_v22 }
 0x120   : > { %6827 = vmatpush3.bf16.msra.mxu1 %v8522_v21  ;;  %v4733_v21 = vor.u32 %v4732_v43, %v4731_v42  ;;  %v4748_v43 = vshrl.u32 %v9336_v4, 16 }
 0x121   : > { %6856 = vmatprep.subr.bf16.mxu1 %v8651_v22 }
 0x122   : > { %v9421_v1 = vsel %vm4723_vm2, %v9408_v38, %v4733_v21  ;;  %v9425_v42 = vsel %vm4723_vm2, %v4733_v21, %v4737_v3  ;;  %v4750_v62 = vrot.slane %v4748_v43, 1  ;;  %v8523_v38 = vld [vmem:[%s10782_s3 + $0x210] sm:$0xff]  }
 0x123   : > { %6801 = vmatmul.mubr.msk.bf16.gmra.mrb[8].mxu1 %vm1031_vm11, %v9010_v14  ;;  %10806 = vst [vmem:[#allocation10_spill] sm:$0xff] %v9421_v1  ;;  %10807 = vst [vmem:[#allocation11_spill] sm:$0xff] %v9425_v42  ;;  %v9437_v1 = vsel %vm4723_vm2, %v4741_v35, %v4745_v49  ;;  %v3515_v35 = vrot.slane %v8997_v59, 4 }
 0x124   : > { %6804 = vmatprep.mubr.msk.bf16.mxu1 %vm8652_vm1, %v8651_v22  ;;  %10809 = vst [vmem:[#allocation13_spill] sm:$0xff] %v9437_v1  ;;  %v9439_v21 = vor.u32 %v4753_v9, %v4750_v62  ;;  %v8521_v62 = vld [vmem:[%s10782_s3 + $0x208] sm:$0xff]   ;;  %v5250_v9 = vrot.slane %v9356_v46, 6  ;;  %v5258_v1 = vrot.slane %v9375_v47, 6 }
 0x126   : > { %7281 = vmatmul.mubr.msk.bf16.gmra.mrb[20].mxu0 %vm1031_vm11, %v8900_v12  ;;  %10810 = vst [vmem:[#allocation14_spill] sm:$0xff] %v9439_v21  ;;  %v9447_v3 = vsel %vm4723_vm2, %v4745_v49, %v9439_v21  ;;  %v3517_v49 = vsel %vm931_vm14, %v3515_v35, %v3516_v25  ;;  %v5251_v21 = vrot.slane %v9359_v36, 7  ;;  %v5255_v35 = vrot.slane %v9367_v31, 7 }
 0x127   : > { %7284 = vmatprep.mubr.msk.bf16.mxu0 %vm8652_vm1, %v8651_v22  ;;  %10811 = vst [vmem:[#allocation15_spill] sm:$0xff] %v9447_v3  ;;  %v5254_v3 = vrot.slane %v9364_v18, 6  ;;  %v5260_v40 = vor.u32 %v5259_v58, %v5258_v1  ;;  %v5267_v1 = vrot.slane %v9404_v48, 7  ;;  %v5270_v58 = vrot.slane %v4748_v43, 6 }
 0x128   : > { %v3520_v43 = vrot.slane %v9137_v7, 4 }
 0x129   : > { %v5256_v42 = vor.u32 %v5255_v35, %v5254_v3  ;;  %v5266_v3 = vrot.slane %v9398_v56, 6 }
 0x12b   : > { %6805 = vmatmul.mubr.msk.bf16.gmra.mrb[12].mxu1 %vm1031_vm11, %v9086_v11  ;;  %v9496_v35 = vsel %vm857_vm3, %v5256_v42, %v5260_v40 }
 0x12c   : > { %6808 = vmatprep.mubr.msk.bf16.mxu1 %vm8652_vm1, %v8651_v22  ;;  %10814 = vst [vmem:[#allocation18_spill] sm:$0xff] %v9496_v35  ;;  %v10816_v35 = vmov 0  }
 0x12e   : > { %7285 = vmatmul.mubr.msk.bf16.gmra.mrb[24].mxu0 %vm1031_vm11, %v8915_v23 }
 0x12f   : > { %7296 = vmatprep.mubr.msk.bf16.mxu0 %vm8652_vm1, %v8651_v22 }
 0x133   : > { %6809 = vmatmul.mubr.msk.bf16.gmra.mrb[16].mxu1 %vm1031_vm11, %v9133_v45 }
 0x134   : > { %6812 = vmatprep.mubr.msk.bf16.mxu1 %vm8652_vm1, %v8651_v22 }
 0x136   : > { %7297 = vmatmul.mubr.msk.bf16.vlgmr.msra.gmra.mrb[0].mxu0 %vm1031_vm11, %v3517_v49  ;;  %v3518_v49 = vrot.slane %v9072_v2, 4 }
 0x137   : > { %7325 = vmatpush3.bf16.msra.mxu0 %v8519_v33  ;;  %7300 = vmatprep.mubr.msk.bf16.mxu0 %vm8652_vm1, %v8651_v22  ;;  %v9475_v33 = vor.u32 %v5251_v21, %v5250_v9  ;;  %v5262_v21 = vrot.slane %v9383_v24, 6  ;;  %v5263_v9 = vrot.slane %v9386_v30, 7 }
 0x138   : > { %7326 = vmatprep.subr.bf16.mxu0 %v8651_v22 }
 0x139   : > { %10812 = vst [vmem:[#allocation16_spill] sm:$0xff] %v9475_v33  ;;  %v9491_v39 = vsel %vm857_vm3, %v9475_v33, %v5256_v42  ;;  %v5264_v5 = vor.u32 %v5263_v9, %v5262_v21  ;;  %v5268_v42 = vor.u32 %v5267_v1, %v5266_v3  ;;  %v5277_v21 = vrot.slane %v10816_v35, 7 }
 0x13a   : > { %10813 = vst [vmem:[#allocation17_spill] sm:$0xff] %v9491_v39  ;;  %v8525_v39 = vld [vmem:[%s10782_s3 + $0x218] sm:$0xff]   ;;  %v5272_v9 = vor.u32 %v5271_v37, %v5270_v58  ;;  %v3521_v37 = vsel %vm931_vm14, %v3518_v49, %v3520_v43  ;;  %v10794_v3 = vrot.slane %v9336_v4, 7  ;;  %v3522_v1 = vrot.slane %v9372_v54, 4  ;;  %v8526_v58 = vld [vmem:[%s10782_s3 + $0x68] sm:$0xff]  }
 0x13b   : > { %6813 = vmatmul.mubr.msk.bf16.gmra.mrb[20].mxu1 %vm1031_vm11, %v9182_v28  ;;  %7327 = vmatpush3.bf16.msra.mxu0 %v8521_v62  ;;  %v3519_v62 = vsel %vm931_vm14, %v3516_v25, %v3518_v49  ;;  %v9506_v25 = vsel %vm857_vm3, %v5260_v40, %v5264_v5  ;;  %v9512_v34 = vsel %vm857_vm3, %v5264_v5, %v5268_v42  ;;  %v1280_v5 = vrot.slane %v9002_v51, 1 }
 0x13c   : > { %6816 = vmatprep.mubr.msk.bf16.mxu1 %vm8652_vm1, %v8651_v22  ;;  %7328 = vmatprep.subr.bf16.mxu0 %v8651_v22  ;;  %10815 = vst [vmem:[#allocation19_spill] sm:$0xff] %v9506_v25  ;;  %10817 = vst [vmem:[#allocation20_spill] sm:$0xff] %v9512_v34  ;;  %v9520_v40 = vsel %vm857_vm3, %v5272_v9, %v5277_v21  ;;  %v9538_v35 = vsel %vm3013_vm8, %v10794_v3, %v5277_v21  ;;  %v1282_v21 = vrot.slane %v9010_v14, 1 }
 0x13d   : > { %10819 = vst [vmem:[#allocation22_spill] sm:$0xff] %v9520_v40  ;;  %10820 = vst [vmem:[#allocation23_spill] sm:$0xff] %v9538_v35  ;;  %v3691_v3 = vrot.slane %v9144_v60, 5  ;;  %v3695_v35 = vrot.slane %v9178_v8, 5  ;;  %v8534_v40 = vld [vmem:[%s10782_s3 + $0x88] sm:$0xff]   ;;  %v1453_v25 = vrot.slane %v9086_v11, 5 }
 0x13e   : > { %7301 = vmatmul.mubr.msk.bf16.gmra.mrb[4].mxu0 %vm1031_vm11, %v3519_v62  ;;  %v1279_v62 = vrot.slane %v8986_v52, 1 }
 0x13f   : > { %7304 = vmatprep.mubr.msk.bf16.mxu0 %vm8652_vm1, %v8651_v22  ;;  %7329 = vmatpush3.bf16.msra.mxu0 %v8523_v38  ;;  %v9517_v38 = vsel %vm857_vm3, %v5268_v42, %v5272_v9  ;;  %v3523_v42 = vsel %vm931_vm14, %v3520_v43, %v3522_v1  ;;  %v8528_v9 = vld [vmem:[%s10782_s3 + $0x70] sm:$0xff]   ;;  %v3524_v43 = vrot.slane %v8900_v12, 4 }
 0x140   : > { %7330 = vmatprep.subr.bf16.mxu0 %v8651_v22  ;;  %10818 = vst [vmem:[#allocation21_spill] sm:$0xff] %v9517_v38  ;;  %v1281_v49 = vsel %vm1278_vm5, %v1279_v62, %v1280_v5  ;;  %v8530_v62 = vld [vmem:[%s10782_s3 + $0x78] sm:$0xff]   ;;  %v9685_v38 = vshrl.u32 %v8915_v23, 16 }
 0x142   : > { %v3706_v33 = vrot.slane %v9685_v38, 4 }
 0x143   : > { %6817 = vmatmul.mubr.msk.bf16.gmra.mrb[24].mxu1 %vm1031_vm11, %v8994_v63  ;;  %7331 = vmatpush3.bf16.msra.mxu0 %v8525_v39  ;;  %v8524_v39 = vld [vmem:[%s10782_s3 + $0x60] sm:$0xff]  }
 0x144   : > { %6828 = vmatprep.mubr.msk.bf16.mxu1 %vm8652_vm1, %v8651_v22  ;;  %7360 = vmatprep.subr.bf16.mxu0 %v8651_v22 }
 0x146   : > { %7305 = vmatmul.mubr.msk.bf16.gmra.mrb[8].mxu0 %vm1031_vm11, %v3521_v37  ;;  %v1283_v37 = vsel %vm1278_vm5, %v1280_v5, %v1282_v21 }
 0x147   : > { %7308 = vmatprep.mubr.msk.bf16.mxu0 %vm8652_vm1, %v8651_v22 }
 0x14b   : > { %6829 = vmatmul.mubr.msk.bf16.vlgmr.msra.gmra.mrb[0].mxu1 %vm1031_vm11, %v1281_v49  ;;  %v1284_v49 = vrot.slane %v9086_v11, 1 }
 0x14c   : > { %6832 = vmatprep.mubr.msk.bf16.mxu1 %vm8652_vm1, %v8651_v22  ;;  %6857 = vmatpush3.bf16.msra.mxu1 %v8524_v39  ;;  %v3525_v39 = vsel %vm931_vm14, %v3522_v1, %v3524_v43 }
 0x14d   : > { %6858 = vmatprep.subr.bf16.mxu1 %v8651_v22  ;;  %v1285_v5 = vsel %vm1278_vm5, %v1282_v21, %v1284_v49 }
 0x14e   : > { %7309 = vmatmul.mubr.msk.bf16.gmra.mrb[12].mxu0 %vm1031_vm11, %v3523_v42  ;;  %v1286_v42 = vrot.slane %v9133_v45, 1 }
 0x14f   : > { %7312 = vmatprep.mubr.msk.bf16.mxu0 %vm8652_vm1, %v8651_v22 }
 0x150   : > { %6859 = vmatpush3.bf16.msra.mxu1 %v8526_v58  ;;  %v9575_v58 = vrot.slane %v8915_v23, 4  ;;  %v1287_v21 = vsel %vm1278_vm5, %v1284_v49, %v1286_v42  ;;  %v8527_v49 = vld [vmem:[%s10782_s3 + $0x220] sm:$0xff]  }
 0x151   : > { %6860 = vmatprep.subr.bf16.mxu1 %v8651_v22 }
 0x152   : > { %v9582_v1 = vsel %vm931_vm14, %v3524_v43, %v9575_v58  ;;  %v3687_v43 = vrot.slane %v9094_v19, 5 }
 0x153   : > { %6833 = vmatmul.mubr.msk.bf16.gmra.mrb[4].mxu1 %vm1031_vm11, %v1283_v37  ;;  %v3686_v37 = vrot.slane %v9059_v55, 4 }
 0x154   : > { %6836 = vmatprep.mubr.msk.bf16.mxu1 %vm8652_vm1, %v8651_v22  ;;  %6861 = vmatpush3.bf16.msra.mxu1 %v8528_v9  ;;  %v1288_v9 = vrot.slane %v9182_v28, 1 }
 0x155   : > { %6862 = vmatprep.subr.bf16.mxu1 %v8651_v22 }
 0x156   : > { %7313 = vmatmul.mubr.msk.bf16.gmra.mrb[16].mxu0 %vm1031_vm11, %v3525_v39  ;;  %v3688_v39 = vor.u32 %v3687_v43, %v3686_v37  ;;  %v8529_v37 = vld [vmem:[%s10782_s3 + $0x228] sm:$0xff]  }
 0x157   : > { %7316 = vmatprep.mubr.msk.bf16.mxu0 %vm8652_vm1, %v8651_v22 }
 0x158   : > { %6863 = vmatpush3.bf16.msra.mxu1 %v8530_v62  ;;  %v1289_v62 = vsel %vm1278_vm5, %v1286_v42, %v1288_v9  ;;  %v1290_v42 = vrot.slane %v8994_v63, 1 }
 0x159   : > { %6892 = vmatprep.subr.bf16.mxu1 %v8651_v22 }
 0x15b   : > { %6837 = vmatmul.mubr.msk.bf16.gmra.mrb[8].mxu1 %vm1031_vm11, %v1285_v5  ;;  %v3689_v5 = vsel %vm932_vm15, %v9165_v10, %v3688_v39  ;;  %v1291_v10 = vsel %vm1278_vm5, %v1288_v9, %v1290_v42 }
 0x15c   : > { %6840 = vmatprep.mubr.msk.bf16.mxu1 %vm8652_vm1, %v8651_v22 }
 0x15e   : > { %7317 = vmatmul.mubr.msk.bf16.gmra.mrb[20].mxu0 %vm1031_vm11, %v9582_v1 }
 0x15f   : > { %7320 = vmatprep.mubr.msk.bf16.mxu0 %vm8652_vm1, %v8651_v22 }
 0x163   : > { %6841 = vmatmul.mubr.msk.bf16.gmra.mrb[12].mxu1 %vm1031_vm11, %v1287_v21  ;;  %v3690_v21 = vrot.slane %v9109_v32, 4 }
 0x164   : > { %6844 = vmatprep.mubr.msk.bf16.mxu1 %vm8652_vm1, %v8651_v22 }
 0x165   : > { %v3692_v43 = vor.u32 %v3691_v3, %v3690_v21  ;;  %v8533_v3 = vld [vmem:[%s10782_s3 + $0x238] sm:$0xff]   ;;  %v9638_v21 = vshrl.u32 %v9372_v54, 16 }
 0x166   : > { %7321 = vmatmul.mubr.msk.bf16.gmra.mrb[24].mxu0 %vm1031_vm11, %v9575_v58 }
 0x167   : > { %7332 = vmatprep.mubr.msk.bf16.mxu0 %vm8652_vm1, %v8651_v22 }
 0x16b   : > { %6845 = vmatmul.mubr.msk.bf16.gmra.mrb[16].mxu1 %vm1031_vm11, %v1289_v62  ;;  %v8531_v62 = vld [vmem:[%s10782_s3 + $0x230] sm:$0xff]  }
 0x16c   : > { %6848 = vmatprep.mubr.msk.bf16.mxu1 %vm8652_vm1, %v8651_v22 }
 0x16e   : > { %7333 = vmatmul.mubr.msk.bf16.vlgmr.msra.gmra.mrb[0].mxu0 %vm1031_vm11, %v3689_v5  ;;  %v3694_v5 = vrot.slane %v9157_v61, 4 }
 0x16f   : > { %7361 = vmatpush3.bf16.msra.mxu0 %v8527_v49  ;;  %7336 = vmatprep.mubr.msk.bf16.mxu0 %vm8652_vm1, %v8651_v22  ;;  %v3693_v49 = vsel %vm932_vm15, %v3688_v39, %v3692_v43  ;;  %v9641_v39 = vshll.u32 %v9372_v54, 16 }
 0x170   : > { %7362 = vmatprep.subr.bf16.mxu0 %v8651_v22  ;;  %v3696_v9 = vor.u32 %v3695_v35, %v3694_v5  ;;  %v3698_v35 = vrot.slane %v9638_v21, 4 }
 0x173   : > { %6849 = vmatmul.mubr.msk.bf16.gmra.mrb[20].mxu1 %vm1031_vm11, %v1291_v10  ;;  %7363 = vmatpush3.bf16.msra.mxu0 %v8529_v37  ;;  %v3697_v37 = vsel %vm932_vm15, %v3692_v43, %v3696_v9  ;;  %v1449_v10 = vrot.slane %v9002_v51, 5 }
 0x174   : > { %6852 = vmatprep.mubr.msk.bf16.mxu1 %vm8652_vm1, %v8651_v22  ;;  %7364 = vmatprep.subr.bf16.mxu0 %v8651_v22 }
 0x176   : > { %7337 = vmatmul.mubr.msk.bf16.gmra.mrb[4].mxu0 %vm1031_vm11, %v3693_v49  ;;  %v8532_v49 = vld [vmem:[%s10782_s3 + $0x80] sm:$0xff]  }
 0x177   : > { %7340 = vmatprep.mubr.msk.bf16.mxu0 %vm8652_vm1, %v8651_v22  ;;  %7365 = vmatpush3.bf16.msra.mxu0 %v8531_v62  ;;  %v3699_v62 = vrot.slane %v9641_v39, 5 }
 0x178   : > { %7366 = vmatprep.subr.bf16.mxu0 %v8651_v22 }
 0x179   : > { %v3700_v5 = vor.u32 %v3699_v62, %v3698_v35  ;;  %v1451_v62 = vrot.slane %v9010_v14, 5 }
 0x17b   : > { %6853 = vmatmul.mubr.msk.bf16.gmra.mrb[24].mxu1 %vm1031_vm11, %v1290_v42  ;;  %7367 = vmatpush3.bf16.msra.mxu0 %v8533_v3  ;;  %v1448_v42 = vrot.slane %v8986_v52, 5  ;;  %v9663_v3 = vshrl.u32 %v8900_v12, 16  ;;  %v3701_v35 = vsel %vm932_vm15, %v3696_v9, %v3700_v5  ;;  %v1452_v9 = vsel %vm1447_vm9, %v1449_v10, %v1451_v62 }
 0x17c   : > { %6864 = vmatprep.mubr.msk.bf16.mxu1 %vm8652_vm1, %v8651_v22  ;;  %7396 = vmatprep.subr.bf16.mxu0 %v8651_v22 }
 0x17d   : > { %v1450_v43 = vsel %vm1447_vm9, %v1448_v42, %v1449_v10  ;;  %v3702_v42 = vrot.slane %v9663_v3, 4 }
 0x17e   : > { %7341 = vmatmul.mubr.msk.bf16.gmra.mrb[8].mxu0 %vm1031_vm11, %v3697_v37  ;;  %v9666_v37 = vshll.u32 %v8900_v12, 16 }
 0x17f   : > { %7344 = vmatprep.mubr.msk.bf16.mxu0 %vm8652_vm1, %v8651_v22 }
 0x180   : > { %10821 = vst [vmem:[#allocation24_spill] sm:$0xff] %v9666_v37 }
 0x183   : > { %6865 = vmatmul.mubr.msk.bf16.vlgmr.msra.gmra.mrb[0].mxu1 %vm1031_vm11, %v1450_v43  ;;  %v8536_v43 = vld [vmem:[%s10782_s3 + $0x90] sm:$0xff]  }
 0x184   : > { %6868 = vmatprep.mubr.msk.bf16.mxu1 %vm8652_vm1, %v8651_v22  ;;  %6893 = vmatpush3.bf16.msra.mxu1 %v8532_v49  ;;  %v3703_v49 = vrot.slane %v9666_v37, 5 }
 0x185   : > { %6894 = vmatprep.subr.bf16.mxu1 %v8651_v22 }
 0x186   : > { %7345 = vmatmul.mubr.msk.bf16.gmra.mrb[12].mxu0 %vm1031_vm11, %v3701_v35  ;;  %v9688_v35 = vshll.u32 %v8915_v23, 16  ;;  %v3704_v34 = vor.u32 %v3703_v49, %v3702_v42  ;;  %v1454_v42 = vsel %vm1447_vm9, %v1451_v62, %v1453_v25  ;;  %v3866_v62 = vrot.slane %v9019_v26, 5 }
 0x187   : > { %7348 = vmatprep.mubr.msk.bf16.mxu0 %vm8652_vm1, %v8651_v22 }
 0x188   : > { %6895 = vmatpush3.bf16.msra.mxu1 %v8534_v40  ;;  %v8538_v40 = vld [vmem:[%s10782_s3 + $0x98] sm:$0xff]   ;;  %v3705_v10 = vsel %vm932_vm15, %v3700_v5, %v3704_v34  ;;  %v3707_v37 = vrot.slane %v9688_v35, 5 }
 0x189   : > { %6896 = vmatprep.subr.bf16.mxu1 %v8651_v22 }
 0x18a   : > { %v9706_v49 = vor.u32 %v3707_v37, %v3706_v33  ;;  %v1457_v37 = vrot.slane %v9182_v28, 5 }
 0x18b   : > { %6869 = vmatmul.mubr.msk.bf16.gmra.mrb[4].mxu1 %vm1031_vm11, %v1452_v9  ;;  %v8535_v9 = vld [vmem:[%s10782_s3 + $0x240] sm:$0xff]  }
 0x18c   : > { %6872 = vmatprep.mubr.msk.bf16.mxu1 %vm8652_vm1, %v8651_v22  ;;  %6897 = vmatpush3.bf16.msra.mxu1 %v8536_v43  ;;  %v9713_v5 = vsel %vm932_vm15, %v3704_v34, %v9706_v49  ;;  %v1455_v43 = vrot.slane %v9133_v45, 5 }
 0x18d   : > { %6898 = vmatprep.subr.bf16.mxu1 %v8651_v22 }
 0x18e   : > { %7349 = vmatmul.mubr.msk.bf16.gmra.mrb[16].mxu0 %vm1031_vm11, %v3705_v10  ;;  %v1456_v33 = vsel %vm1447_vm9, %v1453_v25, %v1455_v43  ;;  %v1458_v34 = vsel %vm1447_vm9, %v1455_v43, %v1457_v37  ;;  %v3865_v25 = vrot.slane %v8997_v59, 5  ;;  %v1459_v10 = vrot.slane %v8994_v63, 5 }
 0x18f   : > { %7352 = vmatprep.mubr.msk.bf16.mxu0 %vm8652_vm1, %v8651_v22 }
 0x190   : > { %6899 = vmatpush3.bf16.msra.mxu1 %v8538_v40  ;;  %v3867_v40 = vsel %vm1447_vm9, %v3865_v25, %v3866_v62  ;;  %v1460_v43 = vsel %vm1447_vm9, %v1457_v37, %v1459_v10  ;;  %v8541_v37 = vld [vmem:[%s10782_s3 + $0x258] sm:$0xff]  }
 0x191   : > { %6928 = vmatprep.subr.bf16.mxu1 %v8651_v22 }
 0x193   : > { %6873 = vmatmul.mubr.msk.bf16.gmra.mrb[8].mxu1 %vm1031_vm11, %v1454_v42  ;;  %v8537_v42 = vld [vmem:[%s10782_s3 + $0x248] sm:$0xff]  }
 0x194   : > { %6876 = vmatprep.mubr.msk.bf16.mxu1 %vm8652_vm1, %v8651_v22 }
 0x196   : > { %7353 = vmatmul.mubr.msk.bf16.gmra.mrb[20].mxu0 %vm1031_vm11, %v9713_v5 }
 0x197   : > { %7356 = vmatprep.mubr.msk.bf16.mxu0 %vm8652_vm1, %v8651_v22 }
 0x19b   : > { %6877 = vmatmul.mubr.msk.bf16.gmra.mrb[12].mxu1 %vm1031_vm11, %v1456_v33  ;;  %v3868_v33 = vrot.slane %v9072_v2, 5 }
 0x19c   : > { %6880 = vmatprep.mubr.msk.bf16.mxu1 %vm8652_vm1, %v8651_v22 }
 0x19d   : > { %v3869_v25 = vsel %vm1447_vm9, %v3866_v62, %v3868_v33 }
 0x19e   : > { %7357 = vmatmul.mubr.msk.bf16.gmra.mrb[24].mxu0 %vm1031_vm11, %v9706_v49 }
 0x19f   : > { %7368 = vmatprep.mubr.msk.bf16.mxu0 %vm8652_vm1, %v8651_v22 }
 0x1a3   : > { %6881 = vmatmul.mubr.msk.bf16.gmra.mrb[16].mxu1 %vm1031_vm11, %v1458_v34  ;;  %v8539_v34 = vld [vmem:[%s10782_s3 + $0x250] sm:$0xff]  }
 0x1a4   : > { %6884 = vmatprep.mubr.msk.bf16.mxu1 %vm8652_vm1, %v8651_v22 }
 0x1a6   : > { %7369 = vmatmul.mubr.msk.bf16.vlgmr.msra.gmra.mrb[0].mxu0 %vm1031_vm11, %v3867_v40  ;;  %v8540_v40 = vld [vmem:[%s10782_s3 + $0xa0] sm:$0xff]  }
 0x1a7   : > { %7397 = vmatpush3.bf16.msra.mxu0 %v8535_v9  ;;  %7372 = vmatprep.mubr.msk.bf16.mxu0 %vm8652_vm1, %v8651_v22  ;;  %v3870_v9 = vrot.slane %v9137_v7, 5 }
 0x1a8   : > { %7398 = vmatprep.subr.bf16.mxu0 %v8651_v22 }
 0x1a9   : > { %v3871_v62 = vsel %vm1447_vm9, %v3868_v33, %v3870_v9  ;;  %v3874_v33 = vrot.slane %v8900_v12, 5 }
 0x1ab   : > { %6885 = vmatmul.mubr.msk.bf16.gmra.mrb[20].mxu1 %vm1031_vm11, %v1460_v43  ;;  %7399 = vmatpush3.bf16.msra.mxu0 %v8537_v42  ;;  %v3872_v42 = vrot.slane %v9372_v54, 5 }
 0x1ac   : > { %6888 = vmatprep.mubr.msk.bf16.mxu1 %vm8652_vm1, %v8651_v22  ;;  %7400 = vmatprep.subr.bf16.mxu0 %v8651_v22 }
 0x1ad   : > { %v3873_v43 = vsel %vm1447_vm9, %v3870_v9, %v3872_v42 }
 0x1ae   : > { %7373 = vmatmul.mubr.msk.bf16.gmra.mrb[4].mxu0 %vm1031_vm11, %v3869_v25  ;;  %v3875_v25 = vsel %vm1447_vm9, %v3872_v42, %v3874_v33  ;;  %v1799_v42 = vrot.slane %v8986_v52, 6 }
 0x1af   : > { %7376 = vmatprep.mubr.msk.bf16.mxu0 %vm8652_vm1, %v8651_v22  ;;  %7401 = vmatpush3.bf16.msra.mxu0 %v8539_v34  ;;  %v8546_v34 = vld [vmem:[%s10782_s3 + $0xb8] sm:$0xff]  }
 0x1b0   : > { %7402 = vmatprep.subr.bf16.mxu0 %v8651_v22 }
 0x1b3   : > { %6889 = vmatmul.mubr.msk.bf16.gmra.mrb[24].mxu1 %vm1031_vm11, %v1459_v10  ;;  %7403 = vmatpush3.bf16.msra.mxu0 %v8541_v37  ;;  %v8542_v10 = vld [vmem:[%s10782_s3 + $0xa8] sm:$0xff]  }
 0x1b4   : > { %6900 = vmatprep.mubr.msk.bf16.mxu1 %vm8652_vm1, %v8651_v22  ;;  %7432 = vmatprep.subr.bf16.mxu0 %v8651_v22 }
 0x1b6   : > { %7377 = vmatmul.mubr.msk.bf16.gmra.mrb[8].mxu0 %vm1031_vm11, %v3871_v62  ;;  %v4035_v62 = vrot.slane %v8982_v50, 4 }
 0x1b7   : > { %7380 = vmatprep.mubr.msk.bf16.mxu0 %vm8652_vm1, %v8651_v22 }
 0x1bb   : > { %6901 = vmatmul.mubr.msk.bf16.vlgmr.msra.gmra.mrb[0].mxu1 %vm1031_vm11, %v9230_v41  ;;  %v8544_v41 = vld [vmem:[%s10782_s3 + $0xb0] sm:$0xff]  }
 0x1bc   : > { %6904 = vmatprep.mubr.msk.bf16.mxu1 %vm8652_vm1, %v8651_v22  ;;  %6929 = vmatpush3.bf16.msra.mxu1 %v8540_v40  ;;  %v1800_v40 = vrot.slane %v9002_v51, 6 }
 0x1bd   : > { %6930 = vmatprep.subr.bf16.mxu1 %v8651_v22 }
 0x1be   : > { %7381 = vmatmul.mubr.msk.bf16.gmra.mrb[12].mxu0 %vm1031_vm11, %v3873_v43  ;;  %v4037_v43 = vrot.slane %v9015_v17, 4 }
 0x1bf   : > { %7384 = vmatprep.mubr.msk.bf16.mxu0 %vm8652_vm1, %v8651_v22 }
 0x1c0   : > { %6931 = vmatpush3.bf16.msra.mxu1 %v8542_v10  ;;  %v1801_v10 = vsel %vm928_vm4, %v1799_v42, %v1800_v40  ;;  %v4038_v52 = vsel %vm931_vm14, %v4035_v62, %v4037_v43  ;;  %v1808_v42 = vrot.slane %v9182_v28, 6 }
 0x1c1   : > { %6932 = vmatprep.subr.bf16.mxu1 %v8651_v22 }
 0x1c3   : > { %6905 = vmatmul.mubr.msk.bf16.gmra.mrb[4].mxu1 %vm1031_vm11, %v9235_v53  ;;  %v9808_v53 = vrot.slane %v8915_v23, 5 }
 0x1c4   : > { %6908 = vmatprep.mubr.msk.bf16.mxu1 %vm8652_vm1, %v8651_v22  ;;  %6933 = vmatpush3.bf16.msra.mxu1 %v8544_v41  ;;  %v8550_v41 = vld [vmem:[%s10782_s3 + $0xc8] sm:$0xff]  }
 0x1c5   : > { %6934 = vmatprep.subr.bf16.mxu1 %v8651_v22  ;;  %v9816_v37 = vsel %vm1447_vm9, %v3874_v33, %v9808_v53  ;;  %v1802_v33 = vrot.slane %v9010_v14, 6 }
 0x1c6   : > { %7385 = vmatmul.mubr.msk.bf16.gmra.mrb[16].mxu0 %vm1031_vm11, %v3875_v25 }
 0x1c7   : > { %7388 = vmatprep.mubr.msk.bf16.mxu0 %vm8652_vm1, %v8651_v22  ;;  %v1803_v25 = vsel %vm928_vm4, %v1800_v40, %v1802_v33 }
 0x1c8   : > { %6935 = vmatpush3.bf16.msra.mxu1 %v8546_v34  ;;  %v8552_v34 = vld [vmem:[%s10782_s3 + $0xd0] sm:$0xff]  }
 0x1c9   : > { %6964 = vmatprep.subr.bf16.mxu1 %v8651_v22 }
 0x1cb   : > { %6909 = vmatmul.mubr.msk.bf16.gmra.mrb[8].mxu1 %vm1031_vm11, %v9238_v57  ;;  %v8543_v57 = vld [vmem:[%s10782_s3 + $0x260] sm:$0xff]  }
 0x1cc   : > { %6912 = vmatprep.mubr.msk.bf16.mxu1 %vm8652_vm1, %v8651_v22 }
 0x1ce   : > { %7389 = vmatmul.mubr.msk.bf16.gmra.mrb[20].mxu0 %vm1031_vm11, %v9816_v37 }
 0x1cf   : > { %7392 = vmatprep.mubr.msk.bf16.mxu0 %vm8652_vm1, %v8651_v22 }
 0x1d3   : > { %6913 = vmatmul.mubr.msk.bf16.gmra.mrb[12].mxu1 %vm1031_vm11, %v9251_v0  ;;  %v8545_v0 = vld [vmem:[%s10782_s3 + $0x268] sm:$0xff]  }
 0x1d4   : > { %6916 = vmatprep.mubr.msk.bf16.mxu1 %vm8652_vm1, %v8651_v22 }
 0x1d6   : > { %7393 = vmatmul.mubr.msk.bf16.gmra.mrb[24].mxu0 %vm1031_vm11, %v9808_v53 }
 0x1d7   : > { %7404 = vmatprep.mubr.msk.bf16.mxu0 %vm8652_vm1, %v8651_v22 }
 0x1db   : > { %6917 = vmatmul.mubr.msk.bf16.gmra.mrb[16].mxu1 %vm1031_vm11, %v9255_v13  ;;  %v4033_v13 = vrot.slane %v8950_v6, 4 }
 0x1dc   : > { %6920 = vmatprep.mubr.msk.bf16.mxu1 %vm8652_vm1, %v8651_v22 }
 0x1dd   : > { %v4034_v9 = vsel %vm931_vm14, %v9575_v58, %v4033_v13  ;;  %v4036_v58 = vsel %vm931_vm14, %v4033_v13, %v4035_v62 }
 0x1de   : > { %7405 = vmatmul.mubr.msk.bf16.vlgmr.msra.gmra.mrb[0].mxu0 %vm1031_vm11, %v9582_v1  ;;  %v8547_v1 = vld [vmem:[%s10782_s3 + $0x270] sm:$0xff]  }
 0x1df   : > { %7433 = vmatpush3.bf16.msra.mxu0 %v8543_v57  ;;  %7408 = vmatprep.mubr.msk.bf16.mxu0 %vm8652_vm1, %v8651_v22  ;;  %v4039_v57 = vrot.slane %v9035_v20, 4 }
 0x1e0   : > { %7434 = vmatprep.subr.bf16.mxu0 %v8651_v22 }
 0x1e1   : > { %v4040_v13 = vsel %vm931_vm14, %v4037_v43, %v4039_v57  ;;  %v4198_v43 = vrot.slane %v9356_v46, 4 }
 0x1e3   : > { %6921 = vmatmul.mubr.msk.bf16.gmra.mrb[20].mxu1 %vm1031_vm11, %v9263_v29  ;;  %7435 = vmatpush3.bf16.msra.mxu0 %v8545_v0  ;;  %v8549_v29 = vld [vmem:[%s10782_s3 + $0x278] sm:$0xff]  }
 0x1e4   : > { %6924 = vmatprep.mubr.msk.bf16.mxu1 %vm8652_vm1, %v8651_v22  ;;  %7436 = vmatprep.subr.bf16.mxu0 %v8651_v22  ;;  %v8554_v0 = vld [vmem:[%s10782_s3 + $0xd8] sm:$0xff]  }
 0x1e6   : > { %7409 = vmatmul.mubr.msk.bf16.gmra.mrb[4].mxu0 %vm1031_vm11, %v4034_v9 }
 0x1e7   : > { %7412 = vmatprep.mubr.msk.bf16.mxu0 %vm8652_vm1, %v8651_v22  ;;  %7437 = vmatpush3.bf16.msra.mxu0 %v8547_v1  ;;  %v1804_v1 = vrot.slane %v9086_v11, 6 }
 0x1e8   : > { %7438 = vmatprep.subr.bf16.mxu0 %v8651_v22 }
 0x1e9   : > { %v1805_v9 = vsel %vm928_vm4, %v1802_v33, %v1804_v1  ;;  %v8553_v33 = vld [vmem:[%s10782_s3 + $0x288] sm:$0xff]  }
 0x1eb   : > { %6925 = vmatmul.mubr.msk.bf16.gmra.mrb[24].mxu1 %vm1031_vm11, %v9257_v16  ;;  %7439 = vmatpush3.bf16.msra.mxu0 %v8549_v29  ;;  %v8548_v16 = vld [vmem:[%s10782_s3 + $0xc0] sm:$0xff]   ;;  %v4041_v29 = vrot.slane %v9039_v44, 4 }
 0x1ec   : > { %6936 = vmatprep.mubr.msk.bf16.mxu1 %vm8652_vm1, %v8651_v22  ;;  %7468 = vmatprep.subr.bf16.mxu0 %v8651_v22 }
 0x1ed   : > { %v4042_v62 = vsel %vm931_vm14, %v4039_v57, %v4041_v29  ;;  %v4210_v57 = vrot.slane %v9367_v31, 5  ;;  %v1968_v31 = vrot.slane %v9010_v14, 2 }
 0x1ee   : > { %7413 = vmatmul.mubr.msk.bf16.gmra.mrb[8].mxu0 %vm1031_vm11, %v4036_v58  ;;  %v1806_v58 = vrot.slane %v9133_v45, 6 }
 0x1ef   : > { %7416 = vmatprep.mubr.msk.bf16.mxu0 %vm8652_vm1, %v8651_v22 }
 0x1f0   : > { %v1807_v40 = vsel %vm928_vm4, %v1804_v1, %v1806_v58  ;;  %v4219_v1 = vrot.slane %v9378_v15, 5 }
 0x1f3   : > { %6937 = vmatmul.mubr.msk.bf16.vlgmr.msra.gmra.mrb[0].mxu1 %vm1031_vm11, %v1801_v10  ;;  %v8551_v10 = vld [vmem:[%s10782_s3 + $0x280] sm:$0xff]  }
 0x1f4   : > { %6940 = vmatprep.mubr.msk.bf16.mxu1 %vm8652_vm1, %v8651_v22  ;;  %6965 = vmatpush3.bf16.msra.mxu1 %v8548_v16  ;;  %v1809_v16 = vsel %vm928_vm4, %v1806_v58, %v1808_v42 }
 0x1f5   : > { %6966 = vmatprep.subr.bf16.mxu1 %v8651_v22 }
 0x1f6   : > { %7417 = vmatmul.mubr.msk.bf16.gmra.mrb[12].mxu0 %vm1031_vm11, %v4038_v52  ;;  %v1810_v52 = vrot.slane %v8994_v63, 6 }
 0x1f7   : > { %7420 = vmatprep.mubr.msk.bf16.mxu0 %vm8652_vm1, %v8651_v22 }
 0x1f8   : > { %6967 = vmatpush3.bf16.msra.mxu1 %v8550_v41  ;;  %v4201_v41 = vrot.slane %v9359_v36, 5  ;;  %v8555_v36 = vld [vmem:[%s10782_s3 + $0x290] sm:$0xff]  }
 0x1f9   : > { %6968 = vmatprep.subr.bf16.mxu1 %v8651_v22 }
 0x1fa   : > { %v4202_v46 = vor.u32 %v4201_v41, %v4198_v43 }
 0x1fb   : > { %6941 = vmatmul.mubr.msk.bf16.gmra.mrb[4].mxu1 %vm1031_vm11, %v1803_v25  ;;  %v4207_v25 = vrot.slane %v9364_v18, 4 }
 0x1fc   : > { %6944 = vmatprep.mubr.msk.bf16.mxu1 %vm8652_vm1, %v8651_v22  ;;  %6969 = vmatpush3.bf16.msra.mxu1 %v8552_v34  ;;  %v1811_v34 = vsel %vm928_vm4, %v1808_v42, %v1810_v52  ;;  %v4225_v42 = vrot.slane %v9383_v24, 4  ;;  %v8562_v24 = vld [vmem:[%s10782_s3 + $0xf8] sm:$0xff]  }
 0x1fd   : > { %6970 = vmatprep.subr.bf16.mxu1 %v8651_v22 }
 0x1fe   : > { %7421 = vmatmul.mubr.msk.bf16.gmra.mrb[16].mxu0 %vm1031_vm11, %v4040_v13  ;;  %v4211_v13 = vor.u32 %v4210_v57, %v4207_v25  ;;  %v1976_v25 = vrot.slane %v8994_v63, 2 }
 0x1ff   : > { %7424 = vmatprep.mubr.msk.bf16.mxu0 %vm8652_vm1, %v8651_v22 }
 0x200   : > { %6971 = vmatpush3.bf16.msra.mxu1 %v8554_v0  ;;  %v8557_v0 = vld [vmem:[%s10782_s3 + $0x298] sm:$0xff]   ;;  %v4212_v18 = vsel %vm932_vm15, %v4202_v46, %v4211_v13 }
 0x201   : > { %7000 = vmatprep.subr.bf16.mxu1 %v8651_v22 }
 0x203   : > { %6945 = vmatmul.mubr.msk.bf16.gmra.mrb[8].mxu1 %vm1031_vm11, %v1805_v9  ;;  %v1967_v9 = vrot.slane %v9002_v51, 2 }
 0x204   : > { %6948 = vmatprep.mubr.msk.bf16.mxu1 %vm8652_vm1, %v8651_v22 }
 0x206   : > { %7425 = vmatmul.mubr.msk.bf16.gmra.mrb[20].mxu0 %vm1031_vm11, %v4042_v62  ;;  %v1969_v62 = vsel %vm922_vm7, %v1967_v9, %v1968_v31  ;;  %v8565_v9 = vld [vmem:[%s10782_s3 + $0x2b8] sm:$0xff]  }
 0x207   : > { %7428 = vmatprep.mubr.msk.bf16.mxu0 %vm8652_vm1, %v8651_v22 }
 0x20b   : > { %6949 = vmatmul.mubr.msk.bf16.gmra.mrb[12].mxu1 %vm1031_vm11, %v1807_v40  ;;  %v1970_v40 = vrot.slane %v9086_v11, 2 }
 0x20c   : > { %6952 = vmatprep.mubr.msk.bf16.mxu1 %vm8652_vm1, %v8651_v22 }
 0x20d   : > { %v1971_v43 = vsel %vm922_vm7, %v1968_v31, %v1970_v40 }
 0x20e   : > { %7429 = vmatmul.mubr.msk.bf16.gmra.mrb[24].mxu0 %vm1031_vm11, %v4041_v29  ;;  %v8556_v29 = vld [vmem:[%s10782_s3 + $0xe0] sm:$0xff]  }
 0x20f   : > { %7440 = vmatprep.mubr.msk.bf16.mxu0 %vm8652_vm1, %v8651_v22 }
 0x213   : > { %6953 = vmatmul.mubr.msk.bf16.gmra.mrb[16].mxu1 %vm1031_vm11, %v1809_v16  ;;  %v4228_v16 = vrot.slane %v9386_v30, 5 }
 0x214   : > { %6956 = vmatprep.mubr.msk.bf16.mxu1 %vm8652_vm1, %v8651_v22 }
 0x215   : > { %v4229_v41 = vor.u32 %v4228_v16, %v4225_v42  ;;  %v10822_v42 = vld [vmem:[#allocation2_spill] sm:$0xff]  ;;  %v8570_v16 = vld [vmem:[%s10782_s3 + $0x118] sm:$0xff]  }
 0x216   : > { %7441 = vmatmul.mubr.msk.bf16.vlgmr.msra.gmra.mrb[0].mxu0 %vm1031_vm11, %v9713_v5  ;;  %v4203_v5 = vsel %vm932_vm15, %v9706_v49, %v4202_v46  ;;  %v4216_v49 = vrot.slane %v9375_v47, 4  ;;  %v8558_v47 = vld [vmem:[%s10782_s3 + $0xe8] sm:$0xff]  }
 0x217   : > { %7469 = vmatpush3.bf16.msra.mxu0 %v8551_v10  ;;  %7444 = vmatprep.mubr.msk.bf16.mxu0 %vm8652_vm1, %v8651_v22  ;;  %v8560_v10 = vld [vmem:[%s10782_s3 + $0xf0] sm:$0xff]  }
 0x218   : > { %7470 = vmatprep.subr.bf16.mxu0 %v8651_v22  ;;  %v4220_v58 = vor.u32 %v4219_v1, %v4216_v49  ;;  %v4392_v49 = vrot.slane %v8950_v6, 5 }
 0x21a   : > { %v4221_v15 = vsel %vm932_vm15, %v4211_v13, %v4220_v58  ;;  %v4230_v30 = vsel %vm932_vm15, %v4220_v58, %v4229_v41  ;;  %v10041_v13 = vrot.slane %v8997_v59, 2  ;;  %v4393_v1 = vsel %vm1447_vm9, %v9808_v53, %v4392_v49 }
 0x21b   : > { %6957 = vmatmul.mubr.msk.bf16.gmra.mrb[20].mxu1 %vm1031_vm11, %v1811_v34  ;;  %7471 = vmatpush3.bf16.msra.mxu0 %v8553_v33  ;;  %v4234_v33 = vrot.slane %v9398_v56, 4  ;;  %v4237_v34 = vrot.slane %v9404_v48, 5  ;;  %v1974_v48 = vrot.slane %v9182_v28, 2  ;;  %v4396_v58 = vrot.slane %v9015_v17, 5 }
 0x21c   : > { %6960 = vmatprep.mubr.msk.bf16.mxu1 %vm8652_vm1, %v8651_v22  ;;  %7472 = vmatprep.subr.bf16.mxu0 %v8651_v22  ;;  %v10053_v31 = vsel %vm922_vm7, %v1976_v25, %v10041_v13 }
 0x21d   : > { %v1977_v57 = vsel %vm922_vm7, %v1974_v48, %v1976_v25 }
 0x21e   : > { %7445 = vmatmul.mubr.msk.bf16.gmra.mrb[4].mxu0 %vm1031_vm11, %v4203_v5 }
 0x21f   : > { %7448 = vmatprep.mubr.msk.bf16.mxu0 %vm8652_vm1, %v8651_v22  ;;  %7473 = vmatpush3.bf16.msra.mxu0 %v8555_v36  ;;  %v4238_v36 = vor.u32 %v4237_v34, %v4234_v33  ;;  %v10825_v33 = vld [vmem:[#allocation6_spill] sm:$0xff]  ;;  %v4555_v34 = vrot.slane %v8915_v23, 1 }
 0x220   : > { %7474 = vmatprep.subr.bf16.mxu0 %v8651_v22 }
 0x221   : > { %v4239_v56 = vsel %vm932_vm15, %v4229_v41, %v4238_v36  ;;  %v10823_v41 = vld [vmem:[#allocation3_spill] sm:$0xff] }
 0x223   : > { %6961 = vmatmul.mubr.msk.bf16.gmra.mrb[24].mxu1 %vm1031_vm11, %v1810_v52  ;;  %7475 = vmatpush3.bf16.msra.mxu0 %v8557_v0  ;;  %v1972_v52 = vrot.slane %v9133_v45, 2  ;;  %v8559_v0 = vld [vmem:[%s10782_s3 + $0x2a0] sm:$0xff]  }
 0x224   : > { %6972 = vmatprep.mubr.msk.bf16.mxu1 %vm8652_vm1, %v8651_v22  ;;  %7504 = vmatprep.subr.bf16.mxu0 %v8651_v22 }
 0x225   : > { %v1973_v46 = vsel %vm922_vm7, %v1970_v40, %v1972_v52  ;;  %v1975_v5 = vsel %vm922_vm7, %v1972_v52, %v1974_v48  ;;  %v4398_v40 = vrot.slane %v9035_v20, 5  ;;  %v4556_v52 = vrot.slane %v8950_v6, 1  ;;  %v10826_v48 = vld [vmem:[#allocation7_spill] sm:$0xff] }
 0x226   : > { %7449 = vmatmul.mubr.msk.bf16.gmra.mrb[8].mxu0 %vm1031_vm11, %v4212_v18  ;;  %v8561_v18 = vld [vmem:[%s10782_s3 + $0x2a8] sm:$0xff]  }
 0x227   : > { %7452 = vmatprep.mubr.msk.bf16.mxu0 %vm8652_vm1, %v8651_v22 }
 0x22b   : > { %6973 = vmatmul.mubr.msk.bf16.vlgmr.msra.gmra.mrb[0].mxu1 %vm1031_vm11, %v1969_v62  ;;  %v8564_v62 = vld [vmem:[%s10782_s3 + $0x100] sm:$0xff]  }
 0x22c   : > { %6976 = vmatprep.mubr.msk.bf16.mxu1 %vm8652_vm1, %v8651_v22  ;;  %7001 = vmatpush3.bf16.msra.mxu1 %v8556_v29  ;;  %v4394_v29 = vrot.slane %v8982_v50, 5 }
 0x22d   : > { %7002 = vmatprep.subr.bf16.mxu1 %v8651_v22 }
 0x22e   : > { %7453 = vmatmul.mubr.msk.bf16.gmra.mrb[12].mxu0 %vm1031_vm11, %v4221_v15  ;;  %v4395_v53 = vsel %vm1447_vm9, %v4392_v49, %v4394_v29  ;;  %v4397_v15 = vsel %vm1447_vm9, %v4394_v29, %v4396_v58  ;;  %v8573_v49 = vld [vmem:[%s10782_s3 + $0x2d8] sm:$0xff]   ;;  %v2323_v29 = vrot.slane %v9002_v51, 3 }
 0x22f   : > { %7456 = vmatprep.mubr.msk.bf16.mxu0 %vm8652_vm1, %v8651_v22 }
 0x230   : > { %7003 = vmatpush3.bf16.msra.mxu1 %v8558_v47  ;;  %v8566_v47 = vld [vmem:[%s10782_s3 + $0x108] sm:$0xff]  }
 0x231   : > { %7004 = vmatprep.subr.bf16.mxu1 %v8651_v22 }
 0x233   : > { %6977 = vmatmul.mubr.msk.bf16.gmra.mrb[4].mxu1 %vm1031_vm11, %v1971_v43  ;;  %v4400_v43 = vrot.slane %v9039_v44, 5 }
 0x234   : > { %6980 = vmatprep.mubr.msk.bf16.mxu1 %vm8652_vm1, %v8651_v22  ;;  %7005 = vmatpush3.bf16.msra.mxu1 %v8560_v10  ;;  %v4399_v10 = vsel %vm1447_vm9, %v4396_v58, %v4398_v40  ;;  %v4562_v58 = vrot.slane %v9035_v20, 1 }
 0x235   : > { %7006 = vmatprep.subr.bf16.mxu1 %v8651_v22 }
 0x236   : > { %7457 = vmatmul.mubr.msk.bf16.gmra.mrb[16].mxu0 %vm1031_vm11, %v4230_v30  ;;  %v10824_v30 = vld [vmem:[#allocation5_spill] sm:$0xff] }
 0x237   : > { %7460 = vmatprep.mubr.msk.bf16.mxu0 %vm8652_vm1, %v8651_v22 }
 0x238   : > { %7007 = vmatpush3.bf16.msra.mxu1 %v8562_v24  ;;  %v4401_v24 = vsel %vm1447_vm9, %v4398_v40, %v4400_v43  ;;  %v10828_v40 = vrot.slane %v9039_v44, 1 }
 0x239   : > { %7036 = vmatprep.subr.bf16.mxu1 %v8651_v22 }
 0x23b   : > { %6981 = vmatmul.mubr.msk.bf16.gmra.mrb[8].mxu1 %vm1031_vm11, %v1973_v46  ;;  %v8567_v46 = vld [vmem:[%s10782_s3 + $0x2c0] sm:$0xff]  }
 0x23c   : > { %6984 = vmatprep.mubr.msk.bf16.mxu1 %vm8652_vm1, %v8651_v22 }
 0x23e   : > { %7461 = vmatmul.mubr.msk.bf16.gmra.mrb[20].mxu0 %vm1031_vm11, %v4239_v56  ;;  %v8569_v56 = vld [vmem:[%s10782_s3 + $0x2c8] sm:$0xff]  }
 0x23f   : > { %7464 = vmatprep.mubr.msk.bf16.mxu0 %vm8652_vm1, %v8651_v22 }
 0x243   : > { %6985 = vmatmul.mubr.msk.bf16.gmra.mrb[12].mxu1 %vm1031_vm11, %v1975_v5  ;;  %v10827_v5 = vld [vmem:[#allocation4_spill] sm:$0xff] }
 0x244   : > { %6988 = vmatprep.mubr.msk.bf16.mxu1 %vm8652_vm1, %v8651_v22  ;;  %v10153_v25 = vsel %vm668_vm6, %v10827_v5, %v10826_v48  ;;  %v10252_v5 = vrot.slane %v8997_v59, 3 }
 0x246   : > { %7465 = vmatmul.mubr.msk.bf16.gmra.mrb[24].mxu0 %vm1031_vm11, %v4238_v36  ;;  %v4557_v36 = vsel %vm1278_vm5, %v4555_v34, %v4556_v52 }
 0x247   : > { %7476 = vmatprep.mubr.msk.bf16.mxu0 %vm8652_vm1, %v8651_v22 }
 0x24b   : > { %6989 = vmatmul.mubr.msk.bf16.gmra.mrb[16].mxu1 %vm1031_vm11, %v1977_v57  ;;  %v4558_v57 = vrot.slane %v8982_v50, 1 }
 0x24c   : > { %6992 = vmatprep.mubr.msk.bf16.mxu1 %vm8652_vm1, %v8651_v22 }
 0x24e   : > { %7477 = vmatmul.mubr.msk.bf16.vlgmr.msra.gmra.mrb[0].mxu0 %vm1031_vm11, %v9816_v37  ;;  %v8563_v37 = vld [vmem:[%s10782_s3 + $0x2b0] sm:$0xff]  }
 0x24f   : > { %7505 = vmatpush3.bf16.msra.mxu0 %v8559_v0  ;;  %7480 = vmatprep.mubr.msk.bf16.mxu0 %vm8652_vm1, %v8651_v22  ;;  %v8571_v0 = vld [vmem:[%s10782_s3 + $0x2d0] sm:$0xff]  }
 0x250   : > { %7506 = vmatprep.subr.bf16.mxu0 %v8651_v22 }
 0x253   : > { %6993 = vmatmul.mubr.msk.bf16.gmra.mrb[20].mxu1 %vm1031_vm11, %v10053_v31  ;;  %7507 = vmatpush3.bf16.msra.mxu0 %v8561_v18  ;;  %v4559_v18 = vsel %vm1278_vm5, %v4556_v52, %v4558_v57  ;;  %v4725_v52 = vrot.slane %v9688_v35, 2 }
 0x254   : > { %6996 = vmatprep.mubr.msk.bf16.mxu1 %vm8652_vm1, %v8651_v22  ;;  %7508 = vmatprep.subr.bf16.mxu0 %v8651_v22 }
 0x256   : > { %7481 = vmatmul.mubr.msk.bf16.gmra.mrb[4].mxu0 %vm1031_vm11, %v4393_v1 }
 0x257   : > { %7484 = vmatprep.mubr.msk.bf16.mxu0 %vm8652_vm1, %v8651_v22  ;;  %7509 = vmatpush3.bf16.msra.mxu0 %v8563_v37  ;;  %v4560_v37 = vrot.slane %v9015_v17, 1 }
 0x258   : > { %7510 = vmatprep.subr.bf16.mxu0 %v8651_v22 }
 0x259   : > { %v4561_v1 = vsel %vm1278_vm5, %v4558_v57, %v4560_v37  ;;  %v4563_v51 = vsel %vm1278_vm5, %v4560_v37, %v4562_v58  ;;  %v8577_v57 = vld [vmem:[%s10782_s3 + $0x2e8] sm:$0xff]   ;;  %v8581_v37 = vld [vmem:[%s10782_s3 + $0x2f8] sm:$0xff]  }
 0x25b   : > { %6997 = vmatmul.mubr.msk.bf16.gmra.mrb[24].mxu1 %vm1031_vm11, %v10041_v13  ;;  %7511 = vmatpush3.bf16.msra.mxu0 %v8565_v9  ;;  %v2324_v9 = vrot.slane %v9010_v14, 3  ;;  %v8574_v14 = vld [vmem:[%s10782_s3 + $0x128] sm:$0xff]  }
 0x25c   : > { %7008 = vmatprep.mubr.msk.bf16.mxu1 %vm8652_vm1, %v8651_v22  ;;  %7540 = vmatprep.subr.bf16.mxu0 %v8651_v22 }
 0x25e   : > { %7485 = vmatmul.mubr.msk.bf16.gmra.mrb[8].mxu0 %vm1031_vm11, %v4395_v53  ;;  %v8572_v53 = vld [vmem:[%s10782_s3 + $0x120] sm:$0xff]  }
 0x25f   : > { %7488 = vmatprep.mubr.msk.bf16.mxu0 %vm8652_vm1, %v8651_v22 }
 0x263   : > { %7009 = vmatmul.mubr.msk.bf16.vlgmr.msra.gmra.mrb[0].mxu1 %vm1031_vm11, %v9309_v27  ;;  %v8568_v27 = vld [vmem:[%s10782_s3 + $0x110] sm:$0xff]  }
 0x264   : > { %7012 = vmatprep.mubr.msk.bf16.mxu1 %vm8652_vm1, %v8651_v22  ;;  %7037 = vmatpush3.bf16.msra.mxu1 %v8564_v62  ;;  %v2325_v62 = vsel %vm2322_vm10, %v2323_v29, %v2324_v9  ;;  %v8582_v29 = vld [vmem:[%s10782_s3 + $0x148] sm:$0xff]  }
 0x265   : > { %7038 = vmatprep.subr.bf16.mxu1 %v8651_v22 }
 0x266   : > { %7489 = vmatmul.mubr.msk.bf16.gmra.mrb[12].mxu0 %vm1031_vm11, %v4397_v15  ;;  %v8576_v15 = vld [vmem:[%s10782_s3 + $0x130] sm:$0xff]  }
 0x267   : > { %7492 = vmatprep.mubr.msk.bf16.mxu0 %vm8652_vm1, %v8651_v22 }
 0x268   : > { %7039 = vmatpush3.bf16.msra.mxu1 %v8566_v47  ;;  %v2326_v47 = vrot.slane %v9086_v11, 3  ;;  %v8578_v11 = vld [vmem:[%s10782_s3 + $0x138] sm:$0xff]  }
 0x269   : > { %7040 = vmatprep.subr.bf16.mxu1 %v8651_v22 }
 0x26b   : > { %7013 = vmatmul.mubr.msk.bf16.gmra.mrb[4].mxu1 %vm1031_vm11, %v10822_v42  ;;  %v4565_v42 = vsel %vm1278_vm5, %v4562_v58, %v10828_v40  ;;  %v2497_v40 = vrot.slane %v9372_v54, 2 }
 0x26c   : > { %7016 = vmatprep.mubr.msk.bf16.mxu1 %vm8652_vm1, %v8651_v22  ;;  %7041 = vmatpush3.bf16.msra.mxu1 %v8568_v27  ;;  %v2327_v27 = vsel %vm2322_vm10, %v2324_v9, %v2326_v47  ;;  %v8580_v9 = vld [vmem:[%s10782_s3 + $0x140] sm:$0xff]  }
 0x26d   : > { %7042 = vmatprep.subr.bf16.mxu1 %v8651_v22 }
 0x26e   : > { %7493 = vmatmul.mubr.msk.bf16.gmra.mrb[16].mxu0 %vm1031_vm11, %v4399_v10 }
 0x26f   : > { %7496 = vmatprep.mubr.msk.bf16.mxu0 %vm8652_vm1, %v8651_v22 }
 0x270   : > { %7043 = vmatpush3.bf16.msra.mxu1 %v8570_v16  ;;  %v2328_v16 = vrot.slane %v9133_v45, 3 }
 0x271   : > { %7072 = vmatprep.subr.bf16.mxu1 %v8651_v22 }
 0x272   : > { %v2329_v10 = vsel %vm2322_vm10, %v2326_v47, %v2328_v16  ;;  %v10835_v47 = vld [vmem:[#allocation13_spill] sm:$0xff] }
 0x273   : > { %7017 = vmatmul.mubr.msk.bf16.gmra.mrb[8].mxu1 %vm1031_vm11, %v10823_v41  ;;  %v10829_v41 = vld [vmem:[#allocation8_spill] sm:$0xff] }
 0x274   : > { %7020 = vmatprep.mubr.msk.bf16.mxu1 %vm8652_vm1, %v8651_v22 }
 0x276   : > { %7497 = vmatmul.mubr.msk.bf16.gmra.mrb[20].mxu0 %vm1031_vm11, %v4401_v24  ;;  %v10830_v24 = vrot.slane %v9336_v4, 1 }
 0x277   : > { %7500 = vmatprep.mubr.msk.bf16.mxu0 %vm8652_vm1, %v8651_v22 }
 0x27b   : > { %7021 = vmatmul.mubr.msk.bf16.gmra.mrb[12].mxu1 %vm1031_vm11, %v10824_v30  ;;  %v4724_v30 = vrot.slane %v9685_v38, 1 }
 0x27c   : > { %7024 = vmatprep.mubr.msk.bf16.mxu1 %vm8652_vm1, %v8651_v22 }
 0x27d   : > { %v4726_v34 = vor.u32 %v4725_v52, %v4724_v30  ;;  %v4914_v52 = vrot.slane %v8982_v50, 2 }
 0x27e   : > { %7501 = vmatmul.mubr.msk.bf16.gmra.mrb[24].mxu0 %vm1031_vm11, %v4400_v43  ;;  %v2330_v43 = vrot.slane %v9182_v28, 3  ;;  %v2332_v28 = vrot.slane %v8994_v63, 3 }
 0x27f   : > { %7512 = vmatprep.mubr.msk.bf16.mxu0 %vm8652_vm1, %v8651_v22 }
 0x280   : > { %v2331_v45 = vsel %vm2322_vm10, %v2328_v16, %v2330_v43 }
 0x283   : > { %7025 = vmatmul.mubr.msk.bf16.gmra.mrb[16].mxu1 %vm1031_vm11, %v10825_v33  ;;  %v2333_v33 = vsel %vm2322_vm10, %v2330_v43, %v2332_v28  ;;  %v4911_v43 = vrot.slane %v8915_v23, 2 }
 0x284   : > { %7028 = vmatprep.mubr.msk.bf16.mxu1 %vm8652_vm1, %v8651_v22 }
 0x286   : > { %7513 = vmatmul.mubr.msk.bf16.vlgmr.msra.gmra.mrb[0].mxu0 %vm1031_vm11, %v4557_v36  ;;  %v10831_v36 = vld [vmem:[#allocation9_spill] sm:$0xff] }
 0x287   : > { %7541 = vmatpush3.bf16.msra.mxu0 %v8567_v46  ;;  %7516 = vmatprep.mubr.msk.bf16.mxu0 %vm8652_vm1, %v8651_v22  ;;  %v8575_v46 = vld [vmem:[%s10782_s3 + $0x2e0] sm:$0xff]  }
 0x288   : > { %7542 = vmatprep.subr.bf16.mxu0 %v8651_v22 }
 0x28b   : > { %7029 = vmatmul.mubr.msk.bf16.gmra.mrb[20].mxu1 %vm1031_vm11, %v10153_v25  ;;  %7543 = vmatpush3.bf16.msra.mxu0 %v8569_v56  ;;  %v4730_v56 = vsel %vm4723_vm2, %v4726_v34, %v10831_v36  ;;  %v4916_v36 = vrot.slane %v9015_v17, 2 }
 0x28c   : > { %7032 = vmatprep.mubr.msk.bf16.mxu1 %vm8652_vm1, %v8651_v22  ;;  %7544 = vmatprep.subr.bf16.mxu0 %v8651_v22 }
 0x28e   : > { %7517 = vmatmul.mubr.msk.bf16.gmra.mrb[4].mxu0 %vm1031_vm11, %v4559_v18  ;;  %v8579_v18 = vld [vmem:[%s10782_s3 + $0x2f0] sm:$0xff]  }
 0x28f   : > { %7520 = vmatprep.mubr.msk.bf16.mxu0 %vm8652_vm1, %v8651_v22  ;;  %7545 = vmatpush3.bf16.msra.mxu0 %v8571_v0  ;;  %v10263_v0 = vsel %vm2322_vm10, %v2332_v28, %v10252_v5  ;;  %v8585_v28 = vld [vmem:[%s10782_s3 + $0x308] sm:$0xff]  }
 0x290   : > { %7546 = vmatprep.subr.bf16.mxu0 %v8651_v22 }
 0x293   : > { %7033 = vmatmul.mubr.msk.bf16.gmra.mrb[24].mxu1 %vm1031_vm11, %v10826_v48  ;;  %7547 = vmatpush3.bf16.msra.mxu0 %v8573_v49  ;;  %v10832_v49 = vld [vmem:[#allocation10_spill] sm:$0xff] }
 0x294   : > { %7044 = vmatprep.mubr.msk.bf16.mxu1 %vm8652_vm1, %v8651_v22  ;;  %7576 = vmatprep.subr.bf16.mxu0 %v8651_v22 }
 0x296   : > { %7521 = vmatmul.mubr.msk.bf16.gmra.mrb[8].mxu0 %vm1031_vm11, %v4561_v1  ;;  %v10833_v1 = vld [vmem:[#allocation11_spill] sm:$0xff] }
 0x297   : > { %7524 = vmatprep.mubr.msk.bf16.mxu0 %vm8652_vm1, %v8651_v22 }
 0x29b   : > { %7045 = vmatmul.mubr.msk.bf16.vlgmr.msra.gmra.mrb[0].mxu1 %vm1031_vm11, %v2325_v62  ;;  %v10834_v62 = vld [vmem:[#allocation12_spill] sm:$0xff] }
 0x29c   : > { %7048 = vmatprep.mubr.msk.bf16.mxu1 %vm8652_vm1, %v8651_v22  ;;  %7073 = vmatpush3.bf16.msra.mxu1 %v8572_v53  ;;  %v2491_v53 = vrot.slane %v9019_v26, 2 }
 0x29d   : > { %7074 = vmatprep.subr.bf16.mxu1 %v8651_v22 }
 0x29e   : > { %7525 = vmatmul.mubr.msk.bf16.gmra.mrb[12].mxu0 %vm1031_vm11, %v4563_v51  ;;  %v2492_v58 = vsel %vm922_vm7, %v10041_v13, %v2491_v53  ;;  %v2493_v51 = vrot.slane %v9072_v2, 2 }
 0x29f   : > { %7528 = vmatprep.mubr.msk.bf16.mxu0 %vm8652_vm1, %v8651_v22 }
 0x2a0   : > { %7075 = vmatpush3.bf16.msra.mxu1 %v8574_v14  ;;  %v8586_v14 = vld [vmem:[%s10782_s3 + $0x158] sm:$0xff]   ;;  %v2494_v13 = vsel %vm922_vm7, %v2491_v53, %v2493_v51  ;;  %v2665_v53 = vrot.slane %v9109_v32, 2 }
 0x2a1   : > { %7076 = vmatprep.subr.bf16.mxu1 %v8651_v22 }
 0x2a3   : > { %7049 = vmatmul.mubr.msk.bf16.gmra.mrb[4].mxu1 %vm1031_vm11, %v2327_v27  ;;  %v10836_v27 = vld [vmem:[#allocation15_spill] sm:$0xff] }
 0x2a4   : > { %7052 = vmatprep.mubr.msk.bf16.mxu1 %vm8652_vm1, %v8651_v22  ;;  %7077 = vmatpush3.bf16.msra.mxu1 %v8576_v15  ;;  %v2495_v15 = vrot.slane %v9137_v7, 2 }
 0x2a5   : > { %7078 = vmatprep.subr.bf16.mxu1 %v8651_v22 }
 0x2a6   : > { %7529 = vmatmul.mubr.msk.bf16.gmra.mrb[16].mxu0 %vm1031_vm11, %v4565_v42  ;;  %v10837_v42 = vld [vmem:[#allocation14_spill] sm:$0xff]  ;;  %v2498_v16 = vsel %vm922_vm7, %v2495_v15, %v2497_v40 }
 0x2a7   : > { %7532 = vmatprep.mubr.msk.bf16.mxu0 %vm8652_vm1, %v8651_v22 }
 0x2a8   : > { %7079 = vmatpush3.bf16.msra.mxu1 %v8578_v11  ;;  %v2496_v11 = vsel %vm922_vm7, %v2493_v51, %v2495_v15  ;;  %v4922_v51 = vrot.slane %v9336_v4, 2 }
 0x2a9   : > { %7108 = vmatprep.subr.bf16.mxu1 %v8651_v22 }
 0x2ab   : > { %7053 = vmatmul.mubr.msk.bf16.gmra.mrb[8].mxu1 %vm1031_vm11, %v2329_v10  ;;  %v4912_v10 = vrot.slane %v8950_v6, 2 }
 0x2ac   : > { %7056 = vmatprep.mubr.msk.bf16.mxu1 %vm8652_vm1, %v8651_v22 }
 0x2ad   : > { %v4915_v34 = vsel %vm922_vm7, %v4912_v10, %v4914_v52 }
 0x2ae   : > { %7533 = vmatmul.mubr.msk.bf16.gmra.mrb[20].mxu0 %vm1031_vm11, %v10829_v41  ;;  %v8583_v41 = vld [vmem:[%s10782_s3 + $0x300] sm:$0xff]  }
 0x2af   : > { %7536 = vmatprep.mubr.msk.bf16.mxu0 %vm8652_vm1, %v8651_v22 }
 0x2b3   : > { %7057 = vmatmul.mubr.msk.bf16.gmra.mrb[12].mxu1 %vm1031_vm11, %v2331_v45  ;;  %v4913_v45 = vsel %vm922_vm7, %v4911_v43, %v4912_v10  ;;  %v8591_v10 = vld [vmem:[%s10782_s3 + $0x320] sm:$0xff]   ;;  %v2692_v43 = vrot.slane %v9663_v3, 2 }
 0x2b4   : > { %7060 = vmatprep.mubr.msk.bf16.mxu1 %vm8652_vm1, %v8651_v22 }
 0x2b6   : > { %7537 = vmatmul.mubr.msk.bf16.gmra.mrb[24].mxu0 %vm1031_vm11, %v10830_v24  ;;  %v2499_v24 = vrot.slane %v8900_v12, 2 }
 0x2b7   : > { %7548 = vmatprep.mubr.msk.bf16.mxu0 %vm8652_vm1, %v8651_v22 }
 0x2b8   : > { %v2500_v30 = vsel %vm922_vm7, %v2497_v40, %v2499_v24 }
 0x2bb   : > { %7061 = vmatmul.mubr.msk.bf16.gmra.mrb[16].mxu1 %vm1031_vm11, %v2333_v33  ;;  %v8587_v33 = vld [vmem:[%s10782_s3 + $0x310] sm:$0xff]  }
 0x2bc   : > { %7064 = vmatprep.mubr.msk.bf16.mxu1 %vm8652_vm1, %v8651_v22 }
 0x2be   : > { %7549 = vmatmul.mubr.msk.bf16.vlgmr.msra.gmra.mrb[0].mxu0 %vm1031_vm11, %v4730_v56  ;;  %v4917_v56 = vsel %vm922_vm7, %v4914_v52, %v4916_v36 }
 0x2bf   : > { %7577 = vmatpush3.bf16.msra.mxu0 %v8575_v46  ;;  %7552 = vmatprep.mubr.msk.bf16.mxu0 %vm8652_vm1, %v8651_v22  ;;  %v8589_v46 = vld [vmem:[%s10782_s3 + $0x318] sm:$0xff]  }
 0x2c0   : > { %7578 = vmatprep.subr.bf16.mxu0 %v8651_v22 }
 0x2c3   : > { %7065 = vmatmul.mubr.msk.bf16.gmra.mrb[20].mxu1 %vm1031_vm11, %v10263_v0  ;;  %7579 = vmatpush3.bf16.msra.mxu0 %v8577_v57  ;;  %v8588_v57 = vld [vmem:[%s10782_s3 + $0x160] sm:$0xff]  }
 0x2c4   : > { %7068 = vmatprep.mubr.msk.bf16.mxu1 %vm8652_vm1, %v8651_v22  ;;  %7580 = vmatprep.subr.bf16.mxu0 %v8651_v22 }
 0x2c6   : > { %7553 = vmatmul.mubr.msk.bf16.gmra.mrb[4].mxu0 %vm1031_vm11, %v10832_v49  ;;  %v2656_v49 = vrot.slane %v9059_v55, 2  ;;  %v8592_v55 = vld [vmem:[%s10782_s3 + $0x170] sm:$0xff]  }
 0x2c7   : > { %7556 = vmatprep.mubr.msk.bf16.mxu0 %vm8652_vm1, %v8651_v22  ;;  %7581 = vmatpush3.bf16.msra.mxu0 %v8579_v18  ;;  %v4918_v18 = vrot.slane %v9035_v20, 2 }
 0x2c8   : > { %7582 = vmatprep.subr.bf16.mxu0 %v8651_v22 }
 0x2cb   : > { %7069 = vmatmul.mubr.msk.bf16.gmra.mrb[24].mxu1 %vm1031_vm11, %v10252_v5  ;;  %7583 = vmatpush3.bf16.msra.mxu0 %v8581_v37  ;;  %v2659_v37 = vrot.slane %v9094_v19, 3 }
 0x2cc   : > { %7080 = vmatprep.mubr.msk.bf16.mxu1 %vm8652_vm1, %v8651_v22  ;;  %7612 = vmatprep.subr.bf16.mxu0 %v8651_v22 }
 0x2ce   : > { %7557 = vmatmul.mubr.msk.bf16.gmra.mrb[8].mxu0 %vm1031_vm11, %v10833_v1  ;;  %v8590_v1 = vld [vmem:[%s10782_s3 + $0x168] sm:$0xff]  }
 0x2cf   : > { %7560 = vmatprep.mubr.msk.bf16.mxu0 %vm8652_vm1, %v8651_v22 }
 0x2d3   : > { %7081 = vmatmul.mubr.msk.bf16.vlgmr.msra.gmra.mrb[0].mxu1 %vm1031_vm11, %v10053_v31  ;;  %v8584_v31 = vld [vmem:[%s10782_s3 + $0x150] sm:$0xff]  }
 0x2d4   : > { %7084 = vmatprep.mubr.msk.bf16.mxu1 %vm8652_vm1, %v8651_v22  ;;  %7109 = vmatpush3.bf16.msra.mxu1 %v8580_v9  ;;  %v4919_v9 = vsel %vm922_vm7, %v4916_v36, %v4918_v18  ;;  %v8597_v36 = vld [vmem:[%s10782_s3 + $0x338] sm:$0xff]  }
 0x2d5   : > { %7110 = vmatprep.subr.bf16.mxu1 %v8651_v22 }
 0x2d6   : > { %7561 = vmatmul.mubr.msk.bf16.gmra.mrb[12].mxu0 %vm1031_vm11, %v10834_v62  ;;  %v2668_v62 = vrot.slane %v9144_v60, 3  ;;  %v2674_v60 = vrot.slane %v9157_v61, 2 }
 0x2d7   : > { %7564 = vmatprep.mubr.msk.bf16.mxu0 %vm8652_vm1, %v8651_v22 }
 0x2d8   : > { %7111 = vmatpush3.bf16.msra.mxu1 %v8582_v29  ;;  %v2660_v29 = vor.u32 %v2659_v37, %v2656_v49  ;;  %v5086_v49 = vrot.slane %v9035_v20, 6  ;;  %v8598_v37 = vld [vmem:[%s10782_s3 + $0x188] sm:$0xff]  }
 0x2d9   : > { %7112 = vmatprep.subr.bf16.mxu1 %v8651_v22 }
 0x2da   : > { %v2661_v19 = vsel %vm668_vm6, %v10826_v48, %v2660_v29 }
 0x2db   : > { %7085 = vmatmul.mubr.msk.bf16.gmra.mrb[4].mxu1 %vm1031_vm11, %v2492_v58  ;;  %v2669_v58 = vor.u32 %v2668_v62, %v2665_v53  ;;  %v2852_v53 = vrot.slane %v9072_v2, 3  ;;  %v5090_v62 = vrot.slane %v9336_v4, 6 }
 0x2dc   : > { %7088 = vmatprep.mubr.msk.bf16.mxu1 %vm8652_vm1, %v8651_v22  ;;  %7113 = vmatpush3.bf16.msra.mxu1 %v8584_v31  ;;  %v8594_v31 = vld [vmem:[%s10782_s3 + $0x178] sm:$0xff]  }
 0x2dd   : > { %7114 = vmatprep.subr.bf16.mxu1 %v8651_v22  ;;  %v2670_v32 = vsel %vm668_vm6, %v2660_v29, %v2669_v58 }
 0x2de   : > { %7565 = vmatmul.mubr.msk.bf16.gmra.mrb[16].mxu0 %vm1031_vm11, %v10835_v47 }
 0x2df   : > { %7568 = vmatprep.mubr.msk.bf16.mxu0 %vm8652_vm1, %v8651_v22 }
 0x2e0   : > { %7115 = vmatpush3.bf16.msra.mxu1 %v8586_v14  ;;  %v2677_v14 = vrot.slane %v9178_v8, 3  ;;  %v2686_v8 = vrot.slane %v9641_v39, 3 }
 0x2e1   : > { %7144 = vmatprep.subr.bf16.mxu1 %v8651_v22 }
 0x2e3   : > { %7089 = vmatmul.mubr.msk.bf16.gmra.mrb[8].mxu1 %vm1031_vm11, %v2494_v13  ;;  %v2678_v13 = vor.u32 %v2677_v14, %v2674_v60  ;;  %v5247_v60 = vrot.slane %v9685_v38, 6  ;;  %v5248_v14 = vrot.slane %v9688_v35, 7 }
 0x2e4   : > { %7092 = vmatprep.mubr.msk.bf16.mxu1 %vm8652_vm1, %v8651_v22 }
 0x2e5   : > { %v2679_v15 = vsel %vm668_vm6, %v2669_v58, %v2678_v13 }
 0x2e6   : > { %7569 = vmatmul.mubr.msk.bf16.gmra.mrb[20].mxu0 %vm1031_vm11, %v10836_v27  ;;  %v2683_v27 = vrot.slane %v9638_v21, 2 }
 0x2e7   : > { %7572 = vmatprep.mubr.msk.bf16.mxu0 %vm8652_vm1, %v8651_v22 }
 0x2eb   : > { %7093 = vmatmul.mubr.msk.bf16.gmra.mrb[12].mxu1 %vm1031_vm11, %v2496_v11  ;;  %v2687_v11 = vor.u32 %v2686_v8, %v2683_v27  ;;  %v2858_v8 = vrot.slane %v8900_v12, 3 }
 0x2ec   : > { %7096 = vmatprep.mubr.msk.bf16.mxu1 %vm8652_vm1, %v8651_v22 }
 0x2ed   : > { %v2688_v40 = vsel %vm668_vm6, %v2678_v13, %v2687_v11  ;;  %v8599_v13 = vld [vmem:[%s10782_s3 + $0x340] sm:$0xff]  }
 0x2ee   : > { %7573 = vmatmul.mubr.msk.bf16.gmra.mrb[24].mxu0 %vm1031_vm11, %v10837_v42  ;;  %v5080_v42 = vrot.slane %v8950_v6, 6 }
 0x2ef   : > { %7584 = vmatprep.mubr.msk.bf16.mxu0 %vm8652_vm1, %v8651_v22 }
 0x2f3   : > { %7097 = vmatmul.mubr.msk.bf16.gmra.mrb[16].mxu1 %vm1031_vm11, %v2498_v16  ;;  %v5079_v16 = vrot.slane %v8915_v23, 6 }
 0x2f4   : > { %7100 = vmatprep.mubr.msk.bf16.mxu1 %vm8652_vm1, %v8651_v22 }
 0x2f6   : > { %7585 = vmatmul.mubr.msk.bf16.vlgmr.msra.gmra.mrb[0].mxu0 %vm1031_vm11, %v4913_v45 }
 0x2f7   : > { %7613 = vmatpush3.bf16.msra.mxu0 %v8583_v41  ;;  %7588 = vmatprep.mubr.msk.bf16.mxu0 %vm8652_vm1, %v8651_v22  ;;  %v10838_v41 = vld [vmem:[#allocation24_spill] sm:$0xff] }
 0x2f8   : > { %7614 = vmatprep.subr.bf16.mxu0 %v8651_v22  ;;  %v2695_v45 = vrot.slane %v10838_v41, 3 }
 0x2fb   : > { %7101 = vmatmul.mubr.msk.bf16.gmra.mrb[20].mxu1 %vm1031_vm11, %v2500_v30  ;;  %7615 = vmatpush3.bf16.msra.mxu0 %v8585_v28  ;;  %v2696_v28 = vor.u32 %v2695_v45, %v2692_v43  ;;  %v8593_v30 = vld [vmem:[%s10782_s3 + $0x328] sm:$0xff]   ;;  %v3014_v43 = vrot.slane %v8994_v63, 7  ;;  %v3015_v45 = vrot.slane %v8997_v59, 7  ;;  %v3017_v63 = vrot.slane %v9019_v26, 7 }
 0x2fc   : > { %7104 = vmatprep.mubr.msk.bf16.mxu1 %vm8652_vm1, %v8651_v22  ;;  %7616 = vmatprep.subr.bf16.mxu0 %v8651_v22  ;;  %v10842_v59 = vld [vmem:[#allocation19_spill] sm:$0xff] }
 0x2fd   : > { %v2697_v52 = vsel %vm668_vm6, %v2687_v11, %v2696_v28  ;;  %v8601_v11 = vld [vmem:[%s10782_s3 + $0x348] sm:$0xff]  }
 0x2fe   : > { %7589 = vmatmul.mubr.msk.bf16.gmra.mrb[4].mxu0 %vm1031_vm11, %v4915_v34  ;;  %v8595_v34 = vld [vmem:[%s10782_s3 + $0x330] sm:$0xff]  }
 0x2ff   : > { %7592 = vmatprep.mubr.msk.bf16.mxu0 %vm8652_vm1, %v8651_v22  ;;  %7617 = vmatpush3.bf16.msra.mxu0 %v8587_v33  ;;  %v5082_v33 = vrot.slane %v8982_v50, 6 }
 0x300   : > { %7618 = vmatprep.subr.bf16.mxu0 %v8651_v22 }
 0x303   : > { %7105 = vmatmul.mubr.msk.bf16.gmra.mrb[24].mxu1 %vm1031_vm11, %v2499_v24  ;;  %7619 = vmatpush3.bf16.msra.mxu0 %v8589_v46  ;;  %v5081_v24 = vsel %vm928_vm4, %v5079_v16, %v5080_v42  ;;  %v5083_v46 = vsel %vm928_vm4, %v5080_v42, %v5082_v33  ;;  %v8603_v42 = vld [vmem:[%s10782_s3 + $0x350] sm:$0xff]   ;;  %v10840_v16 = vld [vmem:[#allocation17_spill] sm:$0xff] }
 0x304   : > { %7116 = vmatprep.mubr.msk.bf16.mxu1 %vm8652_vm1, %v8651_v22  ;;  %7648 = vmatprep.subr.bf16.mxu0 %v8651_v22 }
 0x306   : > { %7593 = vmatmul.mubr.msk.bf16.gmra.mrb[8].mxu0 %vm1031_vm11, %v4917_v56  ;;  %v5084_v56 = vrot.slane %v9015_v17, 6 }
 0x307   : > { %7596 = vmatprep.mubr.msk.bf16.mxu0 %vm8652_vm1, %v8651_v22 }
 0x30b   : > { %7117 = vmatmul.mubr.msk.bf16.vlgmr.msra.gmra.mrb[0].mxu1 %vm1031_vm11, %v10153_v25  ;;  %v4920_v25 = vrot.slane %v9039_v44, 2 }
 0x30c   : > { %7120 = vmatprep.mubr.msk.bf16.mxu1 %vm8652_vm1, %v8651_v22  ;;  %7145 = vmatpush3.bf16.msra.mxu1 %v8588_v57  ;;  %v5085_v57 = vsel %vm928_vm4, %v5082_v33, %v5084_v56  ;;  %v3018_v33 = vsel %vm3013_vm8, %v3015_v45, %v3017_v63 }
 0x30d   : > { %7146 = vmatprep.subr.bf16.mxu1 %v8651_v22  ;;  %v4921_v48 = vsel %vm922_vm7, %v4918_v18, %v4920_v25  ;;  %v4923_v47 = vsel %vm922_vm7, %v4920_v25, %v4922_v51  ;;  %v8596_v18 = vld [vmem:[%s10782_s3 + $0x180] sm:$0xff]  }
 0x30e   : > { %7597 = vmatmul.mubr.msk.bf16.gmra.mrb[12].mxu0 %vm1031_vm11, %v4919_v9  ;;  %v2850_v9 = vrot.slane %v9019_v26, 3  ;;  %v8607_v26 = vld [vmem:[%s10782_s3 + $0x1b0] sm:$0xff]  }
 0x30f   : > { %7600 = vmatprep.mubr.msk.bf16.mxu0 %vm8652_vm1, %v8651_v22 }
 0x310   : > { %7147 = vmatpush3.bf16.msra.mxu1 %v8590_v1  ;;  %v5087_v1 = vsel %vm928_vm4, %v5084_v56, %v5086_v49  ;;  %v2851_v29 = vsel %vm2322_vm10, %v10252_v5, %v2850_v9  ;;  %v2853_v5 = vsel %vm2322_vm10, %v2850_v9, %v2852_v53  ;;  %v3027_v9 = vrot.slane %v8915_v23, 7 }
 0x311   : > { %7148 = vmatprep.subr.bf16.mxu1 %v8651_v22 }
 0x313   : > { %7121 = vmatmul.mubr.msk.bf16.gmra.mrb[4].mxu1 %vm1031_vm11, %v2661_v19  ;;  %v8602_v19 = vld [vmem:[%s10782_s3 + $0x198] sm:$0xff]  }
 0x314   : > { %7124 = vmatprep.mubr.msk.bf16.mxu1 %vm8652_vm1, %v8651_v22  ;;  %7149 = vmatpush3.bf16.msra.mxu1 %v8592_v55  ;;  %v5088_v55 = vrot.slane %v9039_v44, 6 }
 0x315   : > { %7150 = vmatprep.subr.bf16.mxu1 %v8651_v22 }
 0x316   : > { %7601 = vmatmul.mubr.msk.bf16.gmra.mrb[16].mxu0 %vm1031_vm11, %v4921_v48  ;;  %v5089_v25 = vsel %vm928_vm4, %v5086_v49, %v5088_v55  ;;  %v2854_v48 = vrot.slane %v9137_v7, 3  ;;  %v3023_v49 = vrot.slane %v9372_v54, 7 }
 0x317   : > { %7604 = vmatprep.mubr.msk.bf16.mxu0 %vm8652_vm1, %v8651_v22 }
 0x318   : > { %7151 = vmatpush3.bf16.msra.mxu1 %v8594_v31  ;;  %v5091_v31 = vsel %vm928_vm4, %v5088_v55, %v5090_v62  ;;  %v2855_v58 = vsel %vm2322_vm10, %v2852_v53, %v2854_v48  ;;  %v10846_v53 = vrot.slane %v9157_v61, 7 }
 0x319   : > { %7180 = vmatprep.subr.bf16.mxu1 %v8651_v22 }
 0x31b   : > { %7125 = vmatmul.mubr.msk.bf16.gmra.mrb[8].mxu1 %vm1031_vm11, %v2670_v32  ;;  %v2856_v32 = vrot.slane %v9372_v54, 3  ;;  %v3025_v54 = vrot.slane %v8900_v12, 7  ;;  %v5439_v12 = vrot.slane %v9015_v17, 7 }
 0x31c   : > { %7128 = vmatprep.mubr.msk.bf16.mxu1 %vm8652_vm1, %v8651_v22 }
 0x31d   : > { %v3028_v55 = vsel %vm3013_vm8, %v3025_v54, %v3027_v9 }
 0x31e   : > { %7605 = vmatmul.mubr.msk.bf16.gmra.mrb[20].mxu0 %vm1031_vm11, %v4923_v47  ;;  %v5249_v47 = vor.u32 %v5248_v14, %v5247_v60 }
 0x31f   : > { %7608 = vmatprep.mubr.msk.bf16.mxu0 %vm8652_vm1, %v8651_v22 }
 0x323   : > { %7129 = vmatmul.mubr.msk.bf16.gmra.mrb[12].mxu1 %vm1031_vm11, %v2679_v15  ;;  %v10839_v15 = vld [vmem:[#allocation16_spill] sm:$0xff] }
 0x324   : > { %7132 = vmatprep.mubr.msk.bf16.mxu1 %vm8652_vm1, %v8651_v22  ;;  %v5253_v27 = vsel %vm857_vm3, %v5249_v47, %v10839_v15  ;;  %vm5779_vm3 = vcmask 517120  }
 0x326   : > { %7609 = vmatmul.mubr.msk.bf16.gmra.mrb[24].mxu0 %vm1031_vm11, %v4922_v51  ;;  %v2857_v51 = vsel %vm2322_vm10, %v2854_v48, %v2856_v32 }
 0x327   : > { %7620 = vmatprep.mubr.msk.bf16.mxu0 %vm8652_vm1, %v8651_v22 }
 0x32b   : > { %7133 = vmatmul.mubr.msk.bf16.gmra.mrb[16].mxu1 %vm1031_vm11, %v2688_v40  ;;  %v2859_v40 = vsel %vm2322_vm10, %v2856_v32, %v2858_v8 }
 0x32c   : > { %7136 = vmatprep.mubr.msk.bf16.mxu1 %vm8652_vm1, %v8651_v22 }
 0x32e   : > { %7621 = vmatmul.mubr.msk.bf16.vlgmr.msra.gmra.mrb[0].mxu0 %vm1031_vm11, %v5081_v24  ;;  %v10841_v24 = vld [vmem:[#allocation18_spill] sm:$0xff] }
 0x32f   : > { %7649 = vmatpush3.bf16.msra.mxu0 %v8591_v10  ;;  %7624 = vmatprep.mubr.msk.bf16.mxu0 %vm8652_vm1, %v8651_v22  ;;  %v8604_v10 = vld [vmem:[%s10782_s3 + $0x358] sm:$0xff]  }
 0x330   : > { %7650 = vmatprep.subr.bf16.mxu0 %v8651_v22 }
 0x333   : > { %7137 = vmatmul.mubr.msk.bf16.gmra.mrb[20].mxu1 %vm1031_vm11, %v2697_v52  ;;  %7651 = vmatpush3.bf16.msra.mxu0 %v8593_v30  ;;  %v8605_v30 = vld [vmem:[%s10782_s3 + $0x1a0] sm:$0xff]   ;;  %v8606_v52 = vld [vmem:[%s10782_s3 + $0x1a8] sm:$0xff]  }
 0x334   : > { %7140 = vmatprep.mubr.msk.bf16.mxu1 %vm8652_vm1, %v8651_v22  ;;  %7652 = vmatprep.subr.bf16.mxu0 %v8651_v22 }
 0x336   : > { %7625 = vmatmul.mubr.msk.bf16.gmra.mrb[4].mxu0 %vm1031_vm11, %v5083_v46  ;;  %v10843_v46 = vld [vmem:[#allocation20_spill] sm:$0xff] }
 0x337   : > { %7628 = vmatprep.mubr.msk.bf16.mxu0 %vm8652_vm1, %v8651_v22  ;;  %7653 = vmatpush3.bf16.msra.mxu0 %v8595_v34  ;;  %v3019_v34 = vrot.slane %v9072_v2, 7  ;;  %v3021_v2 = vrot.slane %v9137_v7, 7 }
 0x338   : > { %7654 = vmatprep.subr.bf16.mxu0 %v8651_v22 }
 0x339   : > { %v3020_v56 = vsel %vm3013_vm8, %v3017_v63, %v3019_v34  ;;  %v3024_v7 = vsel %vm3013_vm8, %v3021_v2, %v3023_v49 }
 0x33b   : > { %7141 = vmatmul.mubr.msk.bf16.gmra.mrb[24].mxu1 %vm1031_vm11, %v2696_v28  ;;  %7655 = vmatpush3.bf16.msra.mxu0 %v8597_v36  ;;  %v3016_v28 = vsel %vm3013_vm8, %v3014_v43, %v3015_v45  ;;  %v8608_v36 = vld [vmem:[%s10782_s3 + $0x1b8] sm:$0xff]  }
 0x33c   : > { %7152 = vmatprep.mubr.msk.bf16.mxu1 %vm8652_vm1, %v8651_v22  ;;  %7684 = vmatprep.subr.bf16.mxu0 %v8651_v22 }
 0x33e   : > { %7629 = vmatmul.mubr.msk.bf16.gmra.mrb[8].mxu0 %vm1031_vm11, %v5085_v57  ;;  %v10844_v57 = vld [vmem:[#allocation21_spill] sm:$0xff] }
 0x33f   : > { %7632 = vmatprep.mubr.msk.bf16.mxu0 %vm8652_vm1, %v8651_v22 }
 0x343   : > { %7153 = vmatmul.mubr.msk.bf16.vlgmr.msra.gmra.mrb[0].mxu1 %vm1031_vm11, %v10263_v0  ;;  %v8600_v0 = vld [vmem:[%s10782_s3 + $0x190] sm:$0xff]  }
 0x344   : > { %7156 = vmatprep.mubr.msk.bf16.mxu1 %vm8652_vm1, %v8651_v22  ;;  %7181 = vmatpush3.bf16.msra.mxu1 %v8596_v18  ;;  %v3022_v18 = vsel %vm3013_vm8, %v3019_v34, %v3021_v2 }
 0x345   : > { %7182 = vmatprep.subr.bf16.mxu1 %v8651_v22 }
 0x346   : > { %7633 = vmatmul.mubr.msk.bf16.gmra.mrb[12].mxu0 %vm1031_vm11, %v5087_v1  ;;  %v5435_v1 = vrot.slane %v8950_v6, 7  ;;  %v5437_v6 = vrot.slane %v8982_v50, 7 }
 0x347   : > { %7636 = vmatprep.mubr.msk.bf16.mxu0 %vm8652_vm1, %v8651_v22 }
 0x348   : > { %7183 = vmatpush3.bf16.msra.mxu1 %v8598_v37  ;;  %v10845_v37 = vld [vmem:[#allocation22_spill] sm:$0xff]  ;;  %v5438_v23 = vsel %vm3013_vm8, %v5435_v1, %v5437_v6  ;;  %v5440_v50 = vsel %vm3013_vm8, %v5437_v6, %v5439_v12 }
 0x349   : > { %7184 = vmatprep.subr.bf16.mxu1 %v8651_v22 }
 0x34b   : > { %7157 = vmatmul.mubr.msk.bf16.gmra.mrb[4].mxu1 %vm1031_vm11, %v2851_v29  ;;  %v3026_v29 = vsel %vm3013_vm8, %v3023_v49, %v3025_v54 }
 0x34c   : > { %7160 = vmatprep.mubr.msk.bf16.mxu1 %vm8652_vm1, %v8651_v22  ;;  %7185 = vmatpush3.bf16.msra.mxu1 %v8600_v0  ;;  %v5436_v0 = vsel %vm3013_vm8, %v3027_v9, %v5435_v1  ;;  %v5621_v1 = vpop.permute.xlu0 %5620 }
 0x34d   : > { %7186 = vmatprep.subr.bf16.mxu1 %v8651_v22 }
 0x34e   : > { %7637 = vmatmul.mubr.msk.bf16.gmra.mrb[16].mxu0 %vm1031_vm11, %v5089_v25 }
 0x34f   : > { %7640 = vmatprep.mubr.msk.bf16.mxu0 %vm8652_vm1, %v8651_v22 }
 0x350   : > { %7187 = vmatpush3.bf16.msra.mxu1 %v8602_v19  ;;  %v3198_v19 = vrot.slane %v9638_v21, 7  ;;  %v5441_v21 = vrot.slane %v9035_v20, 7  ;;  %v5443_v20 = vrot.slane %v9039_v44, 7  ;;  %v10847_v44 = vrot.slane %v9336_v4, 7 }
 0x351   : > { %7720 = vmatprep.subr.bf16.mxu1 %v8651_v22 }
 0x352   : > { %v3199_v25 = vor.u32 %v3198_v19, %v9641_v39  ;;  %v5442_v39 = vsel %vm3013_vm8, %v5439_v12, %v5441_v21 }
 0x353   : > { %7161 = vmatmul.mubr.msk.bf16.gmra.mrb[8].mxu1 %vm1031_vm11, %v2853_v5  ;;  %v3201_v5 = vrot.slane %v9663_v3, 7  ;;  %v5444_v3 = vsel %vm3013_vm8, %v5441_v21, %v5443_v20 }
 0x354   : > { %7164 = vmatprep.mubr.msk.bf16.mxu1 %vm8652_vm1, %v8651_v22  ;;  %v3200_v17 = vsel %vm3184_vm12, %v10846_v53, %v3199_v25 }
 0x355   : > { %v3202_v61 = vor.u32 %v3201_v5, %v10838_v41 }
 0x356   : > { %7641 = vmatmul.mubr.msk.bf16.gmra.mrb[20].mxu0 %vm1031_vm11, %v5091_v31  ;;  %v3207_v31 = vrot.slane %v9685_v38, 7  ;;  %v5446_v38 = vsel %vm3013_vm8, %v5443_v20, %v10847_v44 }
 0x357   : > { %7644 = vmatprep.mubr.msk.bf16.mxu0 %vm8652_vm1, %v8651_v22 }
 0x358   : > { %v3210_v48 = vor.u32 %v9688_v35, %v3207_v31  ;;  %v5631_v31 = vpop.permute.xlu0 %5630 }
 0x35a   : > { %v3211_v41 = vsel %vm3184_vm12, %v3201_v5, %v3210_v48 }
 0x35b   : > { %7165 = vmatmul.mubr.msk.bf16.gmra.mrb[12].mxu1 %vm1031_vm11, %v2855_v58  ;;  %v10848_v58 = vld [vmem:[#allocation23_spill] sm:$0xff] }
 0x35c   : > { %7168 = vmatprep.mubr.msk.bf16.mxu1 %vm8652_vm1, %v8651_v22 }
 0x35e   : > { %7645 = vmatmul.mubr.msk.bf16.gmra.mrb[24].mxu0 %vm1031_vm11, %v5090_v62  ;;  %v3203_v62 = vsel %vm3184_vm12, %v3198_v19, %v3202_v61 }
 0x35f   : > { %7656 = vmatprep.mubr.msk.bf16.mxu0 %vm8652_vm1, %v8651_v22 }
 0x363   : > { %7169 = vmatmul.mubr.msk.bf16.gmra.mrb[16].mxu1 %vm1031_vm11, %v2857_v51 }
 0x364   : > { %7172 = vmatprep.mubr.msk.bf16.mxu1 %vm8652_vm1, %v8651_v22 }
 0x366   : > { %7657 = vmatmul.mubr.msk.bf16.vlgmr.msra.gmra.mrb[0].mxu0 %vm1031_vm11, %v5253_v27 }
 0x367   : > { %7685 = vmatpush3.bf16.msra.mxu0 %v8599_v13  ;;  %7660 = vmatprep.mubr.msk.bf16.mxu0 %vm8652_vm1, %v8651_v22 }
 0x368   : > { %7686 = vmatprep.subr.bf16.mxu0 %v8651_v22 }
 0x36b   : > { %7173 = vmatmul.mubr.msk.bf16.gmra.mrb[20].mxu1 %vm1031_vm11, %v2859_v40  ;;  %7687 = vmatpush3.bf16.msra.mxu0 %v8601_v11 }
 0x36c   : > { %7176 = vmatprep.mubr.msk.bf16.mxu1 %vm8652_vm1, %v8651_v22  ;;  %7688 = vmatprep.subr.bf16.mxu0 %v8651_v22 }
 0x36e   : > { %7661 = vmatmul.mubr.msk.bf16.gmra.mrb[4].mxu0 %vm1031_vm11, %v10840_v16 }
 0x36f   : > { %7664 = vmatprep.mubr.msk.bf16.mxu0 %vm8652_vm1, %v8651_v22  ;;  %7689 = vmatpush3.bf16.msra.mxu0 %v8603_v42 }
 0x370   : > { %7690 = vmatprep.subr.bf16.mxu0 %v8651_v22 }
 0x373   : > { %7177 = vmatmul.mubr.msk.bf16.gmra.mrb[24].mxu1 %vm1031_vm11, %v2858_v8  ;;  %7691 = vmatpush3.bf16.msra.mxu0 %v8604_v10  ;;  %v8494_v10 = vpop.permute.xlu1 %8493 }
 0x374   : > { %7188 = vmatprep.mubr.msk.bf16.mxu1 %vm8652_vm1, %v8651_v22  ;;  %v8495_v45 = vunpack.i.l.bf16 %v8494_v10  ;;  %v8496_v63 = vunpack.i.h.bf16 %v8494_v10 }
 0x376   : > { %7665 = vmatmul.mubr.msk.bf16.gmra.mrb[8].mxu0 %vm1031_vm11, %v10841_v24 }
 0x377   : > { %7668 = vmatprep.mubr.msk.bf16.mxu0 %vm8652_vm1, %v8651_v22 }
 0x37b   : > { %7189 = vmatmul.mubr.msk.bf16.vlgmr.msra.gmra.mrb[0].mxu1 %vm1031_vm11, %v3016_v28 }
 0x37c   : > { %7192 = vmatprep.mubr.msk.bf16.mxu1 %vm8652_vm1, %v8651_v22  ;;  %7724 = vmatpush3.bf16.msra.mxu1 %v8605_v30 }
 0x37d   : > { %7721 = vmatprep.subr.bf16.mxu1 %v8651_v22 }
 0x37e   : > { %7669 = vmatmul.mubr.msk.bf16.gmra.mrb[12].mxu0 %vm1031_vm11, %v10842_v59 }
 0x37f   : > { %7672 = vmatprep.mubr.msk.bf16.mxu0 %vm8652_vm1, %v8651_v22 }
 0x380   : > { %7725 = vmatpush3.bf16.msra.mxu1 %v8606_v52 }
 0x381   : > { %7722 = vmatprep.subr.bf16.mxu1 %v8651_v22 }
 0x383   : > { %7193 = vmatmul.mubr.msk.bf16.gmra.mrb[4].mxu1 %vm1031_vm11, %v3018_v33 }
 0x384   : > { %7196 = vmatprep.mubr.msk.bf16.mxu1 %vm8652_vm1, %v8651_v22  ;;  %7726 = vmatpush3.bf16.msra.mxu1 %v8607_v26 }
 0x385   : > { %7723 = vmatprep.subr.bf16.mxu1 %v8651_v22 }
 0x386   : > { %7673 = vmatmul.mubr.msk.bf16.gmra.mrb[16].mxu0 %vm1031_vm11, %v10843_v46 }
 0x387   : > { %7676 = vmatprep.mubr.msk.bf16.mxu0 %vm8652_vm1, %v8651_v22 }
 0x388   : > { %7727 = vmatpush3.bf16.msra.mxu1 %v8608_v36 }
 0x38b   : > { %7197 = vmatmul.mubr.msk.bf16.gmra.mrb[8].mxu1 %vm1031_vm11, %v3020_v56 }
 0x38c   : > { %7200 = vmatprep.mubr.msk.bf16.mxu1 %vm8652_vm1, %v8651_v22 }
 0x38e   : > { %7677 = vmatmul.mubr.msk.bf16.gmra.mrb[20].mxu0 %vm1031_vm11, %v10844_v57 }
 0x38f   : > { %7680 = vmatprep.mubr.msk.bf16.mxu0 %vm8652_vm1, %v8651_v22 }
 0x393   : > { %7201 = vmatmul.mubr.msk.bf16.gmra.mrb[12].mxu1 %vm1031_vm11, %v3022_v18 }
 0x394   : > { %7204 = vmatprep.mubr.msk.bf16.mxu1 %vm8652_vm1, %v8651_v22 }
 0x396   : > { %7681 = vmatmul.mubr.msk.bf16.gmra.mrb[24].mxu0 %vm1031_vm11, %v10845_v37 }
 0x397   : > { %7692 = vmatprep.mubr.msk.bf16.mxu0 %vm8652_vm1, %v8651_v22 }
 0x39b   : > { %7205 = vmatmul.mubr.msk.bf16.gmra.mrb[16].mxu1 %vm1031_vm11, %v3024_v7 }
 0x39c   : > { %7208 = vmatprep.mubr.msk.bf16.mxu1 %vm8652_vm1, %v8651_v22 }
 0x39e   : > { %7693 = vmatmul.mubr.msk.bf16.vlgmr.msra.gmra.mrb[0].mxu0 %vm1031_vm11, %v5436_v0 }
 0x39f   : > { %7696 = vmatprep.mubr.msk.bf16.mxu0 %vm8652_vm1, %v8651_v22 }
 0x3a3   : > { %7209 = vmatmul.mubr.msk.bf16.gmra.mrb[20].mxu1 %vm1031_vm11, %v3026_v29 }
 0x3a4   : > { %7212 = vmatprep.mubr.msk.bf16.mxu1 %vm8652_vm1, %v8651_v22 }
 0x3a6   : > { %7697 = vmatmul.mubr.msk.bf16.gmra.mrb[4].mxu0 %vm1031_vm11, %v5438_v23  ;;  %v5626_v23 = vpop.permute.xlu1 %5625 }
 0x3a7   : > { %7700 = vmatprep.mubr.msk.bf16.mxu0 %vm8652_vm1, %v8651_v22 }
 0x3ab   : > { %7213 = vmatmul.mubr.msk.bf16.gmra.mrb[24].mxu1 %vm1031_vm11, %v3028_v55 }
 0x3ac   : > { %7240 = vmatprep.mubr.msk.bf16.mxu1 %vm8652_vm1, %v8651_v22 }
 0x3ae   : > { %7701 = vmatmul.mubr.msk.bf16.gmra.mrb[8].mxu0 %vm1031_vm11, %v5440_v50 }
 0x3af   : > { %7704 = vmatprep.mubr.msk.bf16.mxu0 %vm8652_vm1, %v8651_v22 }
 0x3b3   : > { %7241 = vmatmul.mubr.msk.bf16.vlgmr.msra.gmra.mrb[16].mxu1 %vm1031_vm11, %v3200_v17 }
 0x3b4   : > { %7244 = vmatprep.mubr.msk.bf16.mxu1 %vm8652_vm1, %v8651_v22 }
 0x3b6   : > { %7705 = vmatmul.mubr.msk.bf16.gmra.mrb[12].mxu0 %vm1031_vm11, %v5442_v39 }
 0x3b7   : > { %7708 = vmatprep.mubr.msk.bf16.mxu0 %vm8652_vm1, %v8651_v22 }
 0x3bb   : > { %7245 = vmatmul.mubr.msk.bf16.gmra.mrb[20].mxu1 %vm1031_vm11, %v3203_v62 }
 0x3bc   : > { %7248 = vmatprep.mubr.msk.bf16.mxu1 %vm8652_vm1, %v8651_v22 }
 0x3be   : > { %7709 = vmatmul.mubr.msk.bf16.gmra.mrb[16].mxu0 %vm1031_vm11, %v5444_v3 }
 0x3bf   : > { %7712 = vmatprep.mubr.msk.bf16.mxu0 %vm8652_vm1, %v8651_v22 }
 0x3c3   : > { %7249 = vmatmul.mubr.msk.bf16.gmra.mrb[24].mxu1 %vm1031_vm11, %v3211_v41 }
 0x3c6   : > { %7713 = vmatmul.mubr.msk.bf16.gmra.mrb[20].mxu0 %vm1031_vm11, %v5446_v38 }
 0x3c7   : > { %7716 = vmatprep.mubr.msk.bf16.mxu0 %vm8652_vm1, %v8651_v22  ;;  %vm5698_vm1 = vcmask 519168  }
 0x3ce   : > { %7717 = vmatmul.mubr.msk.bf16.gmra.mrb[24].mxu0 %vm1031_vm11, %v10848_v58  ;;  %v5636_v58 = vpop.permute.xlu1 %5635 }
 0x44e   : > { %v3108_v35 = vpop.f32.mrb[0].mxu1 }
 0x44f   : > { %v7190_v32 = vpop.f32.mrb[1].mxu1 }
 0x450   : > { %v3111_v60 = vpop.f32.mrb[2].mxu1 }
 0x451   : > { %v7191_v14 = vpop.f32.mrb[3].mxu1 }
 0x456   : > { %v3116_v51 = vpop.f32.mrb[4].mxu1 }
 0x457   : > { %v7194_v47 = vpop.f32.mrb[5].mxu1 }
 0x458   : > { %v3119_v13 = vpop.f32.mrb[6].mxu1 }
 0x459   : > { %v7195_v15 = vpop.f32.mrb[7].mxu1 }
 0x45e   : > { %v3124_v27 = vpop.f32.mrb[8].mxu1 }
 0x45f   : > { %v7198_v4 = vpop.f32.mrb[9].mxu1 }
 0x460   : > { %v3127_v8 = vpop.f32.mrb[10].mxu1 }
 0x461   : > { %v7199_v11 = vpop.f32.mrb[11].mxu1 }
 0x466   : > { %v10706_v40 = vpop.f32.mrb[12].mxu1 }
 0x467   : > { %v7202_v42 = vpop.f32.mrb[13].mxu1 }
 0x468   : > { %v10708_v22 = vpop.f32.mrb[14].mxu1 }
 0x469   : > { %v7203_v16 = vpop.f32.mrb[15].mxu1 }
 0x471   : > { %v5528_v43 = vpop.f32.mrb[0].mxu0 }
 0x472   : > { %v7728_v24 = vadd.f32 %v5528_v43, %v3108_v35  ;;  %v7694_v28 = vpop.f32.mrb[1].mxu0 }
 0x473   : > { %v5531_v30 = vpop.f32.mrb[2].mxu0 }
 0x474   : > { %v5673_v59 = vmul.f32 %v8495_v45, %v7728_v24  ;;  %v7729_v52 = vadd.f32 %v5531_v30, %v3111_v60  ;;  %v7695_v33 = vpop.f32.mrb[3].mxu0  ;;  %v5641_v24 = vpop.permute.xlu0 %5640 }
 0x475   : > { %v5646_v33 = vpop.permute.xlu1 %5645 }
 0x476   : > { %5686 = vst.msk [vmem:[%s8746_s10] sm:$0xff] %vm1031_vm11, %v5673_v59  ;;  %v5731_v26 = vmul.f32 %v5673_v59, %v5673_v59  ;;  %v5674_v34 = vmul.f32 %v8496_v63, %v7729_v52  ;;  %v5700_v46 = vsel %vm1031_vm11, %v5673_v59, 0.0 }
 0x478   : > { %5687 = vst.msk [vmem:[%s8746_s10 + $0x8] sm:$0xff] %vm1031_vm11, %v5674_v34  ;;  %v5701_v36 = vsel %vm1031_vm11, %v5674_v34, 0.0  ;;  %v5732_v56 = vmul.f32 %v5674_v34, %v5674_v34  ;;  %v5744_v18 = vsel %vm1031_vm11, %v5731_v26, 0.0 }
 0x479   : > { %v5702_v2 = vadd.f32 %v5701_v36, %v5700_v46  ;;  %v5536_v57 = vpop.f32.mrb[4].mxu0 }
 0x47a   : > { %v5745_v49 = vsel %vm1031_vm11, %v5732_v56, 0.0  ;;  %v7730_v37 = vadd.f32 %v5536_v57, %v3116_v51  ;;  %v7698_v7 = vpop.f32.mrb[5].mxu0 }
 0x47b   : > { %v5746_v9 = vadd.f32 %v5745_v49, %v5744_v18  ;;  %v5539_v0 = vpop.f32.mrb[6].mxu0 }
 0x47c   : > { %v5675_v54 = vmul.f32 %v7730_v37, %v5621_v1  ;;  %v7731_v29 = vadd.f32 %v5539_v0, %v3119_v13  ;;  %v7699_v6 = vpop.f32.mrb[7].mxu0 }
 0x47e   : > { %5688 = vst.msk [vmem:[%s8746_s10 + $0x10] sm:$0xff] %vm1031_vm11, %v5675_v54  ;;  %v5703_v55 = vsel %vm1031_vm11, %v5675_v54, 0.0  ;;  %v5733_v12 = vmul.f32 %v5675_v54, %v5675_v54  ;;  %v5676_v19 = vmul.f32 %v7731_v29, %v5626_v23  ;;  %v5651_v29 = vpop.permute.xlu0 %5650 }
 0x47f   : > { %v5704_v50 = vadd.f32 %v5703_v55, %v5702_v2 }
 0x480   : > { %v5747_v25 = vsel %vm1031_vm11, %v5733_v12, 0.0  ;;  %5689 = vst.msk [vmem:[%s8746_s10 + $0x18] sm:$0xff] %vm1031_vm11, %v5676_v19  ;;  %v5705_v53 = vsel %vm1031_vm11, %v5676_v19, 0.0  ;;  %v5734_v17 = vmul.f32 %v5676_v19, %v5676_v19 }
 0x481   : > { %v5748_v21 = vadd.f32 %v5747_v25, %v5746_v9  ;;  %v5706_v5 = vadd.f32 %v5705_v53, %v5704_v50  ;;  %v5544_v39 = vpop.f32.mrb[8].mxu0  ;;  %v5656_v50 = vpop.permute.xlu1 %5655 }
 0x482   : > { %v5749_v61 = vsel %vm1031_vm11, %v5734_v17, 0.0  ;;  %v7732_v62 = vadd.f32 %v5544_v39, %v3124_v27  ;;  %v7702_v20 = vpop.f32.mrb[9].mxu0 }
 0x483   : > { %v5750_v3 = vadd.f32 %v5749_v61, %v5748_v21  ;;  %v5547_v48 = vpop.f32.mrb[10].mxu0 }
 0x484   : > { %v5677_v41 = vmul.f32 %v7732_v62, %v5631_v31  ;;  %v7733_v44 = vadd.f32 %v5547_v48, %v3127_v8  ;;  %v7703_v38 = vpop.f32.mrb[11].mxu0 }
 0x486   : > { %v3323_v35 = vpop.f32.mrb[16].mxu1  ;;  %5690 = vst.msk [vmem:[%s8746_s10 + $0x20] sm:$0xff] %vm1031_vm11, %v5677_v41  ;;  %v5707_v32 = vsel %vm1031_vm11, %v5677_v41, 0.0  ;;  %v5735_v60 = vmul.f32 %v5677_v41, %v5677_v41  ;;  %v5678_v14 = vmul.f32 %v7733_v44, %v5636_v58 }
 0x487   : > { %v7242_v51 = vpop.f32.mrb[17].mxu1  ;;  %v5708_v47 = vadd.f32 %v5707_v32, %v5706_v5  ;;  %v5661_v32 = vpop.permute.xlu0 %5660 }
 0x488   : > { %v3326_v13 = vpop.f32.mrb[18].mxu1  ;;  %v5751_v15 = vsel %vm1031_vm11, %v5735_v60, 0.0  ;;  %5691 = vst.msk [vmem:[%s8746_s10 + $0x28] sm:$0xff] %vm1031_vm11, %v5678_v14  ;;  %v5709_v27 = vsel %vm1031_vm11, %v5678_v14, 0.0  ;;  %v5736_v4 = vmul.f32 %v5678_v14, %v5678_v14 }
 0x489   : > { %v7243_v8 = vpop.f32.mrb[19].mxu1  ;;  %v5752_v11 = vadd.f32 %v5751_v15, %v5750_v3  ;;  %v5710_v42 = vadd.f32 %v5709_v27, %v5708_v47  ;;  %v5552_v16 = vpop.f32.mrb[12].mxu0 }
 0x48a   : > { %v5753_v10 = vsel %vm1031_vm11, %v5736_v4, 0.0  ;;  %v7734_v43 = vadd.f32 %v5552_v16, %v10706_v40  ;;  %v7706_v45 = vpop.f32.mrb[13].mxu0  ;;  %v5666_v15 = vpop.permute.xlu1 %5665 }
 0x48b   : > { %v5754_v28 = vadd.f32 %v5753_v10, %v5752_v11  ;;  %v5555_v30 = vpop.f32.mrb[14].mxu0 }
 0x48c   : > { %v5679_v63 = vmul.f32 %v7734_v43, %v5641_v24  ;;  %v7735_v59 = vadd.f32 %v5555_v30, %v10708_v22  ;;  %v7707_v52 = vpop.f32.mrb[15].mxu0 }
 0x48e   : > { %v3331_v26 = vpop.f32.mrb[20].mxu1  ;;  %5692 = vst.msk [vmem:[%s8746_s10 + $0x30] sm:$0xff] %vm1031_vm11, %v5679_v63  ;;  %v5711_v34 = vsel %vm1031_vm11, %v5679_v63, 0.0  ;;  %v5737_v46 = vmul.f32 %v5679_v63, %v5679_v63  ;;  %v5680_v36 = vmul.f32 %v7735_v59, %v5646_v33  ;;  %v5671_v59 = vpop.permute.xlu0 %5670 }
 0x48f   : > { %v7246_v56 = vpop.f32.mrb[21].mxu1  ;;  %v5712_v2 = vadd.f32 %v5711_v34, %v5710_v42 }
 0x490   : > { %v3334_v40 = vpop.f32.mrb[22].mxu1  ;;  %v5755_v57 = vsel %vm1031_vm11, %v5737_v46, 0.0  ;;  %5693 = vst.msk [vmem:[%s8746_s10 + $0x38] sm:$0xff] %vm1031_vm11, %v5680_v36  ;;  %v5713_v18 = vsel %vm1031_vm11, %v5680_v36, 0.0  ;;  %v5738_v49 = vmul.f32 %v5680_v36, %v5680_v36 }
 0x491   : > { %v7247_v22 = vpop.f32.mrb[23].mxu1  ;;  %v5756_v37 = vadd.f32 %v5755_v57, %v5754_v28  ;;  %v5714_v7 = vadd.f32 %v5713_v18, %v5712_v2  ;;  %v5560_v1 = vpop.f32.mrb[16].mxu0 }
 0x492   : > { %v5757_v9 = vsel %vm1031_vm11, %v5738_v49, 0.0  ;;  %v7736_v0 = vadd.f32 %v5560_v1, %v3323_v35  ;;  %v7710_v54 = vpop.f32.mrb[17].mxu0 }
 0x493   : > { %v5758_v6 = vadd.f32 %v5757_v9, %v5756_v37  ;;  %v5563_v23 = vpop.f32.mrb[18].mxu0 }
 0x494   : > { %v5681_v55 = vmul.f32 %v7736_v0, %v5651_v29  ;;  %v7737_v12 = vadd.f32 %v5563_v23, %v3326_v13  ;;  %v7711_v19 = vpop.f32.mrb[19].mxu0  ;;  %v5775_v23 = vld [vmem:[%s8752_s15] sm:$0x3] }
 0x496   : > { %v3339_v25 = vpop.f32.mrb[24].mxu1  ;;  %5694 = vst.msk [vmem:[%s8746_s10 + $0x40] sm:$0xff] %vm1031_vm11, %v5681_v55  ;;  %v5715_v53 = vsel %vm1031_vm11, %v5681_v55, 0.0  ;;  %v5739_v17 = vmul.f32 %v5681_v55, %v5681_v55  ;;  %v5682_v21 = vmul.f32 %v7737_v12, %v5656_v50 }
 0x497   : > { %v7250_v5 = vpop.f32.mrb[25].mxu1  ;;  %v5716_v39 = vadd.f32 %v5715_v53, %v5714_v7 }
 0x498   : > { %v3342_v61 = vpop.f32.mrb[26].mxu1  ;;  %v5759_v62 = vsel %vm1031_vm11, %v5739_v17, 0.0  ;;  %5695 = vst.msk [vmem:[%s8746_s10 + $0x48] sm:$0xff] %vm1031_vm11, %v5682_v21  ;;  %v5717_v20 = vsel %vm1031_vm11, %v5682_v21, 0.0  ;;  %v5740_v31 = vmul.f32 %v5682_v21, %v5682_v21 }
 0x499   : > { %v7251_v3 = vpop.f32.mrb[27].mxu1  ;;  %v5760_v48 = vadd.f32 %v5759_v62, %v5758_v6  ;;  %v5718_v41 = vadd.f32 %v5717_v20, %v5716_v39  ;;  %v5568_v44 = vpop.f32.mrb[20].mxu0 }
 0x49a   : > { %v5761_v38 = vsel %vm1031_vm11, %v5740_v31, 0.0  ;;  %v7738_v58 = vadd.f32 %v5568_v44, %v3331_v26  ;;  %v7714_v35 = vpop.f32.mrb[21].mxu0 }
 0x49b   : > { %v5762_v60 = vadd.f32 %v5761_v38, %v5760_v48  ;;  %v5571_v14 = vpop.f32.mrb[22].mxu0 }
 0x49c   : > { %v5683_v51 = vmul.f32 %v7738_v58, %v5661_v32  ;;  %v7739_v47 = vadd.f32 %v5571_v14, %v3334_v40  ;;  %v7715_v13 = vpop.f32.mrb[23].mxu0 }
 0x49e   : > { %5696 = vst.msk [vmem:[%s8746_s10 + $0x50] sm:$0xff] %vm1031_vm11, %v5683_v51  ;;  %v5719_v27 = vsel %vm1031_vm11, %v5683_v51, 0.0  ;;  %v5741_v4 = vmul.f32 %v5683_v51, %v5683_v51  ;;  %v5684_v8 = vmul.f32 %v7739_v47, %v5666_v15 }
 0x49f   : > { %v5720_v11 = vadd.f32 %v5719_v27, %v5718_v41 }
 0x4a0   : > { %v5763_v42 = vsel %vm1031_vm11, %v5741_v4, 0.0  ;;  %5697 = vst.msk [vmem:[%s8746_s10 + $0x58] sm:$0xff] %vm1031_vm11, %v5684_v8  ;;  %v5721_v16 = vsel %vm1031_vm11, %v5684_v8, 0.0  ;;  %v5742_v10 = vmul.f32 %v5684_v8, %v5684_v8 }
 0x4a1   : > { %v5764_v43 = vadd.f32 %v5763_v42, %v5762_v60  ;;  %v5722_v45 = vadd.f32 %v5721_v16, %v5720_v11  ;;  %v5576_v24 = vpop.f32.mrb[24].mxu0 }
 0x4a2   : > { %v5765_v28 = vsel %vm1031_vm11, %v5742_v10, 0.0  ;;  %v7740_v30 = vadd.f32 %v5576_v24, %v3339_v25  ;;  %v7718_v63 = vpop.f32.mrb[25].mxu0 }
 0x4a3   : > { %v5766_v52 = vadd.f32 %v5765_v28, %v5764_v43  ;;  %v5579_v33 = vpop.f32.mrb[26].mxu0 }
 0x4a4   : > { %v5685_v26 = vmul.f32 %v7740_v30, %v5671_v59  ;;  %v7719_v34 = vpop.f32.mrb[27].mxu0 }
 0x4a6   : > { %5699 = vst.msk [vmem:[%s8746_s10 + $0x60] sm:$0xf] %vm5698_vm1, %v5685_v26  ;;  %v5723_v46 = vsel %vm5698_vm1, %v5685_v26, 0.0  ;;  %v5743_v36 = vmul.f32 %v5685_v26, %v5685_v26 }
 0x4a7   : > { %v5724_v56 = vadd.f32 %v5723_v46, %v5722_v45 }
 0x4a8   : > { %v5767_v2 = vsel %vm5698_vm1, %v5743_v36, 0.0 }
 0x4a9   : > { %v5725_v40 = vrot.slane %v5724_v56, 4  ;;  %v5768_v57 = vadd.f32 %v5767_v2, %v5766_v52 }
 0x4ab   : > { %v5726_v18 = vadd.f32 %v5725_v40, %v5724_v56  ;;  %v5769_v49 = vrot.slane %v5768_v57, 4 }
 0x4ad   : > { %v5727_v22 = vrot.slane %v5726_v18, 2  ;;  %v5770_v37 = vadd.f32 %v5769_v49, %v5768_v57 }
 0x4af   : > { %v5728_v7 = vadd.f32 %v5727_v22, %v5726_v18  ;;  %v5771_v1 = vrot.slane %v5770_v37, 2 }
 0x4b1   : > { %v5729_v9 = vrot.slane %v5728_v7, 1  ;;  %v5772_v0 = vadd.f32 %v5771_v1, %v5770_v37 }
 0x4b3   : > { %v5773_v54 = vrot.slane %v5772_v0, 1  ;;  %v5730_v29 = vadd.f32 %v5729_v9, %v5728_v7 }
 0x4b5   : > { %v5774_v6 = vadd.f32 %v5773_v54, %v5772_v0 }
 0x4b7   : > { %v5777_v55 = vsel %vm3013_vm8, %v5730_v29, %v5774_v6 }
 0x4b8   : > { %v5778_v12 = vadd.f32 %v5777_v55, %v5775_v23 }
 0x4ba   : > { %5780 = vst.msk [vmem:[%s8752_s15] sm:$0x3] %vm5779_vm3, %v5778_v12 }
 0x4bb PF: > { %s17_s25 = sadd.s32 1, %s8647_s25   ;;  %s10849_s21 = smov %s8639_s23 }
 0x4bc   : > { %p14_p11 = scmp.ge.s32.totalorder %s17_s25, 18   ;;  %s10850_s22 = smov %s8643_s24 }
 0x4bd   : > { %s10851_s23 = smov %s10854_s26  ;;  %s10852_s24 = smov %s10858_s27 }
 0x4be   :  { %16 = sbr.rel (!%p14_p11) target bundleno = 3 (0x3), region = 118 }

// kernel: basic_block_pallas.7
= control target key start
LH: loop header
LB: loop body
LE: loop exit
PB: predicated region body
PF: predicated region fallthrough
CT: control target
= control target key end

     0   :  { %s1884_s0 = inlined_call_operand.vmem [shape: f32[800,128], index: 0, kind: input, shape index: {}]   ;;  %s1885_s1 = inlined_call_operand.vmem [shape: f32[1,128], index: 1, kind: input, shape index: {}]   ;;  %s1886_s2 = inlined_call_operand.vmem [shape: f32[1,128], index: 2, kind: input, shape index: {}]   ;;  %s1887_s3 = inlined_call_operand.vmem [shape: f32[800,128], index: 3, kind: input, shape index: {}]   ;;  %s1888_s4 = inlined_call_operand.vmem [shape: f32[800,128], index: 4, kind: output, shape index: {}]  }
   0x1   :  { %v17_v0 = vld [vmem:[%s1884_s0] sm:$0xff]  ;;  %v18_v4 = vld [vmem:[%s1884_s0 + $0x8] sm:$0xff]  ;;  %v19_v7 = vld [vmem:[%s1884_s0 + $0x10] sm:$0xff] }
   0x2   :  { %v770_v1 = vld [vmem:[%s1885_s1] ss:$0 sm:$0xff]  ;;  %v20_v8 = vld [vmem:[%s1884_s0 + $0x18] sm:$0xff]  ;;  %v332_v10 = vld [vmem:[%s1887_s3 + $0x8] sm:$0xff] }
   0x3   :  { %v775_v2 = vld [vmem:[%s1886_s2] ss:$0 sm:$0xff]  ;;  %v124_v3 = vmul.f32 %v770_v1, %v17_v0  ;;  %v125_v6 = vmul.f32 %v770_v1, %v18_v4  ;;  %v126_v11 = vmul.f32 %v770_v1, %v19_v7  ;;  %v333_v12 = vld [vmem:[%s1887_s3 + $0x10] sm:$0xff]  ;;  %v127_v13 = vmul.f32 %v770_v1, %v20_v8  ;;  %v334_v16 = vld [vmem:[%s1887_s3 + $0x18] sm:$0xff] }
   0x4   :  { %v331_v5 = vld [vmem:[%s1887_s3] sm:$0xff]  ;;  %v22_v18 = vld [vmem:[%s1884_s0 + $0x28] sm:$0xff]  ;;  %v23_v19 = vld [vmem:[%s1884_s0 + $0x30] sm:$0xff] }
   0x5   :  { %v231_v9 = vadd.f32 %v775_v2, %v124_v3  ;;  %v21_v14 = vld [vmem:[%s1884_s0 + $0x20] sm:$0xff]  ;;  %v232_v15 = vadd.f32 %v775_v2, %v125_v6  ;;  %v233_v21 = vadd.f32 %v775_v2, %v126_v11  ;;  %v234_v22 = vadd.f32 %v775_v2, %v127_v13  ;;  %v24_v25 = vld [vmem:[%s1884_s0 + $0x38] sm:$0xff]  ;;  %v336_v28 = vld [vmem:[%s1887_s3 + $0x28] sm:$0xff] }
   0x6   :  { %v128_v17 = vmul.f32 %v770_v1, %v21_v14  ;;  %v335_v23 = vld [vmem:[%s1887_s3 + $0x20] sm:$0xff]  ;;  %v129_v24 = vmul.f32 %v770_v1, %v22_v18  ;;  %v130_v29 = vmul.f32 %v770_v1, %v23_v19  ;;  %v131_v30 = vmul.f32 %v770_v1, %v24_v25  ;;  %v337_v36 = vld [vmem:[%s1887_s3 + $0x30] sm:$0xff]  ;;  %v338_v37 = vld [vmem:[%s1887_s3 + $0x38] sm:$0xff] }
   0x7   :  { %v431_v20 = vadd.f32 %v331_v5, %v231_v9  ;;  %v432_v26 = vadd.f32 %v332_v10, %v232_v15  ;;  %v25_v31 = vld [vmem:[%s1884_s0 + $0x40] sm:$0xff]  ;;  %v433_v33 = vadd.f32 %v333_v12, %v233_v21  ;;  %v434_v34 = vadd.f32 %v334_v16, %v234_v22  ;;  %v26_v38 = vld [vmem:[%s1884_s0 + $0x48] sm:$0xff]  ;;  %v27_v43 = vld [vmem:[%s1884_s0 + $0x50] sm:$0xff] }
   0x8   :  { %v235_v27 = vadd.f32 %v775_v2, %v128_v17  ;;  %v236_v35 = vadd.f32 %v775_v2, %v129_v24  ;;  %v237_v41 = vadd.f32 %v775_v2, %v130_v29  ;;  %v238_v42 = vadd.f32 %v775_v2, %v131_v30  ;;  %v28_v44 = vld [vmem:[%s1884_s0 + $0x58] sm:$0xff]  ;;  %v29_v49 = vld [vmem:[%s1884_s0 + $0x60] sm:$0xff]  ;;  %v30_v55 = vld [vmem:[%s1884_s0 + $0x68] sm:$0xff] }
   0x9   :  { %v531_v32 = vmax.f32 %v431_v20, 0.0  ;;  %v532_v39 = vmax.f32 %v432_v26, 0.0  ;;  %v533_v45 = vmax.f32 %v433_v33, 0.0  ;;  %v534_v46 = vmax.f32 %v434_v34, 0.0  ;;  %v339_v53 = vld [vmem:[%s1887_s3 + $0x40] sm:$0xff]  ;;  %v340_v58 = vld [vmem:[%s1887_s3 + $0x48] sm:$0xff] }
   0xa   :  { %v435_v40 = vadd.f32 %v335_v23, %v235_v27  ;;  %v436_v47 = vadd.f32 %v336_v28, %v236_v35  ;;  %v132_v48 = vmul.f32 %v770_v1, %v25_v31  ;;  %v437_v51 = vadd.f32 %v337_v36, %v237_v41  ;;  %v31_v61 = vld [vmem:[%s1884_s0 + $0x70] sm:$0xff]  ;;  %v32_v62 = vld [vmem:[%s1884_s0 + $0x78] sm:$0xff]  ;;  %v343_v10 = vld [vmem:[%s1887_s3 + $0x60] sm:$0xff] }
   0xb   :  { %631 = vst [vmem:[%s1888_s4] sm:$0xff] %v531_v32  ;;  %632 = vst [vmem:[%s1888_s4 + $0x8] sm:$0xff] %v532_v39  ;;  %v438_v52 = vadd.f32 %v338_v37, %v238_v42  ;;  %v133_v54 = vmul.f32 %v770_v1, %v26_v38  ;;  %v134_v59 = vmul.f32 %v770_v1, %v27_v43  ;;  %v341_v4 = vld [vmem:[%s1887_s3 + $0x50] sm:$0xff]  ;;  %v342_v5 = vld [vmem:[%s1887_s3 + $0x58] sm:$0xff] }
   0xc   :  { %v535_v50 = vmax.f32 %v435_v40, 0.0  ;;  %633 = vst [vmem:[%s1888_s4 + $0x10] sm:$0xff] %v533_v45  ;;  %634 = vst [vmem:[%s1888_s4 + $0x18] sm:$0xff] %v534_v46  ;;  %v536_v56 = vmax.f32 %v436_v47, 0.0  ;;  %v239_v57 = vadd.f32 %v775_v2, %v132_v48  ;;  %v135_v60 = vmul.f32 %v770_v1, %v28_v44  ;;  %v344_v14 = vld [vmem:[%s1887_s3 + $0x68] sm:$0xff]  ;;  %v33_v17 = vld [vmem:[%s1884_s0 + $0x80] sm:$0xff] }
   0xd   :  { %v537_v63 = vmax.f32 %v437_v51, 0.0  ;;  %v538_v0 = vmax.f32 %v438_v52, 0.0  ;;  %v240_v3 = vadd.f32 %v775_v2, %v133_v54  ;;  %v136_v6 = vmul.f32 %v770_v1, %v29_v49  ;;  %v345_v22 = vld [vmem:[%s1887_s3 + $0x70] sm:$0xff]  ;;  %v346_v23 = vld [vmem:[%s1887_s3 + $0x78] sm:$0xff]  ;;  %v34_v24 = vld [vmem:[%s1884_s0 + $0x88] sm:$0xff] }
   0xe   :  { %635 = vst [vmem:[%s1888_s4 + $0x20] sm:$0xff] %v535_v50  ;;  %636 = vst [vmem:[%s1888_s4 + $0x28] sm:$0xff] %v536_v56  ;;  %v439_v7 = vadd.f32 %v339_v53, %v239_v57  ;;  %v241_v8 = vadd.f32 %v775_v2, %v134_v59  ;;  %v242_v9 = vadd.f32 %v775_v2, %v135_v60  ;;  %v35_v29 = vld [vmem:[%s1884_s0 + $0x90] sm:$0xff]  ;;  %v36_v30 = vld [vmem:[%s1884_s0 + $0x98] sm:$0xff] }
   0xf   :  { %v137_v11 = vmul.f32 %v770_v1, %v30_v55  ;;  %637 = vst [vmem:[%s1888_s4 + $0x30] sm:$0xff] %v537_v63  ;;  %638 = vst [vmem:[%s1888_s4 + $0x38] sm:$0xff] %v538_v0  ;;  %v440_v12 = vadd.f32 %v340_v58, %v240_v3  ;;  %v243_v13 = vadd.f32 %v775_v2, %v136_v6  ;;  %v37_v35 = vld [vmem:[%s1884_s0 + $0xa0] sm:$0xff]  ;;  %v38_v41 = vld [vmem:[%s1884_s0 + $0xa8] sm:$0xff] }
  0x10   :  { %v138_v15 = vmul.f32 %v770_v1, %v31_v61  ;;  %v139_v16 = vmul.f32 %v770_v1, %v32_v62  ;;  %v539_v18 = vmax.f32 %v439_v7, 0.0  ;;  %v441_v19 = vadd.f32 %v341_v4, %v241_v8  ;;  %v347_v39 = vld [vmem:[%s1887_s3 + $0x80] sm:$0xff]  ;;  %v348_v44 = vld [vmem:[%s1887_s3 + $0x88] sm:$0xff]  ;;  %v39_v47 = vld [vmem:[%s1884_s0 + $0xb0] sm:$0xff] }
  0x11   :  { %v442_v20 = vadd.f32 %v342_v5, %v242_v9  ;;  %v244_v21 = vadd.f32 %v775_v2, %v137_v11  ;;  %v540_v25 = vmax.f32 %v440_v12, 0.0  ;;  %v443_v26 = vadd.f32 %v343_v10, %v243_v13  ;;  %v40_v48 = vld [vmem:[%s1884_s0 + $0xb8] sm:$0xff]  ;;  %v349_v52 = vld [vmem:[%s1887_s3 + $0x90] sm:$0xff]  ;;  %v351_v58 = vld [vmem:[%s1887_s3 + $0xa0] sm:$0xff] }
  0x12   :  { %v245_v27 = vadd.f32 %v775_v2, %v138_v15  ;;  %v246_v28 = vadd.f32 %v775_v2, %v139_v16  ;;  %639 = vst [vmem:[%s1888_s4 + $0x40] sm:$0xff] %v539_v18  ;;  %v541_v31 = vmax.f32 %v441_v19, 0.0  ;;  %v140_v34 = vmul.f32 %v770_v1, %v33_v17  ;;  %v350_v53 = vld [vmem:[%s1887_s3 + $0x98] sm:$0xff]  ;;  %v352_v62 = vld [vmem:[%s1887_s3 + $0xa8] sm:$0xff]  ;;  %v41_v3 = vld [vmem:[%s1884_s0 + $0xc0] sm:$0xff] }
  0x13   :  { %v542_v32 = vmax.f32 %v442_v20, 0.0  ;;  %v444_v33 = vadd.f32 %v344_v14, %v244_v21  ;;  %640 = vst [vmem:[%s1888_s4 + $0x48] sm:$0xff] %v540_v25  ;;  %v543_v36 = vmax.f32 %v443_v26, 0.0  ;;  %v141_v40 = vmul.f32 %v770_v1, %v34_v24  ;;  %v353_v8 = vld [vmem:[%s1887_s3 + $0xb0] sm:$0xff]  ;;  %v354_v9 = vld [vmem:[%s1887_s3 + $0xb8] sm:$0xff]  ;;  %v42_v10 = vld [vmem:[%s1884_s0 + $0xc8] sm:$0xff] }
  0x14   :  { %v445_v37 = vadd.f32 %v345_v22, %v245_v27  ;;  %v446_v38 = vadd.f32 %v346_v23, %v246_v28  ;;  %641 = vst [vmem:[%s1888_s4 + $0x50] sm:$0xff] %v541_v31  ;;  %v247_v43 = vadd.f32 %v775_v2, %v140_v34  ;;  %v142_v45 = vmul.f32 %v770_v1, %v35_v29  ;;  %v43_v15 = vld [vmem:[%s1884_s0 + $0xd0] sm:$0xff]  ;;  %v44_v16 = vld [vmem:[%s1884_s0 + $0xd8] sm:$0xff]  ;;  %v45_v21 = vld [vmem:[%s1884_s0 + $0xe0] sm:$0xff] }
  0x15   :  { %642 = vst [vmem:[%s1888_s4 + $0x58] sm:$0xff] %v542_v32  ;;  %v544_v42 = vmax.f32 %v444_v33, 0.0  ;;  %v143_v46 = vmul.f32 %v770_v1, %v36_v30  ;;  %643 = vst [vmem:[%s1888_s4 + $0x60] sm:$0xff] %v543_v36  ;;  %v248_v51 = vadd.f32 %v775_v2, %v141_v40  ;;  %v144_v54 = vmul.f32 %v770_v1, %v37_v35  ;;  %v355_v25 = vld [vmem:[%s1887_s3 + $0xc0] sm:$0xff]  ;;  %v46_v27 = vld [vmem:[%s1884_s0 + $0xe8] sm:$0xff] }
  0x16   :  { %v545_v49 = vmax.f32 %v445_v37, 0.0  ;;  %v546_v50 = vmax.f32 %v446_v38, 0.0  ;;  %v447_v55 = vadd.f32 %v347_v39, %v247_v43  ;;  %v249_v56 = vadd.f32 %v775_v2, %v142_v45  ;;  %v356_v30 = vld [vmem:[%s1887_s3 + $0xc8] sm:$0xff]  ;;  %v47_v33 = vld [vmem:[%s1884_s0 + $0xf0] sm:$0xff]  ;;  %v48_v34 = vld [vmem:[%s1884_s0 + $0xf8] sm:$0xff] }
  0x17   :  { %644 = vst [vmem:[%s1888_s4 + $0x68] sm:$0xff] %v544_v42  ;;  %v250_v57 = vadd.f32 %v775_v2, %v143_v46  ;;  %v145_v59 = vmul.f32 %v770_v1, %v38_v41  ;;  %v448_v60 = vadd.f32 %v348_v44, %v248_v51  ;;  %v251_v61 = vadd.f32 %v775_v2, %v144_v54  ;;  %v357_v38 = vld [vmem:[%s1887_s3 + $0xd0] sm:$0xff]  ;;  %v358_v39 = vld [vmem:[%s1887_s3 + $0xd8] sm:$0xff]  ;;  %v359_v44 = vld [vmem:[%s1887_s3 + $0xe0] sm:$0xff] }
  0x18   :  { %645 = vst [vmem:[%s1888_s4 + $0x70] sm:$0xff] %v545_v49  ;;  %646 = vst [vmem:[%s1888_s4 + $0x78] sm:$0xff] %v546_v50  ;;  %v146_v63 = vmul.f32 %v770_v1, %v39_v47  ;;  %v147_v0 = vmul.f32 %v770_v1, %v40_v48  ;;  %v547_v4 = vmax.f32 %v447_v55, 0.0  ;;  %v449_v5 = vadd.f32 %v349_v52, %v249_v56  ;;  %v360_v48 = vld [vmem:[%s1887_s3 + $0xe8] sm:$0xff]  ;;  %v49_v51 = vld [vmem:[%s1884_s0 + $0x100] sm:$0xff] }
  0x19   :  { %v450_v6 = vadd.f32 %v350_v53, %v250_v57  ;;  %v252_v7 = vadd.f32 %v775_v2, %v145_v59  ;;  %v548_v11 = vmax.f32 %v448_v60, 0.0  ;;  %v451_v12 = vadd.f32 %v351_v58, %v251_v61  ;;  %v361_v56 = vld [vmem:[%s1887_s3 + $0xf0] sm:$0xff]  ;;  %v362_v57 = vld [vmem:[%s1887_s3 + $0xf8] sm:$0xff]  ;;  %v50_v58 = vld [vmem:[%s1884_s0 + $0x108] sm:$0xff] }
  0x1a   :  { %v253_v13 = vadd.f32 %v775_v2, %v146_v63  ;;  %v254_v14 = vadd.f32 %v775_v2, %v147_v0  ;;  %647 = vst [vmem:[%s1888_s4 + $0x80] sm:$0xff] %v547_v4  ;;  %v549_v17 = vmax.f32 %v449_v5, 0.0  ;;  %v148_v20 = vmul.f32 %v770_v1, %v41_v3  ;;  %v51_v63 = vld [vmem:[%s1884_s0 + $0x110] sm:$0xff]  ;;  %v52_v0 = vld [vmem:[%s1884_s0 + $0x118] sm:$0xff] }
  0x1b   :  { %v550_v18 = vmax.f32 %v450_v6, 0.0  ;;  %v452_v19 = vadd.f32 %v352_v62, %v252_v7  ;;  %648 = vst [vmem:[%s1888_s4 + $0x88] sm:$0xff] %v548_v11  ;;  %v551_v22 = vmax.f32 %v451_v12, 0.0  ;;  %v149_v26 = vmul.f32 %v770_v1, %v42_v10  ;;  %v53_v7 = vld [vmem:[%s1884_s0 + $0x120] sm:$0xff] }
  0x1c   :  { %v453_v23 = vadd.f32 %v353_v8, %v253_v13  ;;  %v454_v24 = vadd.f32 %v354_v9, %v254_v14  ;;  %649 = vst [vmem:[%s1888_s4 + $0x90] sm:$0xff] %v549_v17  ;;  %v255_v29 = vadd.f32 %v775_v2, %v148_v20  ;;  %v150_v31 = vmul.f32 %v770_v1, %v43_v15  ;;  %v363_v11 = vld [vmem:[%s1887_s3 + $0x100] sm:$0xff]  ;;  %v54_v13 = vld [vmem:[%s1884_s0 + $0x128] sm:$0xff]  ;;  %v56_v20 = vld [vmem:[%s1884_s0 + $0x138] sm:$0xff] }
  0x1d   :  { %650 = vst [vmem:[%s1888_s4 + $0x98] sm:$0xff] %v550_v18  ;;  %v552_v28 = vmax.f32 %v452_v19, 0.0  ;;  %v151_v32 = vmul.f32 %v770_v1, %v44_v16  ;;  %651 = vst [vmem:[%s1888_s4 + $0xa0] sm:$0xff] %v551_v22  ;;  %v256_v37 = vadd.f32 %v775_v2, %v149_v26  ;;  %v152_v40 = vmul.f32 %v770_v1, %v45_v21  ;;  %v364_v16 = vld [vmem:[%s1887_s3 + $0x108] sm:$0xff]  ;;  %v55_v19 = vld [vmem:[%s1884_s0 + $0x130] sm:$0xff] }
  0x1e   :  { %v553_v35 = vmax.f32 %v453_v23, 0.0  ;;  %v554_v36 = vmax.f32 %v454_v24, 0.0  ;;  %v455_v41 = vadd.f32 %v355_v25, %v255_v29  ;;  %v257_v42 = vadd.f32 %v775_v2, %v150_v31  ;;  %v365_v24 = vld [vmem:[%s1887_s3 + $0x110] sm:$0xff]  ;;  %v366_v25 = vld [vmem:[%s1887_s3 + $0x118] sm:$0xff] }
  0x1f   :  { %652 = vst [vmem:[%s1888_s4 + $0xa8] sm:$0xff] %v552_v28  ;;  %v258_v43 = vadd.f32 %v775_v2, %v151_v32  ;;  %v153_v45 = vmul.f32 %v770_v1, %v46_v27  ;;  %v456_v46 = vadd.f32 %v356_v30, %v256_v37  ;;  %v259_v47 = vadd.f32 %v775_v2, %v152_v40  ;;  %v367_v30 = vld [vmem:[%s1887_s3 + $0x120] sm:$0xff] }
  0x20   :  { %653 = vst [vmem:[%s1888_s4 + $0xb0] sm:$0xff] %v553_v35  ;;  %654 = vst [vmem:[%s1888_s4 + $0xb8] sm:$0xff] %v554_v36  ;;  %v154_v49 = vmul.f32 %v770_v1, %v47_v33  ;;  %v155_v50 = vmul.f32 %v770_v1, %v48_v34  ;;  %v555_v52 = vmax.f32 %v455_v41, 0.0  ;;  %v457_v53 = vadd.f32 %v357_v38, %v257_v42  ;;  %v368_v34 = vld [vmem:[%s1887_s3 + $0x128] sm:$0xff]  ;;  %v57_v37 = vld [vmem:[%s1884_s0 + $0x140] sm:$0xff] }
  0x21   :  { %v458_v54 = vadd.f32 %v358_v39, %v258_v43  ;;  %v260_v55 = vadd.f32 %v775_v2, %v153_v45  ;;  %v556_v59 = vmax.f32 %v456_v46, 0.0  ;;  %v459_v60 = vadd.f32 %v359_v44, %v259_v47  ;;  %v369_v42 = vld [vmem:[%s1887_s3 + $0x130] sm:$0xff]  ;;  %v370_v43 = vld [vmem:[%s1887_s3 + $0x138] sm:$0xff]  ;;  %v58_v44 = vld [vmem:[%s1884_s0 + $0x148] sm:$0xff] }
  0x22   :  { %v261_v61 = vadd.f32 %v775_v2, %v154_v49  ;;  %v262_v62 = vadd.f32 %v775_v2, %v155_v50  ;;  %655 = vst [vmem:[%s1888_s4 + $0xc0] sm:$0xff] %v555_v52  ;;  %v557_v3 = vmax.f32 %v457_v53, 0.0  ;;  %v156_v6 = vmul.f32 %v770_v1, %v49_v51  ;;  %v59_v49 = vld [vmem:[%s1884_s0 + $0x150] sm:$0xff]  ;;  %v60_v50 = vld [vmem:[%s1884_s0 + $0x158] sm:$0xff] }
  0x23   :  { %v558_v4 = vmax.f32 %v458_v54, 0.0  ;;  %v460_v5 = vadd.f32 %v360_v48, %v260_v55  ;;  %656 = vst [vmem:[%s1888_s4 + $0xc8] sm:$0xff] %v556_v59  ;;  %v559_v8 = vmax.f32 %v459_v60, 0.0  ;;  %v157_v12 = vmul.f32 %v770_v1, %v50_v58  ;;  %v61_v55 = vld [vmem:[%s1884_s0 + $0x160] sm:$0xff] }
  0x24   :  { %v461_v9 = vadd.f32 %v361_v56, %v261_v61  ;;  %v462_v10 = vadd.f32 %v362_v57, %v262_v62  ;;  %657 = vst [vmem:[%s1888_s4 + $0xd0] sm:$0xff] %v557_v3  ;;  %v263_v15 = vadd.f32 %v775_v2, %v156_v6  ;;  %v158_v17 = vmul.f32 %v770_v1, %v51_v63  ;;  %v371_v59 = vld [vmem:[%s1887_s3 + $0x140] sm:$0xff]  ;;  %v62_v61 = vld [vmem:[%s1884_s0 + $0x168] sm:$0xff]  ;;  %v64_v6 = vld [vmem:[%s1884_s0 + $0x178] sm:$0xff] }
  0x25   :  { %658 = vst [vmem:[%s1888_s4 + $0xd8] sm:$0xff] %v558_v4  ;;  %v560_v14 = vmax.f32 %v460_v5, 0.0  ;;  %v159_v18 = vmul.f32 %v770_v1, %v52_v0  ;;  %659 = vst [vmem:[%s1888_s4 + $0xe0] sm:$0xff] %v559_v8  ;;  %v264_v23 = vadd.f32 %v775_v2, %v157_v12  ;;  %v160_v26 = vmul.f32 %v770_v1, %v53_v7  ;;  %v372_v0 = vld [vmem:[%s1887_s3 + $0x148] sm:$0xff]  ;;  %v63_v5 = vld [vmem:[%s1884_s0 + $0x170] sm:$0xff] }
  0x26   :  { %v561_v21 = vmax.f32 %v461_v9, 0.0  ;;  %v562_v22 = vmax.f32 %v462_v10, 0.0  ;;  %v463_v27 = vadd.f32 %v363_v11, %v263_v15  ;;  %v265_v28 = vadd.f32 %v775_v2, %v158_v17  ;;  %v373_v10 = vld [vmem:[%s1887_s3 + $0x150] sm:$0xff]  ;;  %v374_v11 = vld [vmem:[%s1887_s3 + $0x158] sm:$0xff] }
  0x27   :  { %660 = vst [vmem:[%s1888_s4 + $0xe8] sm:$0xff] %v560_v14  ;;  %v266_v29 = vadd.f32 %v775_v2, %v159_v18  ;;  %v161_v31 = vmul.f32 %v770_v1, %v54_v13  ;;  %v464_v32 = vadd.f32 %v364_v16, %v264_v23  ;;  %v267_v33 = vadd.f32 %v775_v2, %v160_v26  ;;  %v375_v16 = vld [vmem:[%s1887_s3 + $0x160] sm:$0xff] }
  0x28   :  { %661 = vst [vmem:[%s1888_s4 + $0xf0] sm:$0xff] %v561_v21  ;;  %662 = vst [vmem:[%s1888_s4 + $0xf8] sm:$0xff] %v562_v22  ;;  %v162_v35 = vmul.f32 %v770_v1, %v55_v19  ;;  %v163_v36 = vmul.f32 %v770_v1, %v56_v20  ;;  %v563_v38 = vmax.f32 %v463_v27, 0.0  ;;  %v465_v39 = vadd.f32 %v365_v24, %v265_v28  ;;  %v376_v20 = vld [vmem:[%s1887_s3 + $0x168] sm:$0xff]  ;;  %v65_v23 = vld [vmem:[%s1884_s0 + $0x180] sm:$0xff] }
  0x29   :  { %v466_v40 = vadd.f32 %v366_v25, %v266_v29  ;;  %v268_v41 = vadd.f32 %v775_v2, %v161_v31  ;;  %v564_v45 = vmax.f32 %v464_v32, 0.0  ;;  %v467_v46 = vadd.f32 %v367_v30, %v267_v33  ;;  %v377_v28 = vld [vmem:[%s1887_s3 + $0x170] sm:$0xff]  ;;  %v378_v29 = vld [vmem:[%s1887_s3 + $0x178] sm:$0xff]  ;;  %v66_v30 = vld [vmem:[%s1884_s0 + $0x188] sm:$0xff] }
  0x2a   :  { %v269_v47 = vadd.f32 %v775_v2, %v162_v35  ;;  %v270_v48 = vadd.f32 %v775_v2, %v163_v36  ;;  %663 = vst [vmem:[%s1888_s4 + $0x100] sm:$0xff] %v563_v38  ;;  %v565_v51 = vmax.f32 %v465_v39, 0.0  ;;  %v164_v54 = vmul.f32 %v770_v1, %v57_v37  ;;  %v67_v35 = vld [vmem:[%s1884_s0 + $0x190] sm:$0xff]  ;;  %v68_v36 = vld [vmem:[%s1884_s0 + $0x198] sm:$0xff] }
  0x2b   :  { %v566_v52 = vmax.f32 %v466_v40, 0.0  ;;  %v468_v53 = vadd.f32 %v368_v34, %v268_v41  ;;  %664 = vst [vmem:[%s1888_s4 + $0x108] sm:$0xff] %v564_v45  ;;  %v567_v56 = vmax.f32 %v467_v46, 0.0  ;;  %v165_v60 = vmul.f32 %v770_v1, %v58_v44  ;;  %v69_v41 = vld [vmem:[%s1884_s0 + $0x1a0] sm:$0xff] }
  0x2c   :  { %v469_v57 = vadd.f32 %v369_v42, %v269_v47  ;;  %v470_v58 = vadd.f32 %v370_v43, %v270_v48  ;;  %665 = vst [vmem:[%s1888_s4 + $0x110] sm:$0xff] %v565_v51  ;;  %v271_v63 = vadd.f32 %v775_v2, %v164_v54  ;;  %v166_v3 = vmul.f32 %v770_v1, %v59_v49  ;;  %v379_v45 = vld [vmem:[%s1887_s3 + $0x180] sm:$0xff]  ;;  %v70_v47 = vld [vmem:[%s1884_s0 + $0x1a8] sm:$0xff]  ;;  %v72_v54 = vld [vmem:[%s1884_s0 + $0x1b8] sm:$0xff] }
  0x2d   :  { %666 = vst [vmem:[%s1888_s4 + $0x118] sm:$0xff] %v566_v52  ;;  %v568_v62 = vmax.f32 %v468_v53, 0.0  ;;  %v167_v4 = vmul.f32 %v770_v1, %v60_v50  ;;  %667 = vst [vmem:[%s1888_s4 + $0x120] sm:$0xff] %v567_v56  ;;  %v272_v9 = vadd.f32 %v775_v2, %v165_v60  ;;  %v168_v12 = vmul.f32 %v770_v1, %v61_v55  ;;  %v380_v50 = vld [vmem:[%s1887_s3 + $0x188] sm:$0xff]  ;;  %v71_v53 = vld [vmem:[%s1884_s0 + $0x1b0] sm:$0xff] }
  0x2e   :  { %v569_v7 = vmax.f32 %v469_v57, 0.0  ;;  %v570_v8 = vmax.f32 %v470_v58, 0.0  ;;  %v471_v13 = vadd.f32 %v371_v59, %v271_v63  ;;  %v273_v14 = vadd.f32 %v775_v2, %v166_v3  ;;  %v381_v58 = vld [vmem:[%s1887_s3 + $0x190] sm:$0xff]  ;;  %v382_v59 = vld [vmem:[%s1887_s3 + $0x198] sm:$0xff] }
  0x2f   :  { %668 = vst [vmem:[%s1888_s4 + $0x128] sm:$0xff] %v568_v62  ;;  %v274_v15 = vadd.f32 %v775_v2, %v167_v4  ;;  %v169_v17 = vmul.f32 %v770_v1, %v62_v61  ;;  %v472_v18 = vadd.f32 %v372_v0, %v272_v9  ;;  %v275_v19 = vadd.f32 %v775_v2, %v168_v12  ;;  %v383_v0 = vld [vmem:[%s1887_s3 + $0x1a0] sm:$0xff] }
  0x30   :  { %669 = vst [vmem:[%s1888_s4 + $0x130] sm:$0xff] %v569_v7  ;;  %670 = vst [vmem:[%s1888_s4 + $0x138] sm:$0xff] %v570_v8  ;;  %v170_v21 = vmul.f32 %v770_v1, %v63_v5  ;;  %v171_v22 = vmul.f32 %v770_v1, %v64_v6  ;;  %v571_v24 = vmax.f32 %v471_v13, 0.0  ;;  %v473_v25 = vadd.f32 %v373_v10, %v273_v14  ;;  %v384_v6 = vld [vmem:[%s1887_s3 + $0x1a8] sm:$0xff]  ;;  %v73_v9 = vld [vmem:[%s1884_s0 + $0x1c0] sm:$0xff] }
  0x31   :  { %v474_v26 = vadd.f32 %v374_v11, %v274_v15  ;;  %v276_v27 = vadd.f32 %v775_v2, %v169_v17  ;;  %v572_v31 = vmax.f32 %v472_v18, 0.0  ;;  %v475_v32 = vadd.f32 %v375_v16, %v275_v19  ;;  %v385_v14 = vld [vmem:[%s1887_s3 + $0x1b0] sm:$0xff]  ;;  %v386_v15 = vld [vmem:[%s1887_s3 + $0x1b8] sm:$0xff]  ;;  %v74_v16 = vld [vmem:[%s1884_s0 + $0x1c8] sm:$0xff] }
  0x32   :  { %v277_v33 = vadd.f32 %v775_v2, %v170_v21  ;;  %v278_v34 = vadd.f32 %v775_v2, %v171_v22  ;;  %671 = vst [vmem:[%s1888_s4 + $0x140] sm:$0xff] %v571_v24  ;;  %v573_v37 = vmax.f32 %v473_v25, 0.0  ;;  %v172_v40 = vmul.f32 %v770_v1, %v65_v23  ;;  %v75_v21 = vld [vmem:[%s1884_s0 + $0x1d0] sm:$0xff]  ;;  %v76_v22 = vld [vmem:[%s1884_s0 + $0x1d8] sm:$0xff] }
  0x33   :  { %v574_v38 = vmax.f32 %v474_v26, 0.0  ;;  %v476_v39 = vadd.f32 %v376_v20, %v276_v27  ;;  %672 = vst [vmem:[%s1888_s4 + $0x148] sm:$0xff] %v572_v31  ;;  %v575_v42 = vmax.f32 %v475_v32, 0.0  ;;  %v173_v46 = vmul.f32 %v770_v1, %v66_v30  ;;  %v77_v27 = vld [vmem:[%s1884_s0 + $0x1e0] sm:$0xff] }
  0x34   :  { %v477_v43 = vadd.f32 %v377_v28, %v277_v33  ;;  %v478_v44 = vadd.f32 %v378_v29, %v278_v34  ;;  %673 = vst [vmem:[%s1888_s4 + $0x150] sm:$0xff] %v573_v37  ;;  %v279_v49 = vadd.f32 %v775_v2, %v172_v40  ;;  %v174_v51 = vmul.f32 %v770_v1, %v67_v35  ;;  %v387_v31 = vld [vmem:[%s1887_s3 + $0x1c0] sm:$0xff]  ;;  %v78_v33 = vld [vmem:[%s1884_s0 + $0x1e8] sm:$0xff]  ;;  %v80_v40 = vld [vmem:[%s1884_s0 + $0x1f8] sm:$0xff] }
  0x35   :  { %674 = vst [vmem:[%s1888_s4 + $0x158] sm:$0xff] %v574_v38  ;;  %v576_v48 = vmax.f32 %v476_v39, 0.0  ;;  %v175_v52 = vmul.f32 %v770_v1, %v68_v36  ;;  %675 = vst [vmem:[%s1888_s4 + $0x160] sm:$0xff] %v575_v42  ;;  %v280_v57 = vadd.f32 %v775_v2, %v173_v46  ;;  %v176_v60 = vmul.f32 %v770_v1, %v69_v41  ;;  %v388_v36 = vld [vmem:[%s1887_s3 + $0x1c8] sm:$0xff]  ;;  %v79_v39 = vld [vmem:[%s1884_s0 + $0x1f0] sm:$0xff] }
  0x36   :  { %v577_v55 = vmax.f32 %v477_v43, 0.0  ;;  %v578_v56 = vmax.f32 %v478_v44, 0.0  ;;  %v479_v61 = vadd.f32 %v379_v45, %v279_v49  ;;  %v281_v62 = vadd.f32 %v775_v2, %v174_v51  ;;  %v389_v44 = vld [vmem:[%s1887_s3 + $0x1d0] sm:$0xff]  ;;  %v390_v45 = vld [vmem:[%s1887_s3 + $0x1d8] sm:$0xff] }
  0x37   :  { %676 = vst [vmem:[%s1888_s4 + $0x168] sm:$0xff] %v576_v48  ;;  %v282_v63 = vadd.f32 %v775_v2, %v175_v52  ;;  %v177_v3 = vmul.f32 %v770_v1, %v70_v47  ;;  %v480_v4 = vadd.f32 %v380_v50, %v280_v57  ;;  %v283_v5 = vadd.f32 %v775_v2, %v176_v60  ;;  %v391_v50 = vld [vmem:[%s1887_s3 + $0x1e0] sm:$0xff] }
  0x38   :  { %677 = vst [vmem:[%s1888_s4 + $0x170] sm:$0xff] %v577_v55  ;;  %678 = vst [vmem:[%s1888_s4 + $0x178] sm:$0xff] %v578_v56  ;;  %v178_v7 = vmul.f32 %v770_v1, %v71_v53  ;;  %v179_v8 = vmul.f32 %v770_v1, %v72_v54  ;;  %v579_v10 = vmax.f32 %v479_v61, 0.0  ;;  %v481_v11 = vadd.f32 %v381_v58, %v281_v62  ;;  %v392_v54 = vld [vmem:[%s1887_s3 + $0x1e8] sm:$0xff]  ;;  %v81_v57 = vld [vmem:[%s1884_s0 + $0x200] sm:$0xff] }
  0x39   :  { %v482_v12 = vadd.f32 %v382_v59, %v282_v63  ;;  %v284_v13 = vadd.f32 %v775_v2, %v177_v3  ;;  %v580_v17 = vmax.f32 %v480_v4, 0.0  ;;  %v483_v18 = vadd.f32 %v383_v0, %v283_v5  ;;  %v393_v62 = vld [vmem:[%s1887_s3 + $0x1f0] sm:$0xff]  ;;  %v394_v63 = vld [vmem:[%s1887_s3 + $0x1f8] sm:$0xff]  ;;  %v82_v0 = vld [vmem:[%s1884_s0 + $0x208] sm:$0xff] }
  0x3a   :  { %v285_v19 = vadd.f32 %v775_v2, %v178_v7  ;;  %v286_v20 = vadd.f32 %v775_v2, %v179_v8  ;;  %679 = vst [vmem:[%s1888_s4 + $0x180] sm:$0xff] %v579_v10  ;;  %v581_v23 = vmax.f32 %v481_v11, 0.0  ;;  %v180_v26 = vmul.f32 %v770_v1, %v73_v9  ;;  %v83_v7 = vld [vmem:[%s1884_s0 + $0x210] sm:$0xff]  ;;  %v84_v8 = vld [vmem:[%s1884_s0 + $0x218] sm:$0xff] }
  0x3b   :  { %v582_v24 = vmax.f32 %v482_v12, 0.0  ;;  %v484_v25 = vadd.f32 %v384_v6, %v284_v13  ;;  %680 = vst [vmem:[%s1888_s4 + $0x188] sm:$0xff] %v580_v17  ;;  %v583_v28 = vmax.f32 %v483_v18, 0.0  ;;  %v181_v32 = vmul.f32 %v770_v1, %v74_v16  ;;  %v85_v13 = vld [vmem:[%s1884_s0 + $0x220] sm:$0xff] }
  0x3c   :  { %v485_v29 = vadd.f32 %v385_v14, %v285_v19  ;;  %v486_v30 = vadd.f32 %v386_v15, %v286_v20  ;;  %681 = vst [vmem:[%s1888_s4 + $0x190] sm:$0xff] %v581_v23  ;;  %v287_v35 = vadd.f32 %v775_v2, %v180_v26  ;;  %v182_v37 = vmul.f32 %v770_v1, %v75_v21  ;;  %v395_v17 = vld [vmem:[%s1887_s3 + $0x200] sm:$0xff]  ;;  %v86_v19 = vld [vmem:[%s1884_s0 + $0x228] sm:$0xff]  ;;  %v88_v26 = vld [vmem:[%s1884_s0 + $0x238] sm:$0xff] }
  0x3d   :  { %682 = vst [vmem:[%s1888_s4 + $0x198] sm:$0xff] %v582_v24  ;;  %v584_v34 = vmax.f32 %v484_v25, 0.0  ;;  %v183_v38 = vmul.f32 %v770_v1, %v76_v22  ;;  %683 = vst [vmem:[%s1888_s4 + $0x1a0] sm:$0xff] %v583_v28  ;;  %v288_v43 = vadd.f32 %v775_v2, %v181_v32  ;;  %v184_v46 = vmul.f32 %v770_v1, %v77_v27  ;;  %v396_v22 = vld [vmem:[%s1887_s3 + $0x208] sm:$0xff]  ;;  %v87_v25 = vld [vmem:[%s1884_s0 + $0x230] sm:$0xff] }
  0x3e   :  { %v585_v41 = vmax.f32 %v485_v29, 0.0  ;;  %v586_v42 = vmax.f32 %v486_v30, 0.0  ;;  %v487_v47 = vadd.f32 %v387_v31, %v287_v35  ;;  %v289_v48 = vadd.f32 %v775_v2, %v182_v37  ;;  %v397_v30 = vld [vmem:[%s1887_s3 + $0x210] sm:$0xff]  ;;  %v398_v31 = vld [vmem:[%s1887_s3 + $0x218] sm:$0xff] }
  0x3f   :  { %684 = vst [vmem:[%s1888_s4 + $0x1a8] sm:$0xff] %v584_v34  ;;  %v290_v49 = vadd.f32 %v775_v2, %v183_v38  ;;  %v185_v51 = vmul.f32 %v770_v1, %v78_v33  ;;  %v488_v52 = vadd.f32 %v388_v36, %v288_v43  ;;  %v291_v53 = vadd.f32 %v775_v2, %v184_v46  ;;  %v399_v36 = vld [vmem:[%s1887_s3 + $0x220] sm:$0xff] }
  0x40   :  { %685 = vst [vmem:[%s1888_s4 + $0x1b0] sm:$0xff] %v585_v41  ;;  %686 = vst [vmem:[%s1888_s4 + $0x1b8] sm:$0xff] %v586_v42  ;;  %v186_v55 = vmul.f32 %v770_v1, %v79_v39  ;;  %v187_v56 = vmul.f32 %v770_v1, %v80_v40  ;;  %v587_v58 = vmax.f32 %v487_v47, 0.0  ;;  %v489_v59 = vadd.f32 %v389_v44, %v289_v48  ;;  %v400_v40 = vld [vmem:[%s1887_s3 + $0x228] sm:$0xff]  ;;  %v89_v43 = vld [vmem:[%s1884_s0 + $0x240] sm:$0xff] }
  0x41   :  { %v490_v60 = vadd.f32 %v390_v45, %v290_v49  ;;  %v292_v61 = vadd.f32 %v775_v2, %v185_v51  ;;  %v588_v3 = vmax.f32 %v488_v52, 0.0  ;;  %v491_v4 = vadd.f32 %v391_v50, %v291_v53  ;;  %v401_v48 = vld [vmem:[%s1887_s3 + $0x230] sm:$0xff]  ;;  %v402_v49 = vld [vmem:[%s1887_s3 + $0x238] sm:$0xff]  ;;  %v90_v50 = vld [vmem:[%s1884_s0 + $0x248] sm:$0xff] }
  0x42   :  { %v293_v5 = vadd.f32 %v775_v2, %v186_v55  ;;  %v294_v6 = vadd.f32 %v775_v2, %v187_v56  ;;  %687 = vst [vmem:[%s1888_s4 + $0x1c0] sm:$0xff] %v587_v58  ;;  %v589_v9 = vmax.f32 %v489_v59, 0.0  ;;  %v188_v12 = vmul.f32 %v770_v1, %v81_v57  ;;  %v91_v55 = vld [vmem:[%s1884_s0 + $0x250] sm:$0xff]  ;;  %v92_v56 = vld [vmem:[%s1884_s0 + $0x258] sm:$0xff] }
  0x43   :  { %v590_v10 = vmax.f32 %v490_v60, 0.0  ;;  %v492_v11 = vadd.f32 %v392_v54, %v292_v61  ;;  %688 = vst [vmem:[%s1888_s4 + $0x1c8] sm:$0xff] %v588_v3  ;;  %v591_v14 = vmax.f32 %v491_v4, 0.0  ;;  %v189_v18 = vmul.f32 %v770_v1, %v82_v0  ;;  %v93_v61 = vld [vmem:[%s1884_s0 + $0x260] sm:$0xff] }
  0x44   :  { %v493_v15 = vadd.f32 %v393_v62, %v293_v5  ;;  %v494_v16 = vadd.f32 %v394_v63, %v294_v6  ;;  %689 = vst [vmem:[%s1888_s4 + $0x1d0] sm:$0xff] %v589_v9  ;;  %v295_v21 = vadd.f32 %v775_v2, %v188_v12  ;;  %v190_v23 = vmul.f32 %v770_v1, %v83_v7  ;;  %v403_v3 = vld [vmem:[%s1887_s3 + $0x240] sm:$0xff]  ;;  %v94_v5 = vld [vmem:[%s1884_s0 + $0x268] sm:$0xff]  ;;  %v95_v12 = vld [vmem:[%s1884_s0 + $0x270] sm:$0xff] }
  0x45   :  { %690 = vst [vmem:[%s1888_s4 + $0x1d8] sm:$0xff] %v590_v10  ;;  %v592_v20 = vmax.f32 %v492_v11, 0.0  ;;  %v191_v24 = vmul.f32 %v770_v1, %v84_v8  ;;  %691 = vst [vmem:[%s1888_s4 + $0x1e0] sm:$0xff] %v591_v14  ;;  %v296_v29 = vadd.f32 %v775_v2, %v189_v18  ;;  %v192_v32 = vmul.f32 %v770_v1, %v85_v13  ;;  %v404_v8 = vld [vmem:[%s1887_s3 + $0x248] sm:$0xff]  ;;  %v1585_v10 = vld [vmem:[%s1885_s1] ss:$0 sm:$0xff] }
  0x46   :  { %v593_v27 = vmax.f32 %v493_v15, 0.0  ;;  %v594_v28 = vmax.f32 %v494_v16, 0.0  ;;  %v495_v33 = vadd.f32 %v395_v17, %v295_v21  ;;  %v297_v34 = vadd.f32 %v775_v2, %v190_v23  ;;  %v1600_v14 = vld [vmem:[%s1886_s2] ss:$0 sm:$0xff]  ;;  %v405_v16 = vld [vmem:[%s1887_s3 + $0x250] sm:$0xff]  ;;  %v406_v17 = vld [vmem:[%s1887_s3 + $0x258] sm:$0xff] }
  0x47   :  { %692 = vst [vmem:[%s1888_s4 + $0x1e8] sm:$0xff] %v592_v20  ;;  %v298_v35 = vadd.f32 %v775_v2, %v191_v24  ;;  %v193_v37 = vmul.f32 %v770_v1, %v86_v19  ;;  %v496_v38 = vadd.f32 %v396_v22, %v296_v29  ;;  %v299_v39 = vadd.f32 %v775_v2, %v192_v32  ;;  %v407_v22 = vld [vmem:[%s1887_s3 + $0x260] sm:$0xff] }
  0x48   :  { %693 = vst [vmem:[%s1888_s4 + $0x1f0] sm:$0xff] %v593_v27  ;;  %694 = vst [vmem:[%s1888_s4 + $0x1f8] sm:$0xff] %v594_v28  ;;  %v194_v41 = vmul.f32 %v770_v1, %v87_v25  ;;  %v195_v42 = vmul.f32 %v770_v1, %v88_v26  ;;  %v595_v44 = vmax.f32 %v495_v33, 0.0  ;;  %v497_v45 = vadd.f32 %v397_v30, %v297_v34  ;;  %v408_v26 = vld [vmem:[%s1887_s3 + $0x268] sm:$0xff]  ;;  %v97_v29 = vld [vmem:[%s1884_s0 + $0x280] sm:$0xff] }
  0x49   :  { %v498_v46 = vadd.f32 %v398_v31, %v298_v35  ;;  %v300_v47 = vadd.f32 %v775_v2, %v193_v37  ;;  %v596_v51 = vmax.f32 %v496_v38, 0.0  ;;  %v499_v52 = vadd.f32 %v399_v36, %v299_v39  ;;  %v409_v34 = vld [vmem:[%s1887_s3 + $0x270] sm:$0xff]  ;;  %v410_v35 = vld [vmem:[%s1887_s3 + $0x278] sm:$0xff]  ;;  %v98_v36 = vld [vmem:[%s1884_s0 + $0x288] sm:$0xff] }
  0x4a   :  { %v301_v53 = vadd.f32 %v775_v2, %v194_v41  ;;  %v302_v54 = vadd.f32 %v775_v2, %v195_v42  ;;  %695 = vst [vmem:[%s1888_s4 + $0x200] sm:$0xff] %v595_v44  ;;  %v597_v57 = vmax.f32 %v497_v45, 0.0  ;;  %v196_v60 = vmul.f32 %v770_v1, %v89_v43  ;;  %v99_v41 = vld [vmem:[%s1884_s0 + $0x290] sm:$0xff]  ;;  %v100_v42 = vld [vmem:[%s1884_s0 + $0x298] sm:$0xff] }
  0x4b   :  { %v598_v58 = vmax.f32 %v498_v46, 0.0  ;;  %v500_v59 = vadd.f32 %v400_v40, %v300_v47  ;;  %696 = vst [vmem:[%s1888_s4 + $0x208] sm:$0xff] %v596_v51  ;;  %v599_v62 = vmax.f32 %v499_v52, 0.0  ;;  %v197_v4 = vmul.f32 %v770_v1, %v90_v50  ;;  %v101_v47 = vld [vmem:[%s1884_s0 + $0x2a0] sm:$0xff] }
  0x4c   :  { %v501_v63 = vadd.f32 %v401_v48, %v301_v53  ;;  %v502_v0 = vadd.f32 %v402_v49, %v302_v54  ;;  %697 = vst [vmem:[%s1888_s4 + $0x210] sm:$0xff] %v597_v57  ;;  %v303_v7 = vadd.f32 %v775_v2, %v196_v60  ;;  %v198_v9 = vmul.f32 %v770_v1, %v91_v55  ;;  %v96_v2 = vld [vmem:[%s1884_s0 + $0x278] sm:$0xff]  ;;  %v411_v51 = vld [vmem:[%s1887_s3 + $0x280] sm:$0xff]  ;;  %v102_v53 = vld [vmem:[%s1884_s0 + $0x2a8] sm:$0xff] }
  0x4d   :  { %698 = vst [vmem:[%s1888_s4 + $0x218] sm:$0xff] %v598_v58  ;;  %v600_v6 = vmax.f32 %v500_v59, 0.0  ;;  %v199_v11 = vmul.f32 %v1585_v10, %v92_v56  ;;  %699 = vst [vmem:[%s1888_s4 + $0x220] sm:$0xff] %v599_v62  ;;  %v304_v15 = vadd.f32 %v1600_v14, %v197_v4  ;;  %v200_v18 = vmul.f32 %v1585_v10, %v93_v61  ;;  %v412_v56 = vld [vmem:[%s1887_s3 + $0x288] sm:$0xff]  ;;  %v103_v59 = vld [vmem:[%s1884_s0 + $0x2b0] sm:$0xff] }
  0x4e   :  { %v601_v1 = vmax.f32 %v501_v63, 0.0  ;;  %v602_v13 = vmax.f32 %v502_v0, 0.0  ;;  %v503_v19 = vadd.f32 %v403_v3, %v303_v7  ;;  %v305_v20 = vadd.f32 %v1600_v14, %v198_v9  ;;  %v104_v60 = vld [vmem:[%s1884_s0 + $0x2b8] sm:$0xff]  ;;  %v413_v0 = vld [vmem:[%s1887_s3 + $0x290] sm:$0xff] }
  0x4f   :  { %700 = vst [vmem:[%s1888_s4 + $0x228] sm:$0xff] %v600_v6  ;;  %v306_v21 = vadd.f32 %v1600_v14, %v199_v11  ;;  %v201_v23 = vmul.f32 %v1585_v10, %v94_v5  ;;  %v504_v24 = vadd.f32 %v404_v8, %v304_v15  ;;  %v307_v25 = vadd.f32 %v1600_v14, %v200_v18  ;;  %v414_v3 = vld [vmem:[%s1887_s3 + $0x298] sm:$0xff]  ;;  %v415_v8 = vld [vmem:[%s1887_s3 + $0x2a0] sm:$0xff] }
  0x50   :  { %701 = vst [vmem:[%s1888_s4 + $0x230] sm:$0xff] %v601_v1  ;;  %702 = vst [vmem:[%s1888_s4 + $0x238] sm:$0xff] %v602_v13  ;;  %v202_v27 = vmul.f32 %v1585_v10, %v95_v12  ;;  %v203_v28 = vmul.f32 %v1585_v10, %v96_v2  ;;  %v603_v30 = vmax.f32 %v503_v19, 0.0  ;;  %v505_v31 = vadd.f32 %v405_v16, %v305_v20  ;;  %v416_v2 = vld [vmem:[%s1887_s3 + $0x2a8] sm:$0xff]  ;;  %v105_v15 = vld [vmem:[%s1884_s0 + $0x2c0] sm:$0xff] }
  0x51   :  { %v506_v32 = vadd.f32 %v406_v17, %v306_v21  ;;  %v308_v33 = vadd.f32 %v1600_v14, %v201_v23  ;;  %v604_v37 = vmax.f32 %v504_v24, 0.0  ;;  %v507_v38 = vadd.f32 %v407_v22, %v307_v25  ;;  %v417_v20 = vld [vmem:[%s1887_s3 + $0x2b0] sm:$0xff]  ;;  %v418_v21 = vld [vmem:[%s1887_s3 + $0x2b8] sm:$0xff]  ;;  %v106_v22 = vld [vmem:[%s1884_s0 + $0x2c8] sm:$0xff] }
  0x52   :  { %v309_v39 = vadd.f32 %v1600_v14, %v202_v27  ;;  %v310_v40 = vadd.f32 %v1600_v14, %v203_v28  ;;  %703 = vst [vmem:[%s1888_s4 + $0x240] sm:$0xff] %v603_v30  ;;  %v605_v43 = vmax.f32 %v505_v31, 0.0  ;;  %v204_v46 = vmul.f32 %v1585_v10, %v97_v29  ;;  %v107_v27 = vld [vmem:[%s1884_s0 + $0x2d0] sm:$0xff]  ;;  %v108_v28 = vld [vmem:[%s1884_s0 + $0x2d8] sm:$0xff] }
  0x53   :  { %v606_v44 = vmax.f32 %v506_v32, 0.0  ;;  %v508_v45 = vadd.f32 %v408_v26, %v308_v33  ;;  %704 = vst [vmem:[%s1888_s4 + $0x248] sm:$0xff] %v604_v37  ;;  %v607_v48 = vmax.f32 %v507_v38, 0.0  ;;  %v205_v52 = vmul.f32 %v1585_v10, %v98_v36  ;;  %v109_v33 = vld [vmem:[%s1884_s0 + $0x2e0] sm:$0xff] }
  0x54   :  { %v509_v49 = vadd.f32 %v409_v34, %v309_v39  ;;  %v510_v50 = vadd.f32 %v410_v35, %v310_v40  ;;  %705 = vst [vmem:[%s1888_s4 + $0x250] sm:$0xff] %v605_v43  ;;  %v311_v55 = vadd.f32 %v1600_v14, %v204_v46  ;;  %v206_v57 = vmul.f32 %v1585_v10, %v99_v41  ;;  %v419_v37 = vld [vmem:[%s1887_s3 + $0x2c0] sm:$0xff]  ;;  %v110_v39 = vld [vmem:[%s1884_s0 + $0x2e8] sm:$0xff]  ;;  %v112_v46 = vld [vmem:[%s1884_s0 + $0x2f8] sm:$0xff] }
  0x55   :  { %706 = vst [vmem:[%s1888_s4 + $0x258] sm:$0xff] %v606_v44  ;;  %v608_v54 = vmax.f32 %v508_v45, 0.0  ;;  %v207_v58 = vmul.f32 %v1585_v10, %v100_v42  ;;  %707 = vst [vmem:[%s1888_s4 + $0x260] sm:$0xff] %v607_v48  ;;  %v312_v63 = vadd.f32 %v1600_v14, %v205_v52  ;;  %v208_v4 = vmul.f32 %v1585_v10, %v101_v47  ;;  %v420_v42 = vld [vmem:[%s1887_s3 + $0x2c8] sm:$0xff]  ;;  %v111_v45 = vld [vmem:[%s1884_s0 + $0x2f0] sm:$0xff] }
  0x56   :  { %v609_v61 = vmax.f32 %v509_v49, 0.0  ;;  %v610_v62 = vmax.f32 %v510_v50, 0.0  ;;  %v511_v5 = vadd.f32 %v411_v51, %v311_v55  ;;  %v313_v6 = vadd.f32 %v1600_v14, %v206_v57  ;;  %v421_v50 = vld [vmem:[%s1887_s3 + $0x2d0] sm:$0xff]  ;;  %v422_v51 = vld [vmem:[%s1887_s3 + $0x2d8] sm:$0xff] }
  0x57   :  { %708 = vst [vmem:[%s1888_s4 + $0x268] sm:$0xff] %v608_v54  ;;  %v314_v7 = vadd.f32 %v1600_v14, %v207_v58  ;;  %v209_v9 = vmul.f32 %v1585_v10, %v102_v53  ;;  %v512_v11 = vadd.f32 %v412_v56, %v312_v63  ;;  %v315_v12 = vadd.f32 %v1600_v14, %v208_v4  ;;  %v423_v56 = vld [vmem:[%s1887_s3 + $0x2e0] sm:$0xff] }
  0x58   :  { %709 = vst [vmem:[%s1888_s4 + $0x270] sm:$0xff] %v609_v61  ;;  %710 = vst [vmem:[%s1888_s4 + $0x278] sm:$0xff] %v610_v62  ;;  %v210_v1 = vmul.f32 %v1585_v10, %v103_v59  ;;  %v211_v13 = vmul.f32 %v1585_v10, %v104_v60  ;;  %v611_v16 = vmax.f32 %v511_v5, 0.0  ;;  %v513_v17 = vadd.f32 %v413_v0, %v313_v6  ;;  %v424_v60 = vld [vmem:[%s1887_s3 + $0x2e8] sm:$0xff]  ;;  %v113_v63 = vld [vmem:[%s1884_s0 + $0x300] sm:$0xff] }
  0x59   :  { %v514_v18 = vadd.f32 %v414_v3, %v314_v7  ;;  %v316_v19 = vadd.f32 %v1600_v14, %v209_v9  ;;  %v612_v23 = vmax.f32 %v512_v11, 0.0  ;;  %v515_v24 = vadd.f32 %v415_v8, %v315_v12  ;;  %v425_v6 = vld [vmem:[%s1887_s3 + $0x2f0] sm:$0xff]  ;;  %v426_v7 = vld [vmem:[%s1887_s3 + $0x2f8] sm:$0xff]  ;;  %v114_v8 = vld [vmem:[%s1884_s0 + $0x308] sm:$0xff] }
  0x5a   :  { %v317_v25 = vadd.f32 %v1600_v14, %v210_v1  ;;  %v318_v26 = vadd.f32 %v1600_v14, %v211_v13  ;;  %711 = vst [vmem:[%s1888_s4 + $0x280] sm:$0xff] %v611_v16  ;;  %v613_v29 = vmax.f32 %v513_v17, 0.0  ;;  %v212_v32 = vmul.f32 %v1585_v10, %v105_v15  ;;  %v115_v1 = vld [vmem:[%s1884_s0 + $0x310] sm:$0xff]  ;;  %v116_v13 = vld [vmem:[%s1884_s0 + $0x318] sm:$0xff] }
  0x5b   :  { %v614_v30 = vmax.f32 %v514_v18, 0.0  ;;  %v516_v31 = vadd.f32 %v416_v2, %v316_v19  ;;  %712 = vst [vmem:[%s1888_s4 + $0x288] sm:$0xff] %v612_v23  ;;  %v615_v34 = vmax.f32 %v515_v24, 0.0  ;;  %v213_v38 = vmul.f32 %v1585_v10, %v106_v22  ;;  %v427_v22 = vld [vmem:[%s1887_s3 + $0x300] sm:$0xff] }
  0x5c   :  { %v517_v35 = vadd.f32 %v417_v20, %v317_v25  ;;  %v518_v36 = vadd.f32 %v418_v21, %v318_v26  ;;  %713 = vst [vmem:[%s1888_s4 + $0x290] sm:$0xff] %v613_v29  ;;  %v319_v41 = vadd.f32 %v1600_v14, %v212_v32  ;;  %v214_v43 = vmul.f32 %v1585_v10, %v107_v27  ;;  %v428_v26 = vld [vmem:[%s1887_s3 + $0x308] sm:$0xff]  ;;  %v429_v32 = vld [vmem:[%s1887_s3 + $0x310] sm:$0xff] }
  0x5d   :  { %714 = vst [vmem:[%s1888_s4 + $0x298] sm:$0xff] %v614_v30  ;;  %v616_v40 = vmax.f32 %v516_v31, 0.0  ;;  %v215_v44 = vmul.f32 %v1585_v10, %v108_v28  ;;  %715 = vst [vmem:[%s1888_s4 + $0x2a0] sm:$0xff] %v615_v34  ;;  %v320_v49 = vadd.f32 %v1600_v14, %v213_v38  ;;  %v216_v52 = vmul.f32 %v1585_v10, %v109_v33  ;;  %v430_v33 = vld [vmem:[%s1887_s3 + $0x318] sm:$0xff] }
  0x5e   :  { %v617_v47 = vmax.f32 %v517_v35, 0.0  ;;  %v618_v48 = vmax.f32 %v518_v36, 0.0  ;;  %v519_v53 = vadd.f32 %v419_v37, %v319_v41  ;;  %v321_v54 = vadd.f32 %v1600_v14, %v214_v43 }
  0x5f   :  { %716 = vst [vmem:[%s1888_s4 + $0x2a8] sm:$0xff] %v616_v40  ;;  %v322_v55 = vadd.f32 %v1600_v14, %v215_v44  ;;  %v217_v57 = vmul.f32 %v1585_v10, %v110_v39  ;;  %v520_v58 = vadd.f32 %v420_v42, %v320_v49  ;;  %v323_v59 = vadd.f32 %v1600_v14, %v216_v52 }
  0x60   :  { %717 = vst [vmem:[%s1888_s4 + $0x2b0] sm:$0xff] %v617_v47  ;;  %718 = vst [vmem:[%s1888_s4 + $0x2b8] sm:$0xff] %v618_v48  ;;  %v218_v61 = vmul.f32 %v1585_v10, %v111_v45  ;;  %v219_v62 = vmul.f32 %v1585_v10, %v112_v46  ;;  %v619_v0 = vmax.f32 %v519_v53, 0.0  ;;  %v521_v3 = vadd.f32 %v421_v50, %v321_v54 }
  0x61   :  { %v522_v4 = vadd.f32 %v422_v51, %v322_v55  ;;  %v324_v5 = vadd.f32 %v1600_v14, %v217_v57  ;;  %v620_v9 = vmax.f32 %v520_v58, 0.0  ;;  %v523_v11 = vadd.f32 %v423_v56, %v323_v59 }
  0x62   :  { %v325_v12 = vadd.f32 %v1600_v14, %v218_v61  ;;  %v326_v2 = vadd.f32 %v1600_v14, %v219_v62  ;;  %719 = vst [vmem:[%s1888_s4 + $0x2c0] sm:$0xff] %v619_v0  ;;  %v621_v15 = vmax.f32 %v521_v3, 0.0  ;;  %v220_v18 = vmul.f32 %v1585_v10, %v113_v63 }
  0x63   :  { %v622_v16 = vmax.f32 %v522_v4, 0.0  ;;  %v524_v17 = vadd.f32 %v424_v60, %v324_v5  ;;  %720 = vst [vmem:[%s1888_s4 + $0x2c8] sm:$0xff] %v620_v9  ;;  %v623_v19 = vmax.f32 %v523_v11, 0.0  ;;  %v221_v23 = vmul.f32 %v1585_v10, %v114_v8 }
  0x64   :  { %v525_v20 = vadd.f32 %v425_v6, %v325_v12  ;;  %v526_v21 = vadd.f32 %v426_v7, %v326_v2  ;;  %721 = vst [vmem:[%s1888_s4 + $0x2d0] sm:$0xff] %v621_v15  ;;  %v327_v25 = vadd.f32 %v1600_v14, %v220_v18  ;;  %v222_v27 = vmul.f32 %v1585_v10, %v115_v1 }
  0x65   :  { %722 = vst [vmem:[%s1888_s4 + $0x2d8] sm:$0xff] %v622_v16  ;;  %v624_v24 = vmax.f32 %v524_v17, 0.0  ;;  %v223_v28 = vmul.f32 %v1585_v10, %v116_v13  ;;  %723 = vst [vmem:[%s1888_s4 + $0x2e0] sm:$0xff] %v623_v19  ;;  %v328_v31 = vadd.f32 %v1600_v14, %v221_v23 }
  0x66   :  { %v625_v29 = vmax.f32 %v525_v20, 0.0  ;;  %v626_v30 = vmax.f32 %v526_v21, 0.0  ;;  %v527_v10 = vadd.f32 %v427_v22, %v327_v25  ;;  %v329_v34 = vadd.f32 %v1600_v14, %v222_v27 }
  0x67   :  { %724 = vst [vmem:[%s1888_s4 + $0x2e8] sm:$0xff] %v624_v24  ;;  %v330_v35 = vadd.f32 %v1600_v14, %v223_v28  ;;  %v528_v36 = vadd.f32 %v428_v26, %v328_v31 }
  0x68   :  { %725 = vst [vmem:[%s1888_s4 + $0x2f0] sm:$0xff] %v625_v29  ;;  %726 = vst [vmem:[%s1888_s4 + $0x2f8] sm:$0xff] %v626_v30  ;;  %v627_v37 = vmax.f32 %v527_v10, 0.0  ;;  %v529_v38 = vadd.f32 %v429_v32, %v329_v34 }
  0x69   :  { %v530_v39 = vadd.f32 %v430_v33, %v330_v35  ;;  %v628_v40 = vmax.f32 %v528_v36, 0.0 }
  0x6a   :  { %727 = vst [vmem:[%s1888_s4 + $0x300] sm:$0xff] %v627_v37  ;;  %v629_v41 = vmax.f32 %v529_v38, 0.0 }
  0x6b   :  { %v630_v42 = vmax.f32 %v530_v39, 0.0  ;;  %728 = vst [vmem:[%s1888_s4 + $0x308] sm:$0xff] %v628_v40 }
  0x6c   :  { %729 = vst [vmem:[%s1888_s4 + $0x310] sm:$0xff] %v629_v41 }
  0x6d   :  { %730 = vst [vmem:[%s1888_s4 + $0x318] sm:$0xff] %v630_v42 }

</bundles_post_ra>
